<compile_context>
chip_gen: v6e
topology: v6e:2x2x1
jax: 0.10.0
libtpu: 0.0.40
codegen_flags: <defaults>
</compile_context>

<pallas_src>
import math

import jax
import jax.numpy as jnp
from jax.experimental import pallas as pl
from jax.experimental.pallas import tpu as pltpu


def _pair(v):
    return (v, v) if isinstance(v, int) else tuple(v)


def _round_up(x, m):
    return (x + m - 1) // m * m


def _block_vmem_bytes(block_shape, dtype):
    """Conservative VMEM bytes for one block, accounting for (sublane,128) tiling."""
    itemsize = jnp.dtype(dtype).itemsize
    sub = {4: 8, 2: 16, 1: 32}.get(itemsize, 8)
    lead = 1
    for d in block_shape[:-2]:
        lead *= int(d)
    rows = _round_up(int(block_shape[-2]), sub)
    cols = _round_up(int(block_shape[-1]), 128)
    return lead * rows * cols * itemsize


def conv2d_pallas(x_nchw, weight_oihw, bias=None, stride=1, padding=0,
                  dilation=None, groups=1, *, compute_dtype=jnp.bfloat16,
                  tile_oh=8, nchw_out=True):
    """Forward pass of PyTorch Conv2d (groups=1), computed with a Pallas TPU kernel.

    compute_dtype: dtype of the MXU operands (default bf16).  Accumulation is
    always f32 and the bias is added in f32 before the final cast to the
    input's dtype, so this is an explicit, documented precision choice.
    """
    assert groups == 1  # TODO(synk): grouped convolution not implemented.
    sh, sw = _pair(stride)
    ph, pw = _pair(padding)
    dilh, dilw = (1, 1) if dilation is None else _pair(dilation)

    N, Cin, H, W = x_nchw.shape
    Cout, Cin_w, KH, KW = weight_oihw.shape
    assert Cin_w == Cin

    eff_kh = dilh * (KH - 1) + 1
    eff_kw = dilw * (KW - 1) + 1
    OH = (H + 2 * ph - eff_kh) // sh + 1
    OW = (W + 2 * pw - eff_kw) // sw + 1
    assert OH > 0 and OW > 0

    out_dtype = x_nchw.dtype
    LANE = 128
    Np = _round_up(Cout, LANE)                     # lane-dense output channels

    # Output-row tile: keep >= 2 row blocks whenever OH >= 2 so both v7x
    # TensorCores get work even when N == 1.
    TOH = max(1, min(tile_oh, -(-OH // 2)))
    OHp = _round_up(OH, TOH)

    # Padded input extents so every in-kernel read is in bounds, including the
    # (zero) rows used by padded output rows of the last OH tile.
    Hp = max(H + 2 * ph, (OHp - 1) * sh + (KH - 1) * dilh + 1)
    Wq = max(-(-(W + 2 * pw) // sw), ((KW - 1) * dilw) // sw + OW)
    Wp = sw * Wq

    # ---- wrapper: exactly one activation copy (transpose + pad + phase split,
    # fused by XLA).  Phase split along W makes strided taps contiguous:
    #   x_ph[n*sw + p, h, q, c] == x_padded[n, h, q*sw + p, c]
    x = jnp.transpose(x_nchw, (0, 2, 3, 1)).astype(compute_dtype)
    x = jnp.pad(x, ((0, 0), (ph, Hp - H - ph), (pw, Wp - W - pw), (0, 0)))
    x_ph = (x.reshape(N, Hp, Wq, sw, Cin)
             .transpose(0, 3, 1, 2, 4)
             .reshape(N * sw, Hp, Wq, Cin))

    # Weight (O,I,KH,KW) -> (KH*KW, Cin, Np): small, VMEM-resident in the kernel.
    w = jnp.transpose(weight_oihw, (2, 3, 1, 0)).reshape(KH * KW, Cin, Cout)
    w = jnp.pad(w, ((0, 0), (0, 0), (0, Np - Cout))).astype(compute_dtype)

    if bias is None:
        b = jnp.zeros((1, Np), jnp.float32)
    else:
        b = jnp.pad(bias.astype(jnp.float32).reshape(1, Cout),
                    ((0, 0), (0, Np - Cout)))

    def kernel(x_ref, w_ref, b_ref, o_ref):
        # x_ref : (sw, Hp, Wq, Cin)   phase-split padded image of batch n
        # w_ref : (KH*KW, Cin, Np)    resident weight taps
        # b_ref : (1, Np)             resident f32 bias
        # o_ref : (1, TOH, OW, Np)    output row tile
        oh0 = pl.program_id(1) * TOH
        bvec = b_ref[...]                                    # (1, Np) f32
        for r in range(TOH):
            row0 = (oh0 + r) * sh
            acc = jnp.zeros((OW, Np), jnp.float32)
            for i in range(KH):
                row = row0 + i * dilh                        # dynamic scalar
                for j in range(KW):
                    p = (j * dilw) % sw                      # static
                    q0 = (j * dilw) // sw                    # static
                    a = x_ref[p, row, pl.ds(q0, OW), :]      # (OW, Cin)
                    acc = acc + jnp.dot(a, w_ref[i * KW + j],
                                        preferred_element_type=jnp.float32)
            o_ref[0, r] = (acc + bvec).astype(o_ref.dtype)   # dense (OW, Np) store

    grid = (N, OHp // TOH)

    cdt_size = jnp.dtype(compute_dtype).itemsize
    out_size = jnp.dtype(out_dtype).itemsize
    flops = 2 * N * OHp * OW * KH * KW * Cin * Np
    bytes_accessed = (x_ph.size * cdt_size + w.size * cdt_size
                      + b.size * 4 + N * OHp * OW * Np * out_size)

    vmem_need = 2 * (_block_vmem_bytes((sw, Hp, Wq, Cin), compute_dtype)
                     + _block_vmem_bytes((KH * KW, Cin, Np), compute_dtype)
                     + _block_vmem_bytes((1, Np), jnp.float32)
                     + _block_vmem_bytes((1, TOH, OW, Np), out_dtype)) + (2 << 20)
    vmem_limit = int(min(max(vmem_need, 16 * 2**20), 128 * 2**20))

    out_padded = pl.pallas_call(
        kernel,
        out_shape=jax.ShapeDtypeStruct((N, OHp, OW, Np), out_dtype),
        grid=grid,
        in_specs=[
            # Activation: one image (all W phases); re-DMA'd only when n changes.
            pl.BlockSpec((sw, Hp, Wq, Cin), lambda n, m: (n, 0, 0, 0)),
            # Weight / bias: constant index map -> fetched once, VMEM-resident.
            pl.BlockSpec((KH * KW, Cin, Np), lambda n, m: (0, 0, 0)),
            pl.BlockSpec((1, Np), lambda n, m: (0, 0)),
        ],
        out_specs=pl.BlockSpec((1, TOH, OW, Np), lambda n, m: (n, m, 0, 0)),
        compiler_params=pltpu.CompilerParams(
            dimension_semantics=("parallel", "parallel"),
            vmem_limit_bytes=vmem_limit),
        cost_estimate=pl.CostEstimate(
            flops=flops, transcendentals=0, bytes_accessed=bytes_accessed),
    )(x_ph, w, b)

    out = out_padded[:, :OH, :, :Cout]              # (N, OH, OW, Cout) NHWC
    if nchw_out:
        out = jnp.transpose(out, (0, 3, 1, 2))      # PyTorch NCHW layout
    return out


def _reference_conv(x, w, b, stride, padding, dilation):
    sh, sw = _pair(stride)
    ph, pw = _pair(padding)
    dilh, dilw = (1, 1) if dilation is None else _pair(dilation)
    out = jax.lax.conv_general_dilated(
        x, w, window_strides=(sh, sw), padding=[(ph, ph), (pw, pw)],
        rhs_dilation=(dilh, dilw),
        dimension_numbers=("NCHW", "OIHW", "NCHW"),
        precision=jax.lax.Precision.HIGHEST)
    if b is not None:
        out = out + b[None, :, None, None]
    return out


if __name__ == "__main__":
    # Module config: Conv2d(in_channels=4, out_channels=8, kernel_size=3, bias=True)
    N, Cin, H, W = 2, 4, 16, 16
    Cout, KH, KW = 8, 3, 3

    key = jax.random.PRNGKey(0)
    kx, kw_, kb = jax.random.split(key, 3)

    # Deterministic init mirroring Conv2d.reset_parameters():
    # uniform(-stdv, stdv), stdv = 1 / sqrt(kh * kw * in_channels)
    stdv = 1.0 / math.sqrt(KH * KW * Cin)
    weight = jax.random.uniform(kw_, (Cout, Cin, KH, KW), jnp.float32, -stdv, stdv)
    bias = jax.random.uniform(kb, (Cout,), jnp.float32, -stdv, stdv)
    x = jax.random.normal(kx, (N, Cin, H, W), jnp.float32)

    # The kernel computes with bf16 operands + f32 accumulation, so compare
    # against a reference run on bf16-rounded inputs (bias stays f32 in both).
    xb = x.astype(jnp.bfloat16).astype(jnp.float32)
    wb = weight.astype(jnp.bfloat16).astype(jnp.float32)

    tests = [
        dict(stride=1, padding=1, dilation=None, use_bias=True,  shape=(N, Cout, 16, 16)),
        dict(stride=2, padding=1, dilation=None, use_bias=True,  shape=(N, Cout, 8, 8)),
        dict(stride=1, padding=2, dilation=2,    use_bias=False, shape=(N, Cout, 16, 16)),
    ]
    for cfg in tests:
        b_arg = bias if cfg["use_bias"] else None
        out = jax.block_until_ready(conv2d_pallas(
            x, weight, b_arg, stride=cfg["stride"], padding=cfg["padding"],
            dilation=cfg["dilation"]))
        ref = _reference_conv(xb, wb, b_arg, cfg["stride"], cfg["padding"],
                              cfg["dilation"])
        assert out.shape == ref.shape == cfg["shape"], cfg
        assert jnp.allclose(out, ref, rtol=1e-3, atol=1e-4), cfg

    # End-to-end accuracy of the bf16 path vs the true f32 convolution.
    out_bf16 = jax.block_until_ready(conv2d_pallas(x, weight, bias, stride=1, padding=1))
    ref_f32 = _reference_conv(x, weight, bias, 1, 1, None)
    assert jnp.allclose(out_bf16, ref_f32, rtol=2e-2, atol=2e-2)

    # f32 compute path (compute_dtype is an explicit precision knob).
    out_f32 = jax.block_until_ready(conv2d_pallas(
        x, weight, bias, stride=1, padding=1, compute_dtype=jnp.float32))
    assert jnp.allclose(out_f32, ref_f32, rtol=1e-2, atol=1e-2)

    print("KERNEL_OK")
</pallas_src>

<mosaic_0001>
module attributes {stable_mosaic.version = 11 : i64} {
  func.func @kernel(%arg0: i32, %arg1: i32, %arg2: memref<1x18x18x4xbf16, #tpu.memory_space<vmem>>, %arg3: memref<9x4x128xbf16, #tpu.memory_space<vmem>>, %arg4: memref<1x128xf32, #tpu.memory_space<vmem>>, %arg5: memref<1x8x16x128xf32, #tpu.memory_space<vmem>>) attributes {dimension_semantics = [#tpu.dimension_semantics<parallel>, #tpu.dimension_semantics<parallel>], iteration_bounds = array<i64: 2, 2>, scalar_prefetch = 0 : i64, scratch_operands = 0 : i64, tpu.core_type = #tpu.core_type<tc>, window_params = [{transform_indices = @transform_0, window_bounds = array<i64: 1, 18, 18, 4>}, {pipeline_mode = #tpu.pipeline_mode<synchronous>, transform_indices = @transform_1, window_bounds = array<i64: 9, 4, 128>}, {pipeline_mode = #tpu.pipeline_mode<synchronous>, transform_indices = @transform_2, window_bounds = array<i64: 1, 128>}, {transform_indices = @transform_3, window_bounds = array<i64: 1, 8, 16, 128>}]} {
    %c8_i32 = arith.constant 8 : i32
    %0 = arith.muli %arg1, %c8_i32 : i32
    %c0 = arith.constant 0 : index
    %c0_0 = arith.constant 0 : index
    %1 = vector.load %arg4[%c0, %c0_0] : memref<1x128xf32, #tpu.memory_space<vmem>>, vector<1x128xf32>
    %c0_i32 = arith.constant 0 : i32
    %2 = arith.addi %0, %c0_i32 : i32
    %c1_i32 = arith.constant 1 : i32
    %3 = arith.muli %2, %c1_i32 : i32
    %cst = arith.constant 0.000000e+00 : f32
    %4 = vector.broadcast %cst : f32 to vector<16x128xf32>
    %c0_i32_1 = arith.constant 0 : i32
    %5 = arith.addi %3, %c0_i32_1 : i32
    %c0_2 = arith.constant 0 : index
    %6 = arith.index_cast %5 : i32 to index
    %c0_3 = arith.constant 0 : index
    %c0_4 = arith.constant 0 : index
    %7 = vector.load %arg2[%c0_2, %6, %c0_3, %c0_4] : memref<1x18x18x4xbf16, #tpu.memory_space<vmem>>, vector<1x1x16x4xbf16>
    %8 = vector.shape_cast %7 : vector<1x1x16x4xbf16> to vector<16x4xbf16>
    %c0_5 = arith.constant 0 : index
    %c0_6 = arith.constant 0 : index
    %c0_7 = arith.constant 0 : index
    %9 = vector.load %arg3[%c0_5, %c0_6, %c0_7] : memref<9x4x128xbf16, #tpu.memory_space<vmem>>, vector<1x4x128xbf16>
    %10 = vector.shape_cast %9 : vector<1x4x128xbf16> to vector<4x128xbf16>
    %cst_8 = arith.constant dense<0.000000e+00> : vector<16x128xf32>
    %11 = tpu.matmul %8, %10, %cst_8 {dimension_numbers = #tpu.dot_dimension_numbers<[1], [0], [0], [1], [0, 0, 1, 1], [], []>} : vector<16x4xbf16>, vector<4x128xbf16>, vector<16x128xf32> -> vector<16x128xf32>
    %12 = arith.addf %4, %11 : vector<16x128xf32>
    %c0_9 = arith.constant 0 : index
    %13 = arith.index_cast %5 : i32 to index
    %c1 = arith.constant 1 : index
    %c0_10 = arith.constant 0 : index
    %14 = vector.load %arg2[%c0_9, %13, %c1, %c0_10] : memref<1x18x18x4xbf16, #tpu.memory_space<vmem>>, vector<1x1x16x4xbf16>
    %15 = vector.shape_cast %14 : vector<1x1x16x4xbf16> to vector<16x4xbf16>
    %c1_11 = arith.constant 1 : index
    %c0_12 = arith.constant 0 : index
    %c0_13 = arith.constant 0 : index
    %16 = vector.load %arg3[%c1_11, %c0_12, %c0_13] : memref<9x4x128xbf16, #tpu.memory_space<vmem>>, vector<1x4x128xbf16>
    %17 = vector.shape_cast %16 : vector<1x4x128xbf16> to vector<4x128xbf16>
    %cst_14 = arith.constant dense<0.000000e+00> : vector<16x128xf32>
    %18 = tpu.matmul %15, %17, %cst_14 {dimension_numbers = #tpu.dot_dimension_numbers<[1], [0], [0], [1], [0, 0, 1, 1], [], []>} : vector<16x4xbf16>, vector<4x128xbf16>, vector<16x128xf32> -> vector<16x128xf32>
    %19 = arith.addf %12, %18 : vector<16x128xf32>
    %c0_15 = arith.constant 0 : index
    %20 = arith.index_cast %5 : i32 to index
    %c2 = arith.constant 2 : index
    %c0_16 = arith.constant 0 : index
    %21 = vector.load %arg2[%c0_15, %20, %c2, %c0_16] : memref<1x18x18x4xbf16, #tpu.memory_space<vmem>>, vector<1x1x16x4xbf16>
    %22 = vector.shape_cast %21 : vector<1x1x16x4xbf16> to vector<16x4xbf16>
    %c2_17 = arith.constant 2 : index
    %c0_18 = arith.constant 0 : index
    %c0_19 = arith.constant 0 : index
    %23 = vector.load %arg3[%c2_17, %c0_18, %c0_19] : memref<9x4x128xbf16, #tpu.memory_space<vmem>>, vector<1x4x128xbf16>
    %24 = vector.shape_cast %23 : vector<1x4x128xbf16> to vector<4x128xbf16>
    %cst_20 = arith.constant dense<0.000000e+00> : vector<16x128xf32>
    %25 = tpu.matmul %22, %24, %cst_20 {dimension_numbers = #tpu.dot_dimension_numbers<[1], [0], [0], [1], [0, 0, 1, 1], [], []>} : vector<16x4xbf16>, vector<4x128xbf16>, vector<16x128xf32> -> vector<16x128xf32>
    %26 = arith.addf %19, %25 : vector<16x128xf32>
    %c1_i32_21 = arith.constant 1 : i32
    %27 = arith.addi %3, %c1_i32_21 : i32
    %c0_22 = arith.constant 0 : index
    %28 = arith.index_cast %27 : i32 to index
    %c0_23 = arith.constant 0 : index
    %c0_24 = arith.constant 0 : index
    %29 = vector.load %arg2[%c0_22, %28, %c0_23, %c0_24] : memref<1x18x18x4xbf16, #tpu.memory_space<vmem>>, vector<1x1x16x4xbf16>
    %30 = vector.shape_cast %29 : vector<1x1x16x4xbf16> to vector<16x4xbf16>
    %c3 = arith.constant 3 : index
    %c0_25 = arith.constant 0 : index
    %c0_26 = arith.constant 0 : index
    %31 = vector.load %arg3[%c3, %c0_25, %c0_26] : memref<9x4x128xbf16, #tpu.memory_space<vmem>>, vector<1x4x128xbf16>
    %32 = vector.shape_cast %31 : vector<1x4x128xbf16> to vector<4x128xbf16>
    %cst_27 = arith.constant dense<0.000000e+00> : vector<16x128xf32>
    %33 = tpu.matmul %30, %32, %cst_27 {dimension_numbers = #tpu.dot_dimension_numbers<[1], [0], [0], [1], [0, 0, 1, 1], [], []>} : vector<16x4xbf16>, vector<4x128xbf16>, vector<16x128xf32> -> vector<16x128xf32>
    %34 = arith.addf %26, %33 : vector<16x128xf32>
    %c0_28 = arith.constant 0 : index
    %35 = arith.index_cast %27 : i32 to index
    %c1_29 = arith.constant 1 : index
    %c0_30 = arith.constant 0 : index
    %36 = vector.load %arg2[%c0_28, %35, %c1_29, %c0_30] : memref<1x18x18x4xbf16, #tpu.memory_space<vmem>>, vector<1x1x16x4xbf16>
    %37 = vector.shape_cast %36 : vector<1x1x16x4xbf16> to vector<16x4xbf16>
    %c4 = arith.constant 4 : index
    %c0_31 = arith.constant 0 : index
    %c0_32 = arith.constant 0 : index
    %38 = vector.load %arg3[%c4, %c0_31, %c0_32] : memref<9x4x128xbf16, #tpu.memory_space<vmem>>, vector<1x4x128xbf16>
    %39 = vector.shape_cast %38 : vector<1x4x128xbf16> to vector<4x128xbf16>
    %cst_33 = arith.constant dense<0.000000e+00> : vector<16x128xf32>
    %40 = tpu.matmul %37, %39, %cst_33 {dimension_numbers = #tpu.dot_dimension_numbers<[1], [0], [0], [1], [0, 0, 1, 1], [], []>} : vector<16x4xbf16>, vector<4x128xbf16>, vector<16x128xf32> -> vector<16x128xf32>
    %41 = arith.addf %34, %40 : vector<16x128xf32>
    %c0_34 = arith.constant 0 : index
    %42 = arith.index_cast %27 : i32 to index
    %c2_35 = arith.constant 2 : index
    %c0_36 = arith.constant 0 : index
    %43 = vector.load %arg2[%c0_34, %42, %c2_35, %c0_36] : memref<1x18x18x4xbf16, #tpu.memory_space<vmem>>, vector<1x1x16x4xbf16>
    %44 = vector.shape_cast %43 : vector<1x1x16x4xbf16> to vector<16x4xbf16>
    %c5 = arith.constant 5 : index
    %c0_37 = arith.constant 0 : index
    %c0_38 = arith.constant 0 : index
    %45 = vector.load %arg3[%c5, %c0_37, %c0_38] : memref<9x4x128xbf16, #tpu.memory_space<vmem>>, vector<1x4x128xbf16>
    %46 = vector.shape_cast %45 : vector<1x4x128xbf16> to vector<4x128xbf16>
    %cst_39 = arith.constant dense<0.000000e+00> : vector<16x128xf32>
    %47 = tpu.matmul %44, %46, %cst_39 {dimension_numbers = #tpu.dot_dimension_numbers<[1], [0], [0], [1], [0, 0, 1, 1], [], []>} : vector<16x4xbf16>, vector<4x128xbf16>, vector<16x128xf32> -> vector<16x128xf32>
    %48 = arith.addf %41, %47 : vector<16x128xf32>
    %c2_i32 = arith.constant 2 : i32
    %49 = arith.addi %3, %c2_i32 : i32
    %c0_40 = arith.constant 0 : index
    %50 = arith.index_cast %49 : i32 to index
    %c0_41 = arith.constant 0 : index
    %c0_42 = arith.constant 0 : index
    %51 = vector.load %arg2[%c0_40, %50, %c0_41, %c0_42] : memref<1x18x18x4xbf16, #tpu.memory_space<vmem>>, vector<1x1x16x4xbf16>
    %52 = vector.shape_cast %51 : vector<1x1x16x4xbf16> to vector<16x4xbf16>
    %c6 = arith.constant 6 : index
    %c0_43 = arith.constant 0 : index
    %c0_44 = arith.constant 0 : index
    %53 = vector.load %arg3[%c6, %c0_43, %c0_44] : memref<9x4x128xbf16, #tpu.memory_space<vmem>>, vector<1x4x128xbf16>
    %54 = vector.shape_cast %53 : vector<1x4x128xbf16> to vector<4x128xbf16>
    %cst_45 = arith.constant dense<0.000000e+00> : vector<16x128xf32>
    %55 = tpu.matmul %52, %54, %cst_45 {dimension_numbers = #tpu.dot_dimension_numbers<[1], [0], [0], [1], [0, 0, 1, 1], [], []>} : vector<16x4xbf16>, vector<4x128xbf16>, vector<16x128xf32> -> vector<16x128xf32>
    %56 = arith.addf %48, %55 : vector<16x128xf32>
    %c0_46 = arith.constant 0 : index
    %57 = arith.index_cast %49 : i32 to index
    %c1_47 = arith.constant 1 : index
    %c0_48 = arith.constant 0 : index
    %58 = vector.load %arg2[%c0_46, %57, %c1_47, %c0_48] : memref<1x18x18x4xbf16, #tpu.memory_space<vmem>>, vector<1x1x16x4xbf16>
    %59 = vector.shape_cast %58 : vector<1x1x16x4xbf16> to vector<16x4xbf16>
    %c7 = arith.constant 7 : index
    %c0_49 = arith.constant 0 : index
    %c0_50 = arith.constant 0 : index
    %60 = vector.load %arg3[%c7, %c0_49, %c0_50] : memref<9x4x128xbf16, #tpu.memory_space<vmem>>, vector<1x4x128xbf16>
    %61 = vector.shape_cast %60 : vector<1x4x128xbf16> to vector<4x128xbf16>
    %cst_51 = arith.constant dense<0.000000e+00> : vector<16x128xf32>
    %62 = tpu.matmul %59, %61, %cst_51 {dimension_numbers = #tpu.dot_dimension_numbers<[1], [0], [0], [1], [0, 0, 1, 1], [], []>} : vector<16x4xbf16>, vector<4x128xbf16>, vector<16x128xf32> -> vector<16x128xf32>
    %63 = arith.addf %56, %62 : vector<16x128xf32>
    %c0_52 = arith.constant 0 : index
    %64 = arith.index_cast %49 : i32 to index
    %c2_53 = arith.constant 2 : index
    %c0_54 = arith.constant 0 : index
    %65 = vector.load %arg2[%c0_52, %64, %c2_53, %c0_54] : memref<1x18x18x4xbf16, #tpu.memory_space<vmem>>, vector<1x1x16x4xbf16>
    %66 = vector.shape_cast %65 : vector<1x1x16x4xbf16> to vector<16x4xbf16>
    %c8 = arith.constant 8 : index
    %c0_55 = arith.constant 0 : index
    %c0_56 = arith.constant 0 : index
    %67 = vector.load %arg3[%c8, %c0_55, %c0_56] : memref<9x4x128xbf16, #tpu.memory_space<vmem>>, vector<1x4x128xbf16>
    %68 = vector.shape_cast %67 : vector<1x4x128xbf16> to vector<4x128xbf16>
    %cst_57 = arith.constant dense<0.000000e+00> : vector<16x128xf32>
    %69 = tpu.matmul %66, %68, %cst_57 {dimension_numbers = #tpu.dot_dimension_numbers<[1], [0], [0], [1], [0, 0, 1, 1], [], []>} : vector<16x4xbf16>, vector<4x128xbf16>, vector<16x128xf32> -> vector<16x128xf32>
    %70 = arith.addf %63, %69 : vector<16x128xf32>
    %71 = vector.broadcast %1 : vector<1x128xf32> to vector<16x128xf32>
    %72 = arith.addf %70, %71 : vector<16x128xf32>
    %c0_58 = arith.constant 0 : index
    %c0_59 = arith.constant 0 : index
    %c0_60 = arith.constant 0 : index
    %c0_61 = arith.constant 0 : index
    %73 = vector.load %arg5[%c0_58, %c0_59, %c0_60, %c0_61] : memref<1x8x16x128xf32, #tpu.memory_space<vmem>>, vector<1x1x16x128xf32>
    %74 = vector.shape_cast %73 : vector<1x1x16x128xf32> to vector<16x128xf32>
    %75 = vector.shape_cast %72 : vector<16x128xf32> to vector<1x1x16x128xf32>
    tpu.vector_store %arg5[%c0_58, %c0_59, %c0_60, %c0_61], %75 {strides = array<i32>} : memref<1x8x16x128xf32, #tpu.memory_space<vmem>>, vector<1x1x16x128xf32>,
    %c1_i32_62 = arith.constant 1 : i32
    %76 = arith.addi %0, %c1_i32_62 : i32
    %c1_i32_63 = arith.constant 1 : i32
    %77 = arith.muli %76, %c1_i32_63 : i32
    %cst_64 = arith.constant 0.000000e+00 : f32
    %78 = vector.broadcast %cst_64 : f32 to vector<16x128xf32>
    %c0_i32_65 = arith.constant 0 : i32
    %79 = arith.addi %77, %c0_i32_65 : i32
    %c0_66 = arith.constant 0 : index
    %80 = arith.index_cast %79 : i32 to index
    %c0_67 = arith.constant 0 : index
    %c0_68 = arith.constant 0 : index
    %81 = vector.load %arg2[%c0_66, %80, %c0_67, %c0_68] : memref<1x18x18x4xbf16, #tpu.memory_space<vmem>>, vector<1x1x16x4xbf16>
    %82 = vector.shape_cast %81 : vector<1x1x16x4xbf16> to vector<16x4xbf16>
    %c0_69 = arith.constant 0 : index
    %c0_70 = arith.constant 0 : index
    %c0_71 = arith.constant 0 : index
    %83 = vector.load %arg3[%c0_69, %c0_70, %c0_71] : memref<9x4x128xbf16, #tpu.memory_space<vmem>>, vector<1x4x128xbf16>
    %84 = vector.shape_cast %83 : vector<1x4x128xbf16> to vector<4x128xbf16>
    %cst_72 = arith.constant dense<0.000000e+00> : vector<16x128xf32>
    %85 = tpu.matmul %82, %84, %cst_72 {dimension_numbers = #tpu.dot_dimension_numbers<[1], [0], [0], [1], [0, 0, 1, 1], [], []>} : vector<16x4xbf16>, vector<4x128xbf16>, vector<16x128xf32> -> vector<16x128xf32>
    %86 = arith.addf %78, %85 : vector<16x128xf32>
    %c0_73 = arith.constant 0 : index
    %87 = arith.index_cast %79 : i32 to index
    %c1_74 = arith.constant 1 : index
    %c0_75 = arith.constant 0 : index
    %88 = vector.load %arg2[%c0_73, %87, %c1_74, %c0_75] : memref<1x18x18x4xbf16, #tpu.memory_space<vmem>>, vector<1x1x16x4xbf16>
    %89 = vector.shape_cast %88 : vector<1x1x16x4xbf16> to vector<16x4xbf16>
    %c1_76 = arith.constant 1 : index
    %c0_77 = arith.constant 0 : index
    %c0_78 = arith.constant 0 : index
    %90 = vector.load %arg3[%c1_76, %c0_77, %c0_78] : memref<9x4x128xbf16, #tpu.memory_space<vmem>>, vector<1x4x128xbf16>
    %91 = vector.shape_cast %90 : vector<1x4x128xbf16> to vector<4x128xbf16>
    %cst_79 = arith.constant dense<0.000000e+00> : vector<16x128xf32>
    %92 = tpu.matmul %89, %91, %cst_79 {dimension_numbers = #tpu.dot_dimension_numbers<[1], [0], [0], [1], [0, 0, 1, 1], [], []>} : vector<16x4xbf16>, vector<4x128xbf16>, vector<16x128xf32> -> vector<16x128xf32>
    %93 = arith.addf %86, %92 : vector<16x128xf32>
    %c0_80 = arith.constant 0 : index
    %94 = arith.index_cast %79 : i32 to index
    %c2_81 = arith.constant 2 : index
    %c0_82 = arith.constant 0 : index
    %95 = vector.load %arg2[%c0_80, %94, %c2_81, %c0_82] : memref<1x18x18x4xbf16, #tpu.memory_space<vmem>>, vector<1x1x16x4xbf16>
    %96 = vector.shape_cast %95 : vector<1x1x16x4xbf16> to vector<16x4xbf16>
    %c2_83 = arith.constant 2 : index
    %c0_84 = arith.constant 0 : index
    %c0_85 = arith.constant 0 : index
    %97 = vector.load %arg3[%c2_83, %c0_84, %c0_85] : memref<9x4x128xbf16, #tpu.memory_space<vmem>>, vector<1x4x128xbf16>
    %98 = vector.shape_cast %97 : vector<1x4x128xbf16> to vector<4x128xbf16>
    %cst_86 = arith.constant dense<0.000000e+00> : vector<16x128xf32>
    %99 = tpu.matmul %96, %98, %cst_86 {dimension_numbers = #tpu.dot_dimension_numbers<[1], [0], [0], [1], [0, 0, 1, 1], [], []>} : vector<16x4xbf16>, vector<4x128xbf16>, vector<16x128xf32> -> vector<16x128xf32>
    %100 = arith.addf %93, %99 : vector<16x128xf32>
    %c1_i32_87 = arith.constant 1 : i32
    %101 = arith.addi %77, %c1_i32_87 : i32
    %c0_88 = arith.constant 0 : index
    %102 = arith.index_cast %101 : i32 to index
    %c0_89 = arith.constant 0 : index
    %c0_90 = arith.constant 0 : index
    %103 = vector.load %arg2[%c0_88, %102, %c0_89, %c0_90] : memref<1x18x18x4xbf16, #tpu.memory_space<vmem>>, vector<1x1x16x4xbf16>
    %104 = vector.shape_cast %103 : vector<1x1x16x4xbf16> to vector<16x4xbf16>
    %c3_91 = arith.constant 3 : index
    %c0_92 = arith.constant 0 : index
    %c0_93 = arith.constant 0 : index
    %105 = vector.load %arg3[%c3_91, %c0_92, %c0_93] : memref<9x4x128xbf16, #tpu.memory_space<vmem>>, vector<1x4x128xbf16>
    %106 = vector.shape_cast %105 : vector<1x4x128xbf16> to vector<4x128xbf16>
    %cst_94 = arith.constant dense<0.000000e+00> : vector<16x128xf32>
    %107 = tpu.matmul %104, %106, %cst_94 {dimension_numbers = #tpu.dot_dimension_numbers<[1], [0], [0], [1], [0, 0, 1, 1], [], []>} : vector<16x4xbf16>, vector<4x128xbf16>, vector<16x128xf32> -> vector<16x128xf32>
    %108 = arith.addf %100, %107 : vector<16x128xf32>
    %c0_95 = arith.constant 0 : index
    %109 = arith.index_cast %101 : i32 to index
    %c1_96 = arith.constant 1 : index
    %c0_97 = arith.constant 0 : index
    %110 = vector.load %arg2[%c0_95, %109, %c1_96, %c0_97] : memref<1x18x18x4xbf16, #tpu.memory_space<vmem>>, vector<1x1x16x4xbf16>
    %111 = vector.shape_cast %110 : vector<1x1x16x4xbf16> to vector<16x4xbf16>
    %c4_98 = arith.constant 4 : index
    %c0_99 = arith.constant 0 : index
    %c0_100 = arith.constant 0 : index
    %112 = vector.load %arg3[%c4_98, %c0_99, %c0_100] : memref<9x4x128xbf16, #tpu.memory_space<vmem>>, vector<1x4x128xbf16>
    %113 = vector.shape_cast %112 : vector<1x4x128xbf16> to vector<4x128xbf16>
    %cst_101 = arith.constant dense<0.000000e+00> : vector<16x128xf32>
    %114 = tpu.matmul %111, %113, %cst_101 {dimension_numbers = #tpu.dot_dimension_numbers<[1], [0], [0], [1], [0, 0, 1, 1], [], []>} : vector<16x4xbf16>, vector<4x128xbf16>, vector<16x128xf32> -> vector<16x128xf32>
    %115 = arith.addf %108, %114 : vector<16x128xf32>
    %c0_102 = arith.constant 0 : index
    %116 = arith.index_cast %101 : i32 to index
    %c2_103 = arith.constant 2 : index
    %c0_104 = arith.constant 0 : index
    %117 = vector.load %arg2[%c0_102, %116, %c2_103, %c0_104] : memref<1x18x18x4xbf16, #tpu.memory_space<vmem>>, vector<1x1x16x4xbf16>
    %118 = vector.shape_cast %117 : vector<1x1x16x4xbf16> to vector<16x4xbf16>
    %c5_105 = arith.constant 5 : index
    %c0_106 = arith.constant 0 : index
    %c0_107 = arith.constant 0 : index
    %119 = vector.load %arg3[%c5_105, %c0_106, %c0_107] : memref<9x4x128xbf16, #tpu.memory_space<vmem>>, vector<1x4x128xbf16>
    %120 = vector.shape_cast %119 : vector<1x4x128xbf16> to vector<4x128xbf16>
    %cst_108 = arith.constant dense<0.000000e+00> : vector<16x128xf32>
    %121 = tpu.matmul %118, %120, %cst_108 {dimension_numbers = #tpu.dot_dimension_numbers<[1], [0], [0], [1], [0, 0, 1, 1], [], []>} : vector<16x4xbf16>, vector<4x128xbf16>, vector<16x128xf32> -> vector<16x128xf32>
    %122 = arith.addf %115, %121 : vector<16x128xf32>
    %c2_i32_109 = arith.constant 2 : i32
    %123 = arith.addi %77, %c2_i32_109 : i32
    %c0_110 = arith.constant 0 : index
    %124 = arith.index_cast %123 : i32 to index
    %c0_111 = arith.constant 0 : index
    %c0_112 = arith.constant 0 : index
    %125 = vector.load %arg2[%c0_110, %124, %c0_111, %c0_112] : memref<1x18x18x4xbf16, #tpu.memory_space<vmem>>, vector<1x1x16x4xbf16>
    %126 = vector.shape_cast %125 : vector<1x1x16x4xbf16> to vector<16x4xbf16>
    %c6_113 = arith.constant 6 : index
    %c0_114 = arith.constant 0 : index
    %c0_115 = arith.constant 0 : index
    %127 = vector.load %arg3[%c6_113, %c0_114, %c0_115] : memref<9x4x128xbf16, #tpu.memory_space<vmem>>, vector<1x4x128xbf16>
    %128 = vector.shape_cast %127 : vector<1x4x128xbf16> to vector<4x128xbf16>
    %cst_116 = arith.constant dense<0.000000e+00> : vector<16x128xf32>
    %129 = tpu.matmul %126, %128, %cst_116 {dimension_numbers = #tpu.dot_dimension_numbers<[1], [0], [0], [1], [0, 0, 1, 1], [], []>} : vector<16x4xbf16>, vector<4x128xbf16>, vector<16x128xf32> -> vector<16x128xf32>
    %130 = arith.addf %122, %129 : vector<16x128xf32>
    %c0_117 = arith.constant 0 : index
    %131 = arith.index_cast %123 : i32 to index
    %c1_118 = arith.constant 1 : index
    %c0_119 = arith.constant 0 : index
    %132 = vector.load %arg2[%c0_117, %131, %c1_118, %c0_119] : memref<1x18x18x4xbf16, #tpu.memory_space<vmem>>, vector<1x1x16x4xbf16>
    %133 = vector.shape_cast %132 : vector<1x1x16x4xbf16> to vector<16x4xbf16>
    %c7_120 = arith.constant 7 : index
    %c0_121 = arith.constant 0 : index
    %c0_122 = arith.constant 0 : index
    %134 = vector.load %arg3[%c7_120, %c0_121, %c0_122] : memref<9x4x128xbf16, #tpu.memory_space<vmem>>, vector<1x4x128xbf16>
    %135 = vector.shape_cast %134 : vector<1x4x128xbf16> to vector<4x128xbf16>
    %cst_123 = arith.constant dense<0.000000e+00> : vector<16x128xf32>
    %136 = tpu.matmul %133, %135, %cst_123 {dimension_numbers = #tpu.dot_dimension_numbers<[1], [0], [0], [1], [0, 0, 1, 1], [], []>} : vector<16x4xbf16>, vector<4x128xbf16>, vector<16x128xf32> -> vector<16x128xf32>
    %137 = arith.addf %130, %136 : vector<16x128xf32>
    %c0_124 = arith.constant 0 : index
    %138 = arith.index_cast %123 : i32 to index
    %c2_125 = arith.constant 2 : index
    %c0_126 = arith.constant 0 : index
    %139 = vector.load %arg2[%c0_124, %138, %c2_125, %c0_126] : memref<1x18x18x4xbf16, #tpu.memory_space<vmem>>, vector<1x1x16x4xbf16>
    %140 = vector.shape_cast %139 : vector<1x1x16x4xbf16> to vector<16x4xbf16>
    %c8_127 = arith.constant 8 : index
    %c0_128 = arith.constant 0 : index
    %c0_129 = arith.constant 0 : index
    %141 = vector.load %arg3[%c8_127, %c0_128, %c0_129] : memref<9x4x128xbf16, #tpu.memory_space<vmem>>, vector<1x4x128xbf16>
    %142 = vector.shape_cast %141 : vector<1x4x128xbf16> to vector<4x128xbf16>
    %cst_130 = arith.constant dense<0.000000e+00> : vector<16x128xf32>
    %143 = tpu.matmul %140, %142, %cst_130 {dimension_numbers = #tpu.dot_dimension_numbers<[1], [0], [0], [1], [0, 0, 1, 1], [], []>} : vector<16x4xbf16>, vector<4x128xbf16>, vector<16x128xf32> -> vector<16x128xf32>
    %144 = arith.addf %137, %143 : vector<16x128xf32>
    %145 = vector.broadcast %1 : vector<1x128xf32> to vector<16x128xf32>
    %146 = arith.addf %144, %145 : vector<16x128xf32>
    %c0_131 = arith.constant 0 : index
    %c1_132 = arith.constant 1 : index
    %c0_133 = arith.constant 0 : index
    %c0_134 = arith.constant 0 : index
    %147 = vector.load %arg5[%c0_131, %c1_132, %c0_133, %c0_134] : memref<1x8x16x128xf32, #tpu.memory_space<vmem>>, vector<1x1x16x128xf32>
    %148 = vector.shape_cast %147 : vector<1x1x16x128xf32> to vector<16x128xf32>
    %149 = vector.shape_cast %146 : vector<16x128xf32> to vector<1x1x16x128xf32>
    tpu.vector_store %arg5[%c0_131, %c1_132, %c0_133, %c0_134], %149 {strides = array<i32>} : memref<1x8x16x128xf32, #tpu.memory_space<vmem>>, vector<1x1x16x128xf32>,
    %c2_i32_135 = arith.constant 2 : i32
    %150 = arith.addi %0, %c2_i32_135 : i32
    %c1_i32_136 = arith.constant 1 : i32
    %151 = arith.muli %150, %c1_i32_136 : i32
    %cst_137 = arith.constant 0.000000e+00 : f32
    %152 = vector.broadcast %cst_137 : f32 to vector<16x128xf32>
    %c0_i32_138 = arith.constant 0 : i32
    %153 = arith.addi %151, %c0_i32_138 : i32
    %c0_139 = arith.constant 0 : index
    %154 = arith.index_cast %153 : i32 to index
    %c0_140 = arith.constant 0 : index
    %c0_141 = arith.constant 0 : index
    %155 = vector.load %arg2[%c0_139, %154, %c0_140, %c0_141] : memref<1x18x18x4xbf16, #tpu.memory_space<vmem>>, vector<1x1x16x4xbf16>
    %156 = vector.shape_cast %155 : vector<1x1x16x4xbf16> to vector<16x4xbf16>
    %c0_142 = arith.constant 0 : index
    %c0_143 = arith.constant 0 : index
    %c0_144 = arith.constant 0 : index
    %157 = vector.load %arg3[%c0_142, %c0_143, %c0_144] : memref<9x4x128xbf16, #tpu.memory_space<vmem>>, vector<1x4x128xbf16>
    %158 = vector.shape_cast %157 : vector<1x4x128xbf16> to vector<4x128xbf16>
    %cst_145 = arith.constant dense<0.000000e+00> : vector<16x128xf32>
    %159 = tpu.matmul %156, %158, %cst_145 {dimension_numbers = #tpu.dot_dimension_numbers<[1], [0], [0], [1], [0, 0, 1, 1], [], []>} : vector<16x4xbf16>, vector<4x128xbf16>, vector<16x128xf32> -> vector<16x128xf32>
    %160 = arith.addf %152, %159 : vector<16x128xf32>
    %c0_146 = arith.constant 0 : index
    %161 = arith.index_cast %153 : i32 to index
    %c1_147 = arith.constant 1 : index
    %c0_148 = arith.constant 0 : index
    %162 = vector.load %arg2[%c0_146, %161, %c1_147, %c0_148] : memref<1x18x18x4xbf16, #tpu.memory_space<vmem>>, vector<1x1x16x4xbf16>
    %163 = vector.shape_cast %162 : vector<1x1x16x4xbf16> to vector<16x4xbf16>
    %c1_149 = arith.constant 1 : index
    %c0_150 = arith.constant 0 : index
    %c0_151 = arith.constant 0 : index
    %164 = vector.load %arg3[%c1_149, %c0_150, %c0_151] : memref<9x4x128xbf16, #tpu.memory_space<vmem>>, vector<1x4x128xbf16>
    %165 = vector.shape_cast %164 : vector<1x4x128xbf16> to vector<4x128xbf16>
    %cst_152 = arith.constant dense<0.000000e+00> : vector<16x128xf32>
    %166 = tpu.matmul %163, %165, %cst_152 {dimension_numbers = #tpu.dot_dimension_numbers<[1], [0], [0], [1], [0, 0, 1, 1], [], []>} : vector<16x4xbf16>, vector<4x128xbf16>, vector<16x128xf32> -> vector<16x128xf32>
    %167 = arith.addf %160, %166 : vector<16x128xf32>
    %c0_153 = arith.constant 0 : index
    %168 = arith.index_cast %153 : i32 to index
    %c2_154 = arith.constant 2 : index
    %c0_155 = arith.constant 0 : index
    %169 = vector.load %arg2[%c0_153, %168, %c2_154, %c0_155] : memref<1x18x18x4xbf16, #tpu.memory_space<vmem>>, vector<1x1x16x4xbf16>
    %170 = vector.shape_cast %169 : vector<1x1x16x4xbf16> to vector<16x4xbf16>
    %c2_156 = arith.constant 2 : index
    %c0_157 = arith.constant 0 : index
    %c0_158 = arith.constant 0 : index
    %171 = vector.load %arg3[%c2_156, %c0_157, %c0_158] : memref<9x4x128xbf16, #tpu.memory_space<vmem>>, vector<1x4x128xbf16>
    %172 = vector.shape_cast %171 : vector<1x4x128xbf16> to vector<4x128xbf16>
    %cst_159 = arith.constant dense<0.000000e+00> : vector<16x128xf32>
    %173 = tpu.matmul %170, %172, %cst_159 {dimension_numbers = #tpu.dot_dimension_numbers<[1], [0], [0], [1], [0, 0, 1, 1], [], []>} : vector<16x4xbf16>, vector<4x128xbf16>, vector<16x128xf32> -> vector<16x128xf32>
    %174 = arith.addf %167, %173 : vector<16x128xf32>
    %c1_i32_160 = arith.constant 1 : i32
    %175 = arith.addi %151, %c1_i32_160 : i32
    %c0_161 = arith.constant 0 : index
    %176 = arith.index_cast %175 : i32 to index
    %c0_162 = arith.constant 0 : index
    %c0_163 = arith.constant 0 : index
    %177 = vector.load %arg2[%c0_161, %176, %c0_162, %c0_163] : memref<1x18x18x4xbf16, #tpu.memory_space<vmem>>, vector<1x1x16x4xbf16>
    %178 = vector.shape_cast %177 : vector<1x1x16x4xbf16> to vector<16x4xbf16>
    %c3_164 = arith.constant 3 : index
    %c0_165 = arith.constant 0 : index
    %c0_166 = arith.constant 0 : index
    %179 = vector.load %arg3[%c3_164, %c0_165, %c0_166] : memref<9x4x128xbf16, #tpu.memory_space<vmem>>, vector<1x4x128xbf16>
    %180 = vector.shape_cast %179 : vector<1x4x128xbf16> to vector<4x128xbf16>
    %cst_167 = arith.constant dense<0.000000e+00> : vector<16x128xf32>
    %181 = tpu.matmul %178, %180, %cst_167 {dimension_numbers = #tpu.dot_dimension_numbers<[1], [0], [0], [1], [0, 0, 1, 1], [], []>} : vector<16x4xbf16>, vector<4x128xbf16>, vector<16x128xf32> -> vector<16x128xf32>
    %182 = arith.addf %174, %181 : vector<16x128xf32>
    %c0_168 = arith.constant 0 : index
    %183 = arith.index_cast %175 : i32 to index
    %c1_169 = arith.constant 1 : index
    %c0_170 = arith.constant 0 : index
    %184 = vector.load %arg2[%c0_168, %183, %c1_169, %c0_170] : memref<1x18x18x4xbf16, #tpu.memory_space<vmem>>, vector<1x1x16x4xbf16>
    %185 = vector.shape_cast %184 : vector<1x1x16x4xbf16> to vector<16x4xbf16>
    %c4_171 = arith.constant 4 : index
    %c0_172 = arith.constant 0 : index
    %c0_173 = arith.constant 0 : index
    %186 = vector.load %arg3[%c4_171, %c0_172, %c0_173] : memref<9x4x128xbf16, #tpu.memory_space<vmem>>, vector<1x4x128xbf16>
    %187 = vector.shape_cast %186 : vector<1x4x128xbf16> to vector<4x128xbf16>
    %cst_174 = arith.constant dense<0.000000e+00> : vector<16x128xf32>
    %188 = tpu.matmul %185, %187, %cst_174 {dimension_numbers = #tpu.dot_dimension_numbers<[1], [0], [0], [1], [0, 0, 1, 1], [], []>} : vector<16x4xbf16>, vector<4x128xbf16>, vector<16x128xf32> -> vector<16x128xf32>
    %189 = arith.addf %182, %188 : vector<16x128xf32>
    %c0_175 = arith.constant 0 : index
    %190 = arith.index_cast %175 : i32 to index
    %c2_176 = arith.constant 2 : index
    %c0_177 = arith.constant 0 : index
    %191 = vector.load %arg2[%c0_175, %190, %c2_176, %c0_177] : memref<1x18x18x4xbf16, #tpu.memory_space<vmem>>, vector<1x1x16x4xbf16>
    %192 = vector.shape_cast %191 : vector<1x1x16x4xbf16> to vector<16x4xbf16>
    %c5_178 = arith.constant 5 : index
    %c0_179 = arith.constant 0 : index
    %c0_180 = arith.constant 0 : index
    %193 = vector.load %arg3[%c5_178, %c0_179, %c0_180] : memref<9x4x128xbf16, #tpu.memory_space<vmem>>, vector<1x4x128xbf16>
    %194 = vector.shape_cast %193 : vector<1x4x128xbf16> to vector<4x128xbf16>
    %cst_181 = arith.constant dense<0.000000e+00> : vector<16x128xf32>
    %195 = tpu.matmul %192, %194, %cst_181 {dimension_numbers = #tpu.dot_dimension_numbers<[1], [0], [0], [1], [0, 0, 1, 1], [], []>} : vector<16x4xbf16>, vector<4x128xbf16>, vector<16x128xf32> -> vector<16x128xf32>
    %196 = arith.addf %189, %195 : vector<16x128xf32>
    %c2_i32_182 = arith.constant 2 : i32
    %197 = arith.addi %151, %c2_i32_182 : i32
    %c0_183 = arith.constant 0 : index
    %198 = arith.index_cast %197 : i32 to index
    %c0_184 = arith.constant 0 : index
    %c0_185 = arith.constant 0 : index
    %199 = vector.load %arg2[%c0_183, %198, %c0_184, %c0_185] : memref<1x18x18x4xbf16, #tpu.memory_space<vmem>>, vector<1x1x16x4xbf16>
    %200 = vector.shape_cast %199 : vector<1x1x16x4xbf16> to vector<16x4xbf16>
    %c6_186 = arith.constant 6 : index
    %c0_187 = arith.constant 0 : index
    %c0_188 = arith.constant 0 : index
    %201 = vector.load %arg3[%c6_186, %c0_187, %c0_188] : memref<9x4x128xbf16, #tpu.memory_space<vmem>>, vector<1x4x128xbf16>
    %202 = vector.shape_cast %201 : vector<1x4x128xbf16> to vector<4x128xbf16>
    %cst_189 = arith.constant dense<0.000000e+00> : vector<16x128xf32>
    %203 = tpu.matmul %200, %202, %cst_189 {dimension_numbers = #tpu.dot_dimension_numbers<[1], [0], [0], [1], [0, 0, 1, 1], [], []>} : vector<16x4xbf16>, vector<4x128xbf16>, vector<16x128xf32> -> vector<16x128xf32>
    %204 = arith.addf %196, %203 : vector<16x128xf32>
    %c0_190 = arith.constant 0 : index
    %205 = arith.index_cast %197 : i32 to index
    %c1_191 = arith.constant 1 : index
    %c0_192 = arith.constant 0 : index
    %206 = vector.load %arg2[%c0_190, %205, %c1_191, %c0_192] : memref<1x18x18x4xbf16, #tpu.memory_space<vmem>>, vector<1x1x16x4xbf16>
    %207 = vector.shape_cast %206 : vector<1x1x16x4xbf16> to vector<16x4xbf16>
    %c7_193 = arith.constant 7 : index
    %c0_194 = arith.constant 0 : index
    %c0_195 = arith.constant 0 : index
    %208 = vector.load %arg3[%c7_193, %c0_194, %c0_195] : memref<9x4x128xbf16, #tpu.memory_space<vmem>>, vector<1x4x128xbf16>
    %209 = vector.shape_cast %208 : vector<1x4x128xbf16> to vector<4x128xbf16>
    %cst_196 = arith.constant dense<0.000000e+00> : vector<16x128xf32>
    %210 = tpu.matmul %207, %209, %cst_196 {dimension_numbers = #tpu.dot_dimension_numbers<[1], [0], [0], [1], [0, 0, 1, 1], [], []>} : vector<16x4xbf16>, vector<4x128xbf16>, vector<16x128xf32> -> vector<16x128xf32>
    %211 = arith.addf %204, %210 : vector<16x128xf32>
    %c0_197 = arith.constant 0 : index
    %212 = arith.index_cast %197 : i32 to index
    %c2_198 = arith.constant 2 : index
    %c0_199 = arith.constant 0 : index
    %213 = vector.load %arg2[%c0_197, %212, %c2_198, %c0_199] : memref<1x18x18x4xbf16, #tpu.memory_space<vmem>>, vector<1x1x16x4xbf16>
    %214 = vector.shape_cast %213 : vector<1x1x16x4xbf16> to vector<16x4xbf16>
    %c8_200 = arith.constant 8 : index
    %c0_201 = arith.constant 0 : index
    %c0_202 = arith.constant 0 : index
    %215 = vector.load %arg3[%c8_200, %c0_201, %c0_202] : memref<9x4x128xbf16, #tpu.memory_space<vmem>>, vector<1x4x128xbf16>
    %216 = vector.shape_cast %215 : vector<1x4x128xbf16> to vector<4x128xbf16>
    %cst_203 = arith.constant dense<0.000000e+00> : vector<16x128xf32>
    %217 = tpu.matmul %214, %216, %cst_203 {dimension_numbers = #tpu.dot_dimension_numbers<[1], [0], [0], [1], [0, 0, 1, 1], [], []>} : vector<16x4xbf16>, vector<4x128xbf16>, vector<16x128xf32> -> vector<16x128xf32>
    %218 = arith.addf %211, %217 : vector<16x128xf32>
    %219 = vector.broadcast %1 : vector<1x128xf32> to vector<16x128xf32>
    %220 = arith.addf %218, %219 : vector<16x128xf32>
    %c0_204 = arith.constant 0 : index
    %c2_205 = arith.constant 2 : index
    %c0_206 = arith.constant 0 : index
    %c0_207 = arith.constant 0 : index
    %221 = vector.load %arg5[%c0_204, %c2_205, %c0_206, %c0_207] : memref<1x8x16x128xf32, #tpu.memory_space<vmem>>, vector<1x1x16x128xf32>
    %222 = vector.shape_cast %221 : vector<1x1x16x128xf32> to vector<16x128xf32>
    %223 = vector.shape_cast %220 : vector<16x128xf32> to vector<1x1x16x128xf32>
    tpu.vector_store %arg5[%c0_204, %c2_205, %c0_206, %c0_207], %223 {strides = array<i32>} : memref<1x8x16x128xf32, #tpu.memory_space<vmem>>, vector<1x1x16x128xf32>,
    %c3_i32 = arith.constant 3 : i32
    %224 = arith.addi %0, %c3_i32 : i32
    %c1_i32_208 = arith.constant 1 : i32
    %225 = arith.muli %224, %c1_i32_208 : i32
    %cst_209 = arith.constant 0.000000e+00 : f32
    %226 = vector.broadcast %cst_209 : f32 to vector<16x128xf32>
    %c0_i32_210 = arith.constant 0 : i32
    %227 = arith.addi %225, %c0_i32_210 : i32
    %c0_211 = arith.constant 0 : index
    %228 = arith.index_cast %227 : i32 to index
    %c0_212 = arith.constant 0 : index
    %c0_213 = arith.constant 0 : index
    %229 = vector.load %arg2[%c0_211, %228, %c0_212, %c0_213] : memref<1x18x18x4xbf16, #tpu.memory_space<vmem>>, vector<1x1x16x4xbf16>
    %230 = vector.shape_cast %229 : vector<1x1x16x4xbf16> to vector<16x4xbf16>
    %c0_214 = arith.constant 0 : index
    %c0_215 = arith.constant 0 : index
    %c0_216 = arith.constant 0 : index
    %231 = vector.load %arg3[%c0_214, %c0_215, %c0_216] : memref<9x4x128xbf16, #tpu.memory_space<vmem>>, vector<1x4x128xbf16>
    %232 = vector.shape_cast %231 : vector<1x4x128xbf16> to vector<4x128xbf16>
    %cst_217 = arith.constant dense<0.000000e+00> : vector<16x128xf32>
    %233 = tpu.matmul %230, %232, %cst_217 {dimension_numbers = #tpu.dot_dimension_numbers<[1], [0], [0], [1], [0, 0, 1, 1], [], []>} : vector<16x4xbf16>, vector<4x128xbf16>, vector<16x128xf32> -> vector<16x128xf32>
    %234 = arith.addf %226, %233 : vector<16x128xf32>
    %c0_218 = arith.constant 0 : index
    %235 = arith.index_cast %227 : i32 to index
    %c1_219 = arith.constant 1 : index
    %c0_220 = arith.constant 0 : index
    %236 = vector.load %arg2[%c0_218, %235, %c1_219, %c0_220] : memref<1x18x18x4xbf16, #tpu.memory_space<vmem>>, vector<1x1x16x4xbf16>
    %237 = vector.shape_cast %236 : vector<1x1x16x4xbf16> to vector<16x4xbf16>
    %c1_221 = arith.constant 1 : index
    %c0_222 = arith.constant 0 : index
    %c0_223 = arith.constant 0 : index
    %238 = vector.load %arg3[%c1_221, %c0_222, %c0_223] : memref<9x4x128xbf16, #tpu.memory_space<vmem>>, vector<1x4x128xbf16>
    %239 = vector.shape_cast %238 : vector<1x4x128xbf16> to vector<4x128xbf16>
    %cst_224 = arith.constant dense<0.000000e+00> : vector<16x128xf32>
    %240 = tpu.matmul %237, %239, %cst_224 {dimension_numbers = #tpu.dot_dimension_numbers<[1], [0], [0], [1], [0, 0, 1, 1], [], []>} : vector<16x4xbf16>, vector<4x128xbf16>, vector<16x128xf32> -> vector<16x128xf32>
    %241 = arith.addf %234, %240 : vector<16x128xf32>
    %c0_225 = arith.constant 0 : index
    %242 = arith.index_cast %227 : i32 to index
    %c2_226 = arith.constant 2 : index
    %c0_227 = arith.constant 0 : index
    %243 = vector.load %arg2[%c0_225, %242, %c2_226, %c0_227] : memref<1x18x18x4xbf16, #tpu.memory_space<vmem>>, vector<1x1x16x4xbf16>
    %244 = vector.shape_cast %243 : vector<1x1x16x4xbf16> to vector<16x4xbf16>
    %c2_228 = arith.constant 2 : index
    %c0_229 = arith.constant 0 : index
    %c0_230 = arith.constant 0 : index
    %245 = vector.load %arg3[%c2_228, %c0_229, %c0_230] : memref<9x4x128xbf16, #tpu.memory_space<vmem>>, vector<1x4x128xbf16>
    %246 = vector.shape_cast %245 : vector<1x4x128xbf16> to vector<4x128xbf16>
    %cst_231 = arith.constant dense<0.000000e+00> : vector<16x128xf32>
    %247 = tpu.matmul %244, %246, %cst_231 {dimension_numbers = #tpu.dot_dimension_numbers<[1], [0], [0], [1], [0, 0, 1, 1], [], []>} : vector<16x4xbf16>, vector<4x128xbf16>, vector<16x128xf32> -> vector<16x128xf32>
    %248 = arith.addf %241, %247 : vector<16x128xf32>
    %c1_i32_232 = arith.constant 1 : i32
    %249 = arith.addi %225, %c1_i32_232 : i32
    %c0_233 = arith.constant 0 : index
    %250 = arith.index_cast %249 : i32 to index
    %c0_234 = arith.constant 0 : index
    %c0_235 = arith.constant 0 : index
    %251 = vector.load %arg2[%c0_233, %250, %c0_234, %c0_235] : memref<1x18x18x4xbf16, #tpu.memory_space<vmem>>, vector<1x1x16x4xbf16>
    %252 = vector.shape_cast %251 : vector<1x1x16x4xbf16> to vector<16x4xbf16>
    %c3_236 = arith.constant 3 : index
    %c0_237 = arith.constant 0 : index
    %c0_238 = arith.constant 0 : index
    %253 = vector.load %arg3[%c3_236, %c0_237, %c0_238] : memref<9x4x128xbf16, #tpu.memory_space<vmem>>, vector<1x4x128xbf16>
    %254 = vector.shape_cast %253 : vector<1x4x128xbf16> to vector<4x128xbf16>
    %cst_239 = arith.constant dense<0.000000e+00> : vector<16x128xf32>
    %255 = tpu.matmul %252, %254, %cst_239 {dimension_numbers = #tpu.dot_dimension_numbers<[1], [0], [0], [1], [0, 0, 1, 1], [], []>} : vector<16x4xbf16>, vector<4x128xbf16>, vector<16x128xf32> -> vector<16x128xf32>
    %256 = arith.addf %248, %255 : vector<16x128xf32>
    %c0_240 = arith.constant 0 : index
    %257 = arith.index_cast %249 : i32 to index
    %c1_241 = arith.constant 1 : index
    %c0_242 = arith.constant 0 : index
    %258 = vector.load %arg2[%c0_240, %257, %c1_241, %c0_242] : memref<1x18x18x4xbf16, #tpu.memory_space<vmem>>, vector<1x1x16x4xbf16>
    %259 = vector.shape_cast %258 : vector<1x1x16x4xbf16> to vector<16x4xbf16>
    %c4_243 = arith.constant 4 : index
    %c0_244 = arith.constant 0 : index
    %c0_245 = arith.constant 0 : index
    %260 = vector.load %arg3[%c4_243, %c0_244, %c0_245] : memref<9x4x128xbf16, #tpu.memory_space<vmem>>, vector<1x4x128xbf16>
    %261 = vector.shape_cast %260 : vector<1x4x128xbf16> to vector<4x128xbf16>
    %cst_246 = arith.constant dense<0.000000e+00> : vector<16x128xf32>
    %262 = tpu.matmul %259, %261, %cst_246 {dimension_numbers = #tpu.dot_dimension_numbers<[1], [0], [0], [1], [0, 0, 1, 1], [], []>} : vector<16x4xbf16>, vector<4x128xbf16>, vector<16x128xf32> -> vector<16x128xf32>
    %263 = arith.addf %256, %262 : vector<16x128xf32>
    %c0_247 = arith.constant 0 : index
    %264 = arith.index_cast %249 : i32 to index
    %c2_248 = arith.constant 2 : index
    %c0_249 = arith.constant 0 : index
    %265 = vector.load %arg2[%c0_247, %264, %c2_248, %c0_249] : memref<1x18x18x4xbf16, #tpu.memory_space<vmem>>, vector<1x1x16x4xbf16>
    %266 = vector.shape_cast %265 : vector<1x1x16x4xbf16> to vector<16x4xbf16>
    %c5_250 = arith.constant 5 : index
    %c0_251 = arith.constant 0 : index
    %c0_252 = arith.constant 0 : index
    %267 = vector.load %arg3[%c5_250, %c0_251, %c0_252] : memref<9x4x128xbf16, #tpu.memory_space<vmem>>, vector<1x4x128xbf16>
    %268 = vector.shape_cast %267 : vector<1x4x128xbf16> to vector<4x128xbf16>
    %cst_253 = arith.constant dense<0.000000e+00> : vector<16x128xf32>
    %269 = tpu.matmul %266, %268, %cst_253 {dimension_numbers = #tpu.dot_dimension_numbers<[1], [0], [0], [1], [0, 0, 1, 1], [], []>} : vector<16x4xbf16>, vector<4x128xbf16>, vector<16x128xf32> -> vector<16x128xf32>
    %270 = arith.addf %263, %269 : vector<16x128xf32>
    %c2_i32_254 = arith.constant 2 : i32
    %271 = arith.addi %225, %c2_i32_254 : i32
    %c0_255 = arith.constant 0 : index
    %272 = arith.index_cast %271 : i32 to index
    %c0_256 = arith.constant 0 : index
    %c0_257 = arith.constant 0 : index
    %273 = vector.load %arg2[%c0_255, %272, %c0_256, %c0_257] : memref<1x18x18x4xbf16, #tpu.memory_space<vmem>>, vector<1x1x16x4xbf16>
    %274 = vector.shape_cast %273 : vector<1x1x16x4xbf16> to vector<16x4xbf16>
    %c6_258 = arith.constant 6 : index
    %c0_259 = arith.constant 0 : index
    %c0_260 = arith.constant 0 : index
    %275 = vector.load %arg3[%c6_258, %c0_259, %c0_260] : memref<9x4x128xbf16, #tpu.memory_space<vmem>>, vector<1x4x128xbf16>
    %276 = vector.shape_cast %275 : vector<1x4x128xbf16> to vector<4x128xbf16>
    %cst_261 = arith.constant dense<0.000000e+00> : vector<16x128xf32>
    %277 = tpu.matmul %274, %276, %cst_261 {dimension_numbers = #tpu.dot_dimension_numbers<[1], [0], [0], [1], [0, 0, 1, 1], [], []>} : vector<16x4xbf16>, vector<4x128xbf16>, vector<16x128xf32> -> vector<16x128xf32>
    %278 = arith.addf %270, %277 : vector<16x128xf32>
    %c0_262 = arith.constant 0 : index
    %279 = arith.index_cast %271 : i32 to index
    %c1_263 = arith.constant 1 : index
    %c0_264 = arith.constant 0 : index
    %280 = vector.load %arg2[%c0_262, %279, %c1_263, %c0_264] : memref<1x18x18x4xbf16, #tpu.memory_space<vmem>>, vector<1x1x16x4xbf16>
    %281 = vector.shape_cast %280 : vector<1x1x16x4xbf16> to vector<16x4xbf16>
    %c7_265 = arith.constant 7 : index
    %c0_266 = arith.constant 0 : index
    %c0_267 = arith.constant 0 : index
    %282 = vector.load %arg3[%c7_265, %c0_266, %c0_267] : memref<9x4x128xbf16, #tpu.memory_space<vmem>>, vector<1x4x128xbf16>
    %283 = vector.shape_cast %282 : vector<1x4x128xbf16> to vector<4x128xbf16>
    %cst_268 = arith.constant dense<0.000000e+00> : vector<16x128xf32>
    %284 = tpu.matmul %281, %283, %cst_268 {dimension_numbers = #tpu.dot_dimension_numbers<[1], [0], [0], [1], [0, 0, 1, 1], [], []>} : vector<16x4xbf16>, vector<4x128xbf16>, vector<16x128xf32> -> vector<16x128xf32>
    %285 = arith.addf %278, %284 : vector<16x128xf32>
    %c0_269 = arith.constant 0 : index
    %286 = arith.index_cast %271 : i32 to index
    %c2_270 = arith.constant 2 : index
    %c0_271 = arith.constant 0 : index
    %287 = vector.load %arg2[%c0_269, %286, %c2_270, %c0_271] : memref<1x18x18x4xbf16, #tpu.memory_space<vmem>>, vector<1x1x16x4xbf16>
    %288 = vector.shape_cast %287 : vector<1x1x16x4xbf16> to vector<16x4xbf16>
    %c8_272 = arith.constant 8 : index
    %c0_273 = arith.constant 0 : index
    %c0_274 = arith.constant 0 : index
    %289 = vector.load %arg3[%c8_272, %c0_273, %c0_274] : memref<9x4x128xbf16, #tpu.memory_space<vmem>>, vector<1x4x128xbf16>
    %290 = vector.shape_cast %289 : vector<1x4x128xbf16> to vector<4x128xbf16>
    %cst_275 = arith.constant dense<0.000000e+00> : vector<16x128xf32>
    %291 = tpu.matmul %288, %290, %cst_275 {dimension_numbers = #tpu.dot_dimension_numbers<[1], [0], [0], [1], [0, 0, 1, 1], [], []>} : vector<16x4xbf16>, vector<4x128xbf16>, vector<16x128xf32> -> vector<16x128xf32>
    %292 = arith.addf %285, %291 : vector<16x128xf32>
    %293 = vector.broadcast %1 : vector<1x128xf32> to vector<16x128xf32>
    %294 = arith.addf %292, %293 : vector<16x128xf32>
    %c0_276 = arith.constant 0 : index
    %c3_277 = arith.constant 3 : index
    %c0_278 = arith.constant 0 : index
    %c0_279 = arith.constant 0 : index
    %295 = vector.load %arg5[%c0_276, %c3_277, %c0_278, %c0_279] : memref<1x8x16x128xf32, #tpu.memory_space<vmem>>, vector<1x1x16x128xf32>
    %296 = vector.shape_cast %295 : vector<1x1x16x128xf32> to vector<16x128xf32>
    %297 = vector.shape_cast %294 : vector<16x128xf32> to vector<1x1x16x128xf32>
    tpu.vector_store %arg5[%c0_276, %c3_277, %c0_278, %c0_279], %297 {strides = array<i32>} : memref<1x8x16x128xf32, #tpu.memory_space<vmem>>, vector<1x1x16x128xf32>,
    %c4_i32 = arith.constant 4 : i32
    %298 = arith.addi %0, %c4_i32 : i32
    %c1_i32_280 = arith.constant 1 : i32
    %299 = arith.muli %298, %c1_i32_280 : i32
    %cst_281 = arith.constant 0.000000e+00 : f32
    %300 = vector.broadcast %cst_281 : f32 to vector<16x128xf32>
    %c0_i32_282 = arith.constant 0 : i32
    %301 = arith.addi %299, %c0_i32_282 : i32
    %c0_283 = arith.constant 0 : index
    %302 = arith.index_cast %301 : i32 to index
    %c0_284 = arith.constant 0 : index
    %c0_285 = arith.constant 0 : index
    %303 = vector.load %arg2[%c0_283, %302, %c0_284, %c0_285] : memref<1x18x18x4xbf16, #tpu.memory_space<vmem>>, vector<1x1x16x4xbf16>
    %304 = vector.shape_cast %303 : vector<1x1x16x4xbf16> to vector<16x4xbf16>
    %c0_286 = arith.constant 0 : index
    %c0_287 = arith.constant 0 : index
    %c0_288 = arith.constant 0 : index
    %305 = vector.load %arg3[%c0_286, %c0_287, %c0_288] : memref<9x4x128xbf16, #tpu.memory_space<vmem>>, vector<1x4x128xbf16>
    %306 = vector.shape_cast %305 : vector<1x4x128xbf16> to vector<4x128xbf16>
    %cst_289 = arith.constant dense<0.000000e+00> : vector<16x128xf32>
    %307 = tpu.matmul %304, %306, %cst_289 {dimension_numbers = #tpu.dot_dimension_numbers<[1], [0], [0], [1], [0, 0, 1, 1], [], []>} : vector<16x4xbf16>, vector<4x128xbf16>, vector<16x128xf32> -> vector<16x128xf32>
    %308 = arith.addf %300, %307 : vector<16x128xf32>
    %c0_290 = arith.constant 0 : index
    %309 = arith.index_cast %301 : i32 to index
    %c1_291 = arith.constant 1 : index
    %c0_292 = arith.constant 0 : index
    %310 = vector.load %arg2[%c0_290, %309, %c1_291, %c0_292] : memref<1x18x18x4xbf16, #tpu.memory_space<vmem>>, vector<1x1x16x4xbf16>
    %311 = vector.shape_cast %310 : vector<1x1x16x4xbf16> to vector<16x4xbf16>
    %c1_293 = arith.constant 1 : index
    %c0_294 = arith.constant 0 : index
    %c0_295 = arith.constant 0 : index
    %312 = vector.load %arg3[%c1_293, %c0_294, %c0_295] : memref<9x4x128xbf16, #tpu.memory_space<vmem>>, vector<1x4x128xbf16>
    %313 = vector.shape_cast %312 : vector<1x4x128xbf16> to vector<4x128xbf16>
    %cst_296 = arith.constant dense<0.000000e+00> : vector<16x128xf32>
    %314 = tpu.matmul %311, %313, %cst_296 {dimension_numbers = #tpu.dot_dimension_numbers<[1], [0], [0], [1], [0, 0, 1, 1], [], []>} : vector<16x4xbf16>, vector<4x128xbf16>, vector<16x128xf32> -> vector<16x128xf32>
    %315 = arith.addf %308, %314 : vector<16x128xf32>
    %c0_297 = arith.constant 0 : index
    %316 = arith.index_cast %301 : i32 to index
    %c2_298 = arith.constant 2 : index
    %c0_299 = arith.constant 0 : index
    %317 = vector.load %arg2[%c0_297, %316, %c2_298, %c0_299] : memref<1x18x18x4xbf16, #tpu.memory_space<vmem>>, vector<1x1x16x4xbf16>
    %318 = vector.shape_cast %317 : vector<1x1x16x4xbf16> to vector<16x4xbf16>
    %c2_300 = arith.constant 2 : index
    %c0_301 = arith.constant 0 : index
    %c0_302 = arith.constant 0 : index
    %319 = vector.load %arg3[%c2_300, %c0_301, %c0_302] : memref<9x4x128xbf16, #tpu.memory_space<vmem>>, vector<1x4x128xbf16>
    %320 = vector.shape_cast %319 : vector<1x4x128xbf16> to vector<4x128xbf16>
    %cst_303 = arith.constant dense<0.000000e+00> : vector<16x128xf32>
    %321 = tpu.matmul %318, %320, %cst_303 {dimension_numbers = #tpu.dot_dimension_numbers<[1], [0], [0], [1], [0, 0, 1, 1], [], []>} : vector<16x4xbf16>, vector<4x128xbf16>, vector<16x128xf32> -> vector<16x128xf32>
    %322 = arith.addf %315, %321 : vector<16x128xf32>
    %c1_i32_304 = arith.constant 1 : i32
    %323 = arith.addi %299, %c1_i32_304 : i32
    %c0_305 = arith.constant 0 : index
    %324 = arith.index_cast %323 : i32 to index
    %c0_306 = arith.constant 0 : index
    %c0_307 = arith.constant 0 : index
    %325 = vector.load %arg2[%c0_305, %324, %c0_306, %c0_307] : memref<1x18x18x4xbf16, #tpu.memory_space<vmem>>, vector<1x1x16x4xbf16>
    %326 = vector.shape_cast %325 : vector<1x1x16x4xbf16> to vector<16x4xbf16>
    %c3_308 = arith.constant 3 : index
    %c0_309 = arith.constant 0 : index
    %c0_310 = arith.constant 0 : index
    %327 = vector.load %arg3[%c3_308, %c0_309, %c0_310] : memref<9x4x128xbf16, #tpu.memory_space<vmem>>, vector<1x4x128xbf16>
    %328 = vector.shape_cast %327 : vector<1x4x128xbf16> to vector<4x128xbf16>
    %cst_311 = arith.constant dense<0.000000e+00> : vector<16x128xf32>
    %329 = tpu.matmul %326, %328, %cst_311 {dimension_numbers = #tpu.dot_dimension_numbers<[1], [0], [0], [1], [0, 0, 1, 1], [], []>} : vector<16x4xbf16>, vector<4x128xbf16>, vector<16x128xf32> -> vector<16x128xf32>
    %330 = arith.addf %322, %329 : vector<16x128xf32>
    %c0_312 = arith.constant 0 : index
    %331 = arith.index_cast %323 : i32 to index
    %c1_313 = arith.constant 1 : index
    %c0_314 = arith.constant 0 : index
    %332 = vector.load %arg2[%c0_312, %331, %c1_313, %c0_314] : memref<1x18x18x4xbf16, #tpu.memory_space<vmem>>, vector<1x1x16x4xbf16>
    %333 = vector.shape_cast %332 : vector<1x1x16x4xbf16> to vector<16x4xbf16>
    %c4_315 = arith.constant 4 : index
    %c0_316 = arith.constant 0 : index
    %c0_317 = arith.constant 0 : index
    %334 = vector.load %arg3[%c4_315, %c0_316, %c0_317] : memref<9x4x128xbf16, #tpu.memory_space<vmem>>, vector<1x4x128xbf16>
    %335 = vector.shape_cast %334 : vector<1x4x128xbf16> to vector<4x128xbf16>
    %cst_318 = arith.constant dense<0.000000e+00> : vector<16x128xf32>
    %336 = tpu.matmul %333, %335, %cst_318 {dimension_numbers = #tpu.dot_dimension_numbers<[1], [0], [0], [1], [0, 0, 1, 1], [], []>} : vector<16x4xbf16>, vector<4x128xbf16>, vector<16x128xf32> -> vector<16x128xf32>
    %337 = arith.addf %330, %336 : vector<16x128xf32>
    %c0_319 = arith.constant 0 : index
    %338 = arith.index_cast %323 : i32 to index
    %c2_320 = arith.constant 2 : index
    %c0_321 = arith.constant 0 : index
    %339 = vector.load %arg2[%c0_319, %338, %c2_320, %c0_321] : memref<1x18x18x4xbf16, #tpu.memory_space<vmem>>, vector<1x1x16x4xbf16>
    %340 = vector.shape_cast %339 : vector<1x1x16x4xbf16> to vector<16x4xbf16>
    %c5_322 = arith.constant 5 : index
    %c0_323 = arith.constant 0 : index
    %c0_324 = arith.constant 0 : index
    %341 = vector.load %arg3[%c5_322, %c0_323, %c0_324] : memref<9x4x128xbf16, #tpu.memory_space<vmem>>, vector<1x4x128xbf16>
    %342 = vector.shape_cast %341 : vector<1x4x128xbf16> to vector<4x128xbf16>
    %cst_325 = arith.constant dense<0.000000e+00> : vector<16x128xf32>
    %343 = tpu.matmul %340, %342, %cst_325 {dimension_numbers = #tpu.dot_dimension_numbers<[1], [0], [0], [1], [0, 0, 1, 1], [], []>} : vector<16x4xbf16>, vector<4x128xbf16>, vector<16x128xf32> -> vector<16x128xf32>
    %344 = arith.addf %337, %343 : vector<16x128xf32>
    %c2_i32_326 = arith.constant 2 : i32
    %345 = arith.addi %299, %c2_i32_326 : i32
    %c0_327 = arith.constant 0 : index
    %346 = arith.index_cast %345 : i32 to index
    %c0_328 = arith.constant 0 : index
    %c0_329 = arith.constant 0 : index
    %347 = vector.load %arg2[%c0_327, %346, %c0_328, %c0_329] : memref<1x18x18x4xbf16, #tpu.memory_space<vmem>>, vector<1x1x16x4xbf16>
    %348 = vector.shape_cast %347 : vector<1x1x16x4xbf16> to vector<16x4xbf16>
    %c6_330 = arith.constant 6 : index
    %c0_331 = arith.constant 0 : index
    %c0_332 = arith.constant 0 : index
    %349 = vector.load %arg3[%c6_330, %c0_331, %c0_332] : memref<9x4x128xbf16, #tpu.memory_space<vmem>>, vector<1x4x128xbf16>
    %350 = vector.shape_cast %349 : vector<1x4x128xbf16> to vector<4x128xbf16>
    %cst_333 = arith.constant dense<0.000000e+00> : vector<16x128xf32>
    %351 = tpu.matmul %348, %350, %cst_333 {dimension_numbers = #tpu.dot_dimension_numbers<[1], [0], [0], [1], [0, 0, 1, 1], [], []>} : vector<16x4xbf16>, vector<4x128xbf16>, vector<16x128xf32> -> vector<16x128xf32>
    %352 = arith.addf %344, %351 : vector<16x128xf32>
    %c0_334 = arith.constant 0 : index
    %353 = arith.index_cast %345 : i32 to index
    %c1_335 = arith.constant 1 : index
    %c0_336 = arith.constant 0 : index
    %354 = vector.load %arg2[%c0_334, %353, %c1_335, %c0_336] : memref<1x18x18x4xbf16, #tpu.memory_space<vmem>>, vector<1x1x16x4xbf16>
    %355 = vector.shape_cast %354 : vector<1x1x16x4xbf16> to vector<16x4xbf16>
    %c7_337 = arith.constant 7 : index
    %c0_338 = arith.constant 0 : index
    %c0_339 = arith.constant 0 : index
    %356 = vector.load %arg3[%c7_337, %c0_338, %c0_339] : memref<9x4x128xbf16, #tpu.memory_space<vmem>>, vector<1x4x128xbf16>
    %357 = vector.shape_cast %356 : vector<1x4x128xbf16> to vector<4x128xbf16>
    %cst_340 = arith.constant dense<0.000000e+00> : vector<16x128xf32>
    %358 = tpu.matmul %355, %357, %cst_340 {dimension_numbers = #tpu.dot_dimension_numbers<[1], [0], [0], [1], [0, 0, 1, 1], [], []>} : vector<16x4xbf16>, vector<4x128xbf16>, vector<16x128xf32> -> vector<16x128xf32>
    %359 = arith.addf %352, %358 : vector<16x128xf32>
    %c0_341 = arith.constant 0 : index
    %360 = arith.index_cast %345 : i32 to index
    %c2_342 = arith.constant 2 : index
    %c0_343 = arith.constant 0 : index
    %361 = vector.load %arg2[%c0_341, %360, %c2_342, %c0_343] : memref<1x18x18x4xbf16, #tpu.memory_space<vmem>>, vector<1x1x16x4xbf16>
    %362 = vector.shape_cast %361 : vector<1x1x16x4xbf16> to vector<16x4xbf16>
    %c8_344 = arith.constant 8 : index
    %c0_345 = arith.constant 0 : index
    %c0_346 = arith.constant 0 : index
    %363 = vector.load %arg3[%c8_344, %c0_345, %c0_346] : memref<9x4x128xbf16, #tpu.memory_space<vmem>>, vector<1x4x128xbf16>
    %364 = vector.shape_cast %363 : vector<1x4x128xbf16> to vector<4x128xbf16>
    %cst_347 = arith.constant dense<0.000000e+00> : vector<16x128xf32>
    %365 = tpu.matmul %362, %364, %cst_347 {dimension_numbers = #tpu.dot_dimension_numbers<[1], [0], [0], [1], [0, 0, 1, 1], [], []>} : vector<16x4xbf16>, vector<4x128xbf16>, vector<16x128xf32> -> vector<16x128xf32>
    %366 = arith.addf %359, %365 : vector<16x128xf32>
    %367 = vector.broadcast %1 : vector<1x128xf32> to vector<16x128xf32>
    %368 = arith.addf %366, %367 : vector<16x128xf32>
    %c0_348 = arith.constant 0 : index
    %c4_349 = arith.constant 4 : index
    %c0_350 = arith.constant 0 : index
    %c0_351 = arith.constant 0 : index
    %369 = vector.load %arg5[%c0_348, %c4_349, %c0_350, %c0_351] : memref<1x8x16x128xf32, #tpu.memory_space<vmem>>, vector<1x1x16x128xf32>
    %370 = vector.shape_cast %369 : vector<1x1x16x128xf32> to vector<16x128xf32>
    %371 = vector.shape_cast %368 : vector<16x128xf32> to vector<1x1x16x128xf32>
    tpu.vector_store %arg5[%c0_348, %c4_349, %c0_350, %c0_351], %371 {strides = array<i32>} : memref<1x8x16x128xf32, #tpu.memory_space<vmem>>, vector<1x1x16x128xf32>,
    %c5_i32 = arith.constant 5 : i32
    %372 = arith.addi %0, %c5_i32 : i32
    %c1_i32_352 = arith.constant 1 : i32
    %373 = arith.muli %372, %c1_i32_352 : i32
    %cst_353 = arith.constant 0.000000e+00 : f32
    %374 = vector.broadcast %cst_353 : f32 to vector<16x128xf32>
    %c0_i32_354 = arith.constant 0 : i32
    %375 = arith.addi %373, %c0_i32_354 : i32
    %c0_355 = arith.constant 0 : index
    %376 = arith.index_cast %375 : i32 to index
    %c0_356 = arith.constant 0 : index
    %c0_357 = arith.constant 0 : index
    %377 = vector.load %arg2[%c0_355, %376, %c0_356, %c0_357] : memref<1x18x18x4xbf16, #tpu.memory_space<vmem>>, vector<1x1x16x4xbf16>
    %378 = vector.shape_cast %377 : vector<1x1x16x4xbf16> to vector<16x4xbf16>
    %c0_358 = arith.constant 0 : index
    %c0_359 = arith.constant 0 : index
    %c0_360 = arith.constant 0 : index
    %379 = vector.load %arg3[%c0_358, %c0_359, %c0_360] : memref<9x4x128xbf16, #tpu.memory_space<vmem>>, vector<1x4x128xbf16>
    %380 = vector.shape_cast %379 : vector<1x4x128xbf16> to vector<4x128xbf16>
    %cst_361 = arith.constant dense<0.000000e+00> : vector<16x128xf32>
    %381 = tpu.matmul %378, %380, %cst_361 {dimension_numbers = #tpu.dot_dimension_numbers<[1], [0], [0], [1], [0, 0, 1, 1], [], []>} : vector<16x4xbf16>, vector<4x128xbf16>, vector<16x128xf32> -> vector<16x128xf32>
    %382 = arith.addf %374, %381 : vector<16x128xf32>
    %c0_362 = arith.constant 0 : index
    %383 = arith.index_cast %375 : i32 to index
    %c1_363 = arith.constant 1 : index
    %c0_364 = arith.constant 0 : index
    %384 = vector.load %arg2[%c0_362, %383, %c1_363, %c0_364] : memref<1x18x18x4xbf16, #tpu.memory_space<vmem>>, vector<1x1x16x4xbf16>
    %385 = vector.shape_cast %384 : vector<1x1x16x4xbf16> to vector<16x4xbf16>
    %c1_365 = arith.constant 1 : index
    %c0_366 = arith.constant 0 : index
    %c0_367 = arith.constant 0 : index
    %386 = vector.load %arg3[%c1_365, %c0_366, %c0_367] : memref<9x4x128xbf16, #tpu.memory_space<vmem>>, vector<1x4x128xbf16>
    %387 = vector.shape_cast %386 : vector<1x4x128xbf16> to vector<4x128xbf16>
    %cst_368 = arith.constant dense<0.000000e+00> : vector<16x128xf32>
    %388 = tpu.matmul %385, %387, %cst_368 {dimension_numbers = #tpu.dot_dimension_numbers<[1], [0], [0], [1], [0, 0, 1, 1], [], []>} : vector<16x4xbf16>, vector<4x128xbf16>, vector<16x128xf32> -> vector<16x128xf32>
    %389 = arith.addf %382, %388 : vector<16x128xf32>
    %c0_369 = arith.constant 0 : index
    %390 = arith.index_cast %375 : i32 to index
    %c2_370 = arith.constant 2 : index
    %c0_371 = arith.constant 0 : index
    %391 = vector.load %arg2[%c0_369, %390, %c2_370, %c0_371] : memref<1x18x18x4xbf16, #tpu.memory_space<vmem>>, vector<1x1x16x4xbf16>
    %392 = vector.shape_cast %391 : vector<1x1x16x4xbf16> to vector<16x4xbf16>
    %c2_372 = arith.constant 2 : index
    %c0_373 = arith.constant 0 : index
    %c0_374 = arith.constant 0 : index
    %393 = vector.load %arg3[%c2_372, %c0_373, %c0_374] : memref<9x4x128xbf16, #tpu.memory_space<vmem>>, vector<1x4x128xbf16>
    %394 = vector.shape_cast %393 : vector<1x4x128xbf16> to vector<4x128xbf16>
    %cst_375 = arith.constant dense<0.000000e+00> : vector<16x128xf32>
    %395 = tpu.matmul %392, %394, %cst_375 {dimension_numbers = #tpu.dot_dimension_numbers<[1], [0], [0], [1], [0, 0, 1, 1], [], []>} : vector<16x4xbf16>, vector<4x128xbf16>, vector<16x128xf32> -> vector<16x128xf32>
    %396 = arith.addf %389, %395 : vector<16x128xf32>
    %c1_i32_376 = arith.constant 1 : i32
    %397 = arith.addi %373, %c1_i32_376 : i32
    %c0_377 = arith.constant 0 : index
    %398 = arith.index_cast %397 : i32 to index
    %c0_378 = arith.constant 0 : index
    %c0_379 = arith.constant 0 : index
    %399 = vector.load %arg2[%c0_377, %398, %c0_378, %c0_379] : memref<1x18x18x4xbf16, #tpu.memory_space<vmem>>, vector<1x1x16x4xbf16>
    %400 = vector.shape_cast %399 : vector<1x1x16x4xbf16> to vector<16x4xbf16>
    %c3_380 = arith.constant 3 : index
    %c0_381 = arith.constant 0 : index
    %c0_382 = arith.constant 0 : index
    %401 = vector.load %arg3[%c3_380, %c0_381, %c0_382] : memref<9x4x128xbf16, #tpu.memory_space<vmem>>, vector<1x4x128xbf16>
    %402 = vector.shape_cast %401 : vector<1x4x128xbf16> to vector<4x128xbf16>
    %cst_383 = arith.constant dense<0.000000e+00> : vector<16x128xf32>
    %403 = tpu.matmul %400, %402, %cst_383 {dimension_numbers = #tpu.dot_dimension_numbers<[1], [0], [0], [1], [0, 0, 1, 1], [], []>} : vector<16x4xbf16>, vector<4x128xbf16>, vector<16x128xf32> -> vector<16x128xf32>
    %404 = arith.addf %396, %403 : vector<16x128xf32>
    %c0_384 = arith.constant 0 : index
    %405 = arith.index_cast %397 : i32 to index
    %c1_385 = arith.constant 1 : index
    %c0_386 = arith.constant 0 : index
    %406 = vector.load %arg2[%c0_384, %405, %c1_385, %c0_386] : memref<1x18x18x4xbf16, #tpu.memory_space<vmem>>, vector<1x1x16x4xbf16>
    %407 = vector.shape_cast %406 : vector<1x1x16x4xbf16> to vector<16x4xbf16>
    %c4_387 = arith.constant 4 : index
    %c0_388 = arith.constant 0 : index
    %c0_389 = arith.constant 0 : index
    %408 = vector.load %arg3[%c4_387, %c0_388, %c0_389] : memref<9x4x128xbf16, #tpu.memory_space<vmem>>, vector<1x4x128xbf16>
    %409 = vector.shape_cast %408 : vector<1x4x128xbf16> to vector<4x128xbf16>
    %cst_390 = arith.constant dense<0.000000e+00> : vector<16x128xf32>
    %410 = tpu.matmul %407, %409, %cst_390 {dimension_numbers = #tpu.dot_dimension_numbers<[1], [0], [0], [1], [0, 0, 1, 1], [], []>} : vector<16x4xbf16>, vector<4x128xbf16>, vector<16x128xf32> -> vector<16x128xf32>
    %411 = arith.addf %404, %410 : vector<16x128xf32>
    %c0_391 = arith.constant 0 : index
    %412 = arith.index_cast %397 : i32 to index
    %c2_392 = arith.constant 2 : index
    %c0_393 = arith.constant 0 : index
    %413 = vector.load %arg2[%c0_391, %412, %c2_392, %c0_393] : memref<1x18x18x4xbf16, #tpu.memory_space<vmem>>, vector<1x1x16x4xbf16>
    %414 = vector.shape_cast %413 : vector<1x1x16x4xbf16> to vector<16x4xbf16>
    %c5_394 = arith.constant 5 : index
    %c0_395 = arith.constant 0 : index
    %c0_396 = arith.constant 0 : index
    %415 = vector.load %arg3[%c5_394, %c0_395, %c0_396] : memref<9x4x128xbf16, #tpu.memory_space<vmem>>, vector<1x4x128xbf16>
    %416 = vector.shape_cast %415 : vector<1x4x128xbf16> to vector<4x128xbf16>
    %cst_397 = arith.constant dense<0.000000e+00> : vector<16x128xf32>
    %417 = tpu.matmul %414, %416, %cst_397 {dimension_numbers = #tpu.dot_dimension_numbers<[1], [0], [0], [1], [0, 0, 1, 1], [], []>} : vector<16x4xbf16>, vector<4x128xbf16>, vector<16x128xf32> -> vector<16x128xf32>
    %418 = arith.addf %411, %417 : vector<16x128xf32>
    %c2_i32_398 = arith.constant 2 : i32
    %419 = arith.addi %373, %c2_i32_398 : i32
    %c0_399 = arith.constant 0 : index
    %420 = arith.index_cast %419 : i32 to index
    %c0_400 = arith.constant 0 : index
    %c0_401 = arith.constant 0 : index
    %421 = vector.load %arg2[%c0_399, %420, %c0_400, %c0_401] : memref<1x18x18x4xbf16, #tpu.memory_space<vmem>>, vector<1x1x16x4xbf16>
    %422 = vector.shape_cast %421 : vector<1x1x16x4xbf16> to vector<16x4xbf16>
    %c6_402 = arith.constant 6 : index
    %c0_403 = arith.constant 0 : index
    %c0_404 = arith.constant 0 : index
    %423 = vector.load %arg3[%c6_402, %c0_403, %c0_404] : memref<9x4x128xbf16, #tpu.memory_space<vmem>>, vector<1x4x128xbf16>
    %424 = vector.shape_cast %423 : vector<1x4x128xbf16> to vector<4x128xbf16>
    %cst_405 = arith.constant dense<0.000000e+00> : vector<16x128xf32>
    %425 = tpu.matmul %422, %424, %cst_405 {dimension_numbers = #tpu.dot_dimension_numbers<[1], [0], [0], [1], [0, 0, 1, 1], [], []>} : vector<16x4xbf16>, vector<4x128xbf16>, vector<16x128xf32> -> vector<16x128xf32>
    %426 = arith.addf %418, %425 : vector<16x128xf32>
    %c0_406 = arith.constant 0 : index
    %427 = arith.index_cast %419 : i32 to index
    %c1_407 = arith.constant 1 : index
    %c0_408 = arith.constant 0 : index
    %428 = vector.load %arg2[%c0_406, %427, %c1_407, %c0_408] : memref<1x18x18x4xbf16, #tpu.memory_space<vmem>>, vector<1x1x16x4xbf16>
    %429 = vector.shape_cast %428 : vector<1x1x16x4xbf16> to vector<16x4xbf16>
    %c7_409 = arith.constant 7 : index
    %c0_410 = arith.constant 0 : index
    %c0_411 = arith.constant 0 : index
    %430 = vector.load %arg3[%c7_409, %c0_410, %c0_411] : memref<9x4x128xbf16, #tpu.memory_space<vmem>>, vector<1x4x128xbf16>
    %431 = vector.shape_cast %430 : vector<1x4x128xbf16> to vector<4x128xbf16>
    %cst_412 = arith.constant dense<0.000000e+00> : vector<16x128xf32>
    %432 = tpu.matmul %429, %431, %cst_412 {dimension_numbers = #tpu.dot_dimension_numbers<[1], [0], [0], [1], [0, 0, 1, 1], [], []>} : vector<16x4xbf16>, vector<4x128xbf16>, vector<16x128xf32> -> vector<16x128xf32>
    %433 = arith.addf %426, %432 : vector<16x128xf32>
    %c0_413 = arith.constant 0 : index
    %434 = arith.index_cast %419 : i32 to index
    %c2_414 = arith.constant 2 : index
    %c0_415 = arith.constant 0 : index
    %435 = vector.load %arg2[%c0_413, %434, %c2_414, %c0_415] : memref<1x18x18x4xbf16, #tpu.memory_space<vmem>>, vector<1x1x16x4xbf16>
    %436 = vector.shape_cast %435 : vector<1x1x16x4xbf16> to vector<16x4xbf16>
    %c8_416 = arith.constant 8 : index
    %c0_417 = arith.constant 0 : index
    %c0_418 = arith.constant 0 : index
    %437 = vector.load %arg3[%c8_416, %c0_417, %c0_418] : memref<9x4x128xbf16, #tpu.memory_space<vmem>>, vector<1x4x128xbf16>
    %438 = vector.shape_cast %437 : vector<1x4x128xbf16> to vector<4x128xbf16>
    %cst_419 = arith.constant dense<0.000000e+00> : vector<16x128xf32>
    %439 = tpu.matmul %436, %438, %cst_419 {dimension_numbers = #tpu.dot_dimension_numbers<[1], [0], [0], [1], [0, 0, 1, 1], [], []>} : vector<16x4xbf16>, vector<4x128xbf16>, vector<16x128xf32> -> vector<16x128xf32>
    %440 = arith.addf %433, %439 : vector<16x128xf32>
    %441 = vector.broadcast %1 : vector<1x128xf32> to vector<16x128xf32>
    %442 = arith.addf %440, %441 : vector<16x128xf32>
    %c0_420 = arith.constant 0 : index
    %c5_421 = arith.constant 5 : index
    %c0_422 = arith.constant 0 : index
    %c0_423 = arith.constant 0 : index
    %443 = vector.load %arg5[%c0_420, %c5_421, %c0_422, %c0_423] : memref<1x8x16x128xf32, #tpu.memory_space<vmem>>, vector<1x1x16x128xf32>
    %444 = vector.shape_cast %443 : vector<1x1x16x128xf32> to vector<16x128xf32>
    %445 = vector.shape_cast %442 : vector<16x128xf32> to vector<1x1x16x128xf32>
    tpu.vector_store %arg5[%c0_420, %c5_421, %c0_422, %c0_423], %445 {strides = array<i32>} : memref<1x8x16x128xf32, #tpu.memory_space<vmem>>, vector<1x1x16x128xf32>,
    %c6_i32 = arith.constant 6 : i32
    %446 = arith.addi %0, %c6_i32 : i32
    %c1_i32_424 = arith.constant 1 : i32
    %447 = arith.muli %446, %c1_i32_424 : i32
    %cst_425 = arith.constant 0.000000e+00 : f32
    %448 = vector.broadcast %cst_425 : f32 to vector<16x128xf32>
    %c0_i32_426 = arith.constant 0 : i32
    %449 = arith.addi %447, %c0_i32_426 : i32
    %c0_427 = arith.constant 0 : index
    %450 = arith.index_cast %449 : i32 to index
    %c0_428 = arith.constant 0 : index
    %c0_429 = arith.constant 0 : index
    %451 = vector.load %arg2[%c0_427, %450, %c0_428, %c0_429] : memref<1x18x18x4xbf16, #tpu.memory_space<vmem>>, vector<1x1x16x4xbf16>
    %452 = vector.shape_cast %451 : vector<1x1x16x4xbf16> to vector<16x4xbf16>
    %c0_430 = arith.constant 0 : index
    %c0_431 = arith.constant 0 : index
    %c0_432 = arith.constant 0 : index
    %453 = vector.load %arg3[%c0_430, %c0_431, %c0_432] : memref<9x4x128xbf16, #tpu.memory_space<vmem>>, vector<1x4x128xbf16>
    %454 = vector.shape_cast %453 : vector<1x4x128xbf16> to vector<4x128xbf16>
    %cst_433 = arith.constant dense<0.000000e+00> : vector<16x128xf32>
    %455 = tpu.matmul %452, %454, %cst_433 {dimension_numbers = #tpu.dot_dimension_numbers<[1], [0], [0], [1], [0, 0, 1, 1], [], []>} : vector<16x4xbf16>, vector<4x128xbf16>, vector<16x128xf32> -> vector<16x128xf32>
    %456 = arith.addf %448, %455 : vector<16x128xf32>
    %c0_434 = arith.constant 0 : index
    %457 = arith.index_cast %449 : i32 to index
    %c1_435 = arith.constant 1 : index
    %c0_436 = arith.constant 0 : index
    %458 = vector.load %arg2[%c0_434, %457, %c1_435, %c0_436] : memref<1x18x18x4xbf16, #tpu.memory_space<vmem>>, vector<1x1x16x4xbf16>
    %459 = vector.shape_cast %458 : vector<1x1x16x4xbf16> to vector<16x4xbf16>
    %c1_437 = arith.constant 1 : index
    %c0_438 = arith.constant 0 : index
    %c0_439 = arith.constant 0 : index
    %460 = vector.load %arg3[%c1_437, %c0_438, %c0_439] : memref<9x4x128xbf16, #tpu.memory_space<vmem>>, vector<1x4x128xbf16>
    %461 = vector.shape_cast %460 : vector<1x4x128xbf16> to vector<4x128xbf16>
    %cst_440 = arith.constant dense<0.000000e+00> : vector<16x128xf32>
    %462 = tpu.matmul %459, %461, %cst_440 {dimension_numbers = #tpu.dot_dimension_numbers<[1], [0], [0], [1], [0, 0, 1, 1], [], []>} : vector<16x4xbf16>, vector<4x128xbf16>, vector<16x128xf32> -> vector<16x128xf32>
    %463 = arith.addf %456, %462 : vector<16x128xf32>
    %c0_441 = arith.constant 0 : index
    %464 = arith.index_cast %449 : i32 to index
    %c2_442 = arith.constant 2 : index
    %c0_443 = arith.constant 0 : index
    %465 = vector.load %arg2[%c0_441, %464, %c2_442, %c0_443] : memref<1x18x18x4xbf16, #tpu.memory_space<vmem>>, vector<1x1x16x4xbf16>
    %466 = vector.shape_cast %465 : vector<1x1x16x4xbf16> to vector<16x4xbf16>
    %c2_444 = arith.constant 2 : index
    %c0_445 = arith.constant 0 : index
    %c0_446 = arith.constant 0 : index
    %467 = vector.load %arg3[%c2_444, %c0_445, %c0_446] : memref<9x4x128xbf16, #tpu.memory_space<vmem>>, vector<1x4x128xbf16>
    %468 = vector.shape_cast %467 : vector<1x4x128xbf16> to vector<4x128xbf16>
    %cst_447 = arith.constant dense<0.000000e+00> : vector<16x128xf32>
    %469 = tpu.matmul %466, %468, %cst_447 {dimension_numbers = #tpu.dot_dimension_numbers<[1], [0], [0], [1], [0, 0, 1, 1], [], []>} : vector<16x4xbf16>, vector<4x128xbf16>, vector<16x128xf32> -> vector<16x128xf32>
    %470 = arith.addf %463, %469 : vector<16x128xf32>
    %c1_i32_448 = arith.constant 1 : i32
    %471 = arith.addi %447, %c1_i32_448 : i32
    %c0_449 = arith.constant 0 : index
    %472 = arith.index_cast %471 : i32 to index
    %c0_450 = arith.constant 0 : index
    %c0_451 = arith.constant 0 : index
    %473 = vector.load %arg2[%c0_449, %472, %c0_450, %c0_451] : memref<1x18x18x4xbf16, #tpu.memory_space<vmem>>, vector<1x1x16x4xbf16>
    %474 = vector.shape_cast %473 : vector<1x1x16x4xbf16> to vector<16x4xbf16>
    %c3_452 = arith.constant 3 : index
    %c0_453 = arith.constant 0 : index
    %c0_454 = arith.constant 0 : index
    %475 = vector.load %arg3[%c3_452, %c0_453, %c0_454] : memref<9x4x128xbf16, #tpu.memory_space<vmem>>, vector<1x4x128xbf16>
    %476 = vector.shape_cast %475 : vector<1x4x128xbf16> to vector<4x128xbf16>
    %cst_455 = arith.constant dense<0.000000e+00> : vector<16x128xf32>
    %477 = tpu.matmul %474, %476, %cst_455 {dimension_numbers = #tpu.dot_dimension_numbers<[1], [0], [0], [1], [0, 0, 1, 1], [], []>} : vector<16x4xbf16>, vector<4x128xbf16>, vector<16x128xf32> -> vector<16x128xf32>
    %478 = arith.addf %470, %477 : vector<16x128xf32>
    %c0_456 = arith.constant 0 : index
    %479 = arith.index_cast %471 : i32 to index
    %c1_457 = arith.constant 1 : index
    %c0_458 = arith.constant 0 : index
    %480 = vector.load %arg2[%c0_456, %479, %c1_457, %c0_458] : memref<1x18x18x4xbf16, #tpu.memory_space<vmem>>, vector<1x1x16x4xbf16>
    %481 = vector.shape_cast %480 : vector<1x1x16x4xbf16> to vector<16x4xbf16>
    %c4_459 = arith.constant 4 : index
    %c0_460 = arith.constant 0 : index
    %c0_461 = arith.constant 0 : index
    %482 = vector.load %arg3[%c4_459, %c0_460, %c0_461] : memref<9x4x128xbf16, #tpu.memory_space<vmem>>, vector<1x4x128xbf16>
    %483 = vector.shape_cast %482 : vector<1x4x128xbf16> to vector<4x128xbf16>
    %cst_462 = arith.constant dense<0.000000e+00> : vector<16x128xf32>
    %484 = tpu.matmul %481, %483, %cst_462 {dimension_numbers = #tpu.dot_dimension_numbers<[1], [0], [0], [1], [0, 0, 1, 1], [], []>} : vector<16x4xbf16>, vector<4x128xbf16>, vector<16x128xf32> -> vector<16x128xf32>
    %485 = arith.addf %478, %484 : vector<16x128xf32>
    %c0_463 = arith.constant 0 : index
    %486 = arith.index_cast %471 : i32 to index
    %c2_464 = arith.constant 2 : index
    %c0_465 = arith.constant 0 : index
    %487 = vector.load %arg2[%c0_463, %486, %c2_464, %c0_465] : memref<1x18x18x4xbf16, #tpu.memory_space<vmem>>, vector<1x1x16x4xbf16>
    %488 = vector.shape_cast %487 : vector<1x1x16x4xbf16> to vector<16x4xbf16>
    %c5_466 = arith.constant 5 : index
    %c0_467 = arith.constant 0 : index
    %c0_468 = arith.constant 0 : index
    %489 = vector.load %arg3[%c5_466, %c0_467, %c0_468] : memref<9x4x128xbf16, #tpu.memory_space<vmem>>, vector<1x4x128xbf16>
    %490 = vector.shape_cast %489 : vector<1x4x128xbf16> to vector<4x128xbf16>
    %cst_469 = arith.constant dense<0.000000e+00> : vector<16x128xf32>
    %491 = tpu.matmul %488, %490, %cst_469 {dimension_numbers = #tpu.dot_dimension_numbers<[1], [0], [0], [1], [0, 0, 1, 1], [], []>} : vector<16x4xbf16>, vector<4x128xbf16>, vector<16x128xf32> -> vector<16x128xf32>
    %492 = arith.addf %485, %491 : vector<16x128xf32>
    %c2_i32_470 = arith.constant 2 : i32
    %493 = arith.addi %447, %c2_i32_470 : i32
    %c0_471 = arith.constant 0 : index
    %494 = arith.index_cast %493 : i32 to index
    %c0_472 = arith.constant 0 : index
    %c0_473 = arith.constant 0 : index
    %495 = vector.load %arg2[%c0_471, %494, %c0_472, %c0_473] : memref<1x18x18x4xbf16, #tpu.memory_space<vmem>>, vector<1x1x16x4xbf16>
    %496 = vector.shape_cast %495 : vector<1x1x16x4xbf16> to vector<16x4xbf16>
    %c6_474 = arith.constant 6 : index
    %c0_475 = arith.constant 0 : index
    %c0_476 = arith.constant 0 : index
    %497 = vector.load %arg3[%c6_474, %c0_475, %c0_476] : memref<9x4x128xbf16, #tpu.memory_space<vmem>>, vector<1x4x128xbf16>
    %498 = vector.shape_cast %497 : vector<1x4x128xbf16> to vector<4x128xbf16>
    %cst_477 = arith.constant dense<0.000000e+00> : vector<16x128xf32>
    %499 = tpu.matmul %496, %498, %cst_477 {dimension_numbers = #tpu.dot_dimension_numbers<[1], [0], [0], [1], [0, 0, 1, 1], [], []>} : vector<16x4xbf16>, vector<4x128xbf16>, vector<16x128xf32> -> vector<16x128xf32>
    %500 = arith.addf %492, %499 : vector<16x128xf32>
    %c0_478 = arith.constant 0 : index
    %501 = arith.index_cast %493 : i32 to index
    %c1_479 = arith.constant 1 : index
    %c0_480 = arith.constant 0 : index
    %502 = vector.load %arg2[%c0_478, %501, %c1_479, %c0_480] : memref<1x18x18x4xbf16, #tpu.memory_space<vmem>>, vector<1x1x16x4xbf16>
    %503 = vector.shape_cast %502 : vector<1x1x16x4xbf16> to vector<16x4xbf16>
    %c7_481 = arith.constant 7 : index
    %c0_482 = arith.constant 0 : index
    %c0_483 = arith.constant 0 : index
    %504 = vector.load %arg3[%c7_481, %c0_482, %c0_483] : memref<9x4x128xbf16, #tpu.memory_space<vmem>>, vector<1x4x128xbf16>
    %505 = vector.shape_cast %504 : vector<1x4x128xbf16> to vector<4x128xbf16>
    %cst_484 = arith.constant dense<0.000000e+00> : vector<16x128xf32>
    %506 = tpu.matmul %503, %505, %cst_484 {dimension_numbers = #tpu.dot_dimension_numbers<[1], [0], [0], [1], [0, 0, 1, 1], [], []>} : vector<16x4xbf16>, vector<4x128xbf16>, vector<16x128xf32> -> vector<16x128xf32>
    %507 = arith.addf %500, %506 : vector<16x128xf32>
    %c0_485 = arith.constant 0 : index
    %508 = arith.index_cast %493 : i32 to index
    %c2_486 = arith.constant 2 : index
    %c0_487 = arith.constant 0 : index
    %509 = vector.load %arg2[%c0_485, %508, %c2_486, %c0_487] : memref<1x18x18x4xbf16, #tpu.memory_space<vmem>>, vector<1x1x16x4xbf16>
    %510 = vector.shape_cast %509 : vector<1x1x16x4xbf16> to vector<16x4xbf16>
    %c8_488 = arith.constant 8 : index
    %c0_489 = arith.constant 0 : index
    %c0_490 = arith.constant 0 : index
    %511 = vector.load %arg3[%c8_488, %c0_489, %c0_490] : memref<9x4x128xbf16, #tpu.memory_space<vmem>>, vector<1x4x128xbf16>
    %512 = vector.shape_cast %511 : vector<1x4x128xbf16> to vector<4x128xbf16>
    %cst_491 = arith.constant dense<0.000000e+00> : vector<16x128xf32>
    %513 = tpu.matmul %510, %512, %cst_491 {dimension_numbers = #tpu.dot_dimension_numbers<[1], [0], [0], [1], [0, 0, 1, 1], [], []>} : vector<16x4xbf16>, vector<4x128xbf16>, vector<16x128xf32> -> vector<16x128xf32>
    %514 = arith.addf %507, %513 : vector<16x128xf32>
    %515 = vector.broadcast %1 : vector<1x128xf32> to vector<16x128xf32>
    %516 = arith.addf %514, %515 : vector<16x128xf32>
    %c0_492 = arith.constant 0 : index
    %c6_493 = arith.constant 6 : index
    %c0_494 = arith.constant 0 : index
    %c0_495 = arith.constant 0 : index
    %517 = vector.load %arg5[%c0_492, %c6_493, %c0_494, %c0_495] : memref<1x8x16x128xf32, #tpu.memory_space<vmem>>, vector<1x1x16x128xf32>
    %518 = vector.shape_cast %517 : vector<1x1x16x128xf32> to vector<16x128xf32>
    %519 = vector.shape_cast %516 : vector<16x128xf32> to vector<1x1x16x128xf32>
    tpu.vector_store %arg5[%c0_492, %c6_493, %c0_494, %c0_495], %519 {strides = array<i32>} : memref<1x8x16x128xf32, #tpu.memory_space<vmem>>, vector<1x1x16x128xf32>,
    %c7_i32 = arith.constant 7 : i32
    %520 = arith.addi %0, %c7_i32 : i32
    %c1_i32_496 = arith.constant 1 : i32
    %521 = arith.muli %520, %c1_i32_496 : i32
    %cst_497 = arith.constant 0.000000e+00 : f32
    %522 = vector.broadcast %cst_497 : f32 to vector<16x128xf32>
    %c0_i32_498 = arith.constant 0 : i32
    %523 = arith.addi %521, %c0_i32_498 : i32
    %c0_499 = arith.constant 0 : index
    %524 = arith.index_cast %523 : i32 to index
    %c0_500 = arith.constant 0 : index
    %c0_501 = arith.constant 0 : index
    %525 = vector.load %arg2[%c0_499, %524, %c0_500, %c0_501] : memref<1x18x18x4xbf16, #tpu.memory_space<vmem>>, vector<1x1x16x4xbf16>
    %526 = vector.shape_cast %525 : vector<1x1x16x4xbf16> to vector<16x4xbf16>
    %c0_502 = arith.constant 0 : index
    %c0_503 = arith.constant 0 : index
    %c0_504 = arith.constant 0 : index
    %527 = vector.load %arg3[%c0_502, %c0_503, %c0_504] : memref<9x4x128xbf16, #tpu.memory_space<vmem>>, vector<1x4x128xbf16>
    %528 = vector.shape_cast %527 : vector<1x4x128xbf16> to vector<4x128xbf16>
    %cst_505 = arith.constant dense<0.000000e+00> : vector<16x128xf32>
    %529 = tpu.matmul %526, %528, %cst_505 {dimension_numbers = #tpu.dot_dimension_numbers<[1], [0], [0], [1], [0, 0, 1, 1], [], []>} : vector<16x4xbf16>, vector<4x128xbf16>, vector<16x128xf32> -> vector<16x128xf32>
    %530 = arith.addf %522, %529 : vector<16x128xf32>
    %c0_506 = arith.constant 0 : index
    %531 = arith.index_cast %523 : i32 to index
    %c1_507 = arith.constant 1 : index
    %c0_508 = arith.constant 0 : index
    %532 = vector.load %arg2[%c0_506, %531, %c1_507, %c0_508] : memref<1x18x18x4xbf16, #tpu.memory_space<vmem>>, vector<1x1x16x4xbf16>
    %533 = vector.shape_cast %532 : vector<1x1x16x4xbf16> to vector<16x4xbf16>
    %c1_509 = arith.constant 1 : index
    %c0_510 = arith.constant 0 : index
    %c0_511 = arith.constant 0 : index
    %534 = vector.load %arg3[%c1_509, %c0_510, %c0_511] : memref<9x4x128xbf16, #tpu.memory_space<vmem>>, vector<1x4x128xbf16>
    %535 = vector.shape_cast %534 : vector<1x4x128xbf16> to vector<4x128xbf16>
    %cst_512 = arith.constant dense<0.000000e+00> : vector<16x128xf32>
    %536 = tpu.matmul %533, %535, %cst_512 {dimension_numbers = #tpu.dot_dimension_numbers<[1], [0], [0], [1], [0, 0, 1, 1], [], []>} : vector<16x4xbf16>, vector<4x128xbf16>, vector<16x128xf32> -> vector<16x128xf32>
    %537 = arith.addf %530, %536 : vector<16x128xf32>
    %c0_513 = arith.constant 0 : index
    %538 = arith.index_cast %523 : i32 to index
    %c2_514 = arith.constant 2 : index
    %c0_515 = arith.constant 0 : index
    %539 = vector.load %arg2[%c0_513, %538, %c2_514, %c0_515] : memref<1x18x18x4xbf16, #tpu.memory_space<vmem>>, vector<1x1x16x4xbf16>
    %540 = vector.shape_cast %539 : vector<1x1x16x4xbf16> to vector<16x4xbf16>
    %c2_516 = arith.constant 2 : index
    %c0_517 = arith.constant 0 : index
    %c0_518 = arith.constant 0 : index
    %541 = vector.load %arg3[%c2_516, %c0_517, %c0_518] : memref<9x4x128xbf16, #tpu.memory_space<vmem>>, vector<1x4x128xbf16>
    %542 = vector.shape_cast %541 : vector<1x4x128xbf16> to vector<4x128xbf16>
    %cst_519 = arith.constant dense<0.000000e+00> : vector<16x128xf32>
    %543 = tpu.matmul %540, %542, %cst_519 {dimension_numbers = #tpu.dot_dimension_numbers<[1], [0], [0], [1], [0, 0, 1, 1], [], []>} : vector<16x4xbf16>, vector<4x128xbf16>, vector<16x128xf32> -> vector<16x128xf32>
    %544 = arith.addf %537, %543 : vector<16x128xf32>
    %c1_i32_520 = arith.constant 1 : i32
    %545 = arith.addi %521, %c1_i32_520 : i32
    %c0_521 = arith.constant 0 : index
    %546 = arith.index_cast %545 : i32 to index
    %c0_522 = arith.constant 0 : index
    %c0_523 = arith.constant 0 : index
    %547 = vector.load %arg2[%c0_521, %546, %c0_522, %c0_523] : memref<1x18x18x4xbf16, #tpu.memory_space<vmem>>, vector<1x1x16x4xbf16>
    %548 = vector.shape_cast %547 : vector<1x1x16x4xbf16> to vector<16x4xbf16>
    %c3_524 = arith.constant 3 : index
    %c0_525 = arith.constant 0 : index
    %c0_526 = arith.constant 0 : index
    %549 = vector.load %arg3[%c3_524, %c0_525, %c0_526] : memref<9x4x128xbf16, #tpu.memory_space<vmem>>, vector<1x4x128xbf16>
    %550 = vector.shape_cast %549 : vector<1x4x128xbf16> to vector<4x128xbf16>
    %cst_527 = arith.constant dense<0.000000e+00> : vector<16x128xf32>
    %551 = tpu.matmul %548, %550, %cst_527 {dimension_numbers = #tpu.dot_dimension_numbers<[1], [0], [0], [1], [0, 0, 1, 1], [], []>} : vector<16x4xbf16>, vector<4x128xbf16>, vector<16x128xf32> -> vector<16x128xf32>
    %552 = arith.addf %544, %551 : vector<16x128xf32>
    %c0_528 = arith.constant 0 : index
    %553 = arith.index_cast %545 : i32 to index
    %c1_529 = arith.constant 1 : index
    %c0_530 = arith.constant 0 : index
    %554 = vector.load %arg2[%c0_528, %553, %c1_529, %c0_530] : memref<1x18x18x4xbf16, #tpu.memory_space<vmem>>, vector<1x1x16x4xbf16>
    %555 = vector.shape_cast %554 : vector<1x1x16x4xbf16> to vector<16x4xbf16>
    %c4_531 = arith.constant 4 : index
    %c0_532 = arith.constant 0 : index
    %c0_533 = arith.constant 0 : index
    %556 = vector.load %arg3[%c4_531, %c0_532, %c0_533] : memref<9x4x128xbf16, #tpu.memory_space<vmem>>, vector<1x4x128xbf16>
    %557 = vector.shape_cast %556 : vector<1x4x128xbf16> to vector<4x128xbf16>
    %cst_534 = arith.constant dense<0.000000e+00> : vector<16x128xf32>
    %558 = tpu.matmul %555, %557, %cst_534 {dimension_numbers = #tpu.dot_dimension_numbers<[1], [0], [0], [1], [0, 0, 1, 1], [], []>} : vector<16x4xbf16>, vector<4x128xbf16>, vector<16x128xf32> -> vector<16x128xf32>
    %559 = arith.addf %552, %558 : vector<16x128xf32>
    %c0_535 = arith.constant 0 : index
    %560 = arith.index_cast %545 : i32 to index
    %c2_536 = arith.constant 2 : index
    %c0_537 = arith.constant 0 : index
    %561 = vector.load %arg2[%c0_535, %560, %c2_536, %c0_537] : memref<1x18x18x4xbf16, #tpu.memory_space<vmem>>, vector<1x1x16x4xbf16>
    %562 = vector.shape_cast %561 : vector<1x1x16x4xbf16> to vector<16x4xbf16>
    %c5_538 = arith.constant 5 : index
    %c0_539 = arith.constant 0 : index
    %c0_540 = arith.constant 0 : index
    %563 = vector.load %arg3[%c5_538, %c0_539, %c0_540] : memref<9x4x128xbf16, #tpu.memory_space<vmem>>, vector<1x4x128xbf16>
    %564 = vector.shape_cast %563 : vector<1x4x128xbf16> to vector<4x128xbf16>
    %cst_541 = arith.constant dense<0.000000e+00> : vector<16x128xf32>
    %565 = tpu.matmul %562, %564, %cst_541 {dimension_numbers = #tpu.dot_dimension_numbers<[1], [0], [0], [1], [0, 0, 1, 1], [], []>} : vector<16x4xbf16>, vector<4x128xbf16>, vector<16x128xf32> -> vector<16x128xf32>
    %566 = arith.addf %559, %565 : vector<16x128xf32>
    %c2_i32_542 = arith.constant 2 : i32
    %567 = arith.addi %521, %c2_i32_542 : i32
    %c0_543 = arith.constant 0 : index
    %568 = arith.index_cast %567 : i32 to index
    %c0_544 = arith.constant 0 : index
    %c0_545 = arith.constant 0 : index
    %569 = vector.load %arg2[%c0_543, %568, %c0_544, %c0_545] : memref<1x18x18x4xbf16, #tpu.memory_space<vmem>>, vector<1x1x16x4xbf16>
    %570 = vector.shape_cast %569 : vector<1x1x16x4xbf16> to vector<16x4xbf16>
    %c6_546 = arith.constant 6 : index
    %c0_547 = arith.constant 0 : index
    %c0_548 = arith.constant 0 : index
    %571 = vector.load %arg3[%c6_546, %c0_547, %c0_548] : memref<9x4x128xbf16, #tpu.memory_space<vmem>>, vector<1x4x128xbf16>
    %572 = vector.shape_cast %571 : vector<1x4x128xbf16> to vector<4x128xbf16>
    %cst_549 = arith.constant dense<0.000000e+00> : vector<16x128xf32>
    %573 = tpu.matmul %570, %572, %cst_549 {dimension_numbers = #tpu.dot_dimension_numbers<[1], [0], [0], [1], [0, 0, 1, 1], [], []>} : vector<16x4xbf16>, vector<4x128xbf16>, vector<16x128xf32> -> vector<16x128xf32>
    %574 = arith.addf %566, %573 : vector<16x128xf32>
    %c0_550 = arith.constant 0 : index
    %575 = arith.index_cast %567 : i32 to index
    %c1_551 = arith.constant 1 : index
    %c0_552 = arith.constant 0 : index
    %576 = vector.load %arg2[%c0_550, %575, %c1_551, %c0_552] : memref<1x18x18x4xbf16, #tpu.memory_space<vmem>>, vector<1x1x16x4xbf16>
    %577 = vector.shape_cast %576 : vector<1x1x16x4xbf16> to vector<16x4xbf16>
    %c7_553 = arith.constant 7 : index
    %c0_554 = arith.constant 0 : index
    %c0_555 = arith.constant 0 : index
    %578 = vector.load %arg3[%c7_553, %c0_554, %c0_555] : memref<9x4x128xbf16, #tpu.memory_space<vmem>>, vector<1x4x128xbf16>
    %579 = vector.shape_cast %578 : vector<1x4x128xbf16> to vector<4x128xbf16>
    %cst_556 = arith.constant dense<0.000000e+00> : vector<16x128xf32>
    %580 = tpu.matmul %577, %579, %cst_556 {dimension_numbers = #tpu.dot_dimension_numbers<[1], [0], [0], [1], [0, 0, 1, 1], [], []>} : vector<16x4xbf16>, vector<4x128xbf16>, vector<16x128xf32> -> vector<16x128xf32>
    %581 = arith.addf %574, %580 : vector<16x128xf32>
    %c0_557 = arith.constant 0 : index
    %582 = arith.index_cast %567 : i32 to index
    %c2_558 = arith.constant 2 : index
    %c0_559 = arith.constant 0 : index
    %583 = vector.load %arg2[%c0_557, %582, %c2_558, %c0_559] : memref<1x18x18x4xbf16, #tpu.memory_space<vmem>>, vector<1x1x16x4xbf16>
    %584 = vector.shape_cast %583 : vector<1x1x16x4xbf16> to vector<16x4xbf16>
    %c8_560 = arith.constant 8 : index
    %c0_561 = arith.constant 0 : index
    %c0_562 = arith.constant 0 : index
    %585 = vector.load %arg3[%c8_560, %c0_561, %c0_562] : memref<9x4x128xbf16, #tpu.memory_space<vmem>>, vector<1x4x128xbf16>
    %586 = vector.shape_cast %585 : vector<1x4x128xbf16> to vector<4x128xbf16>
    %cst_563 = arith.constant dense<0.000000e+00> : vector<16x128xf32>
    %587 = tpu.matmul %584, %586, %cst_563 {dimension_numbers = #tpu.dot_dimension_numbers<[1], [0], [0], [1], [0, 0, 1, 1], [], []>} : vector<16x4xbf16>, vector<4x128xbf16>, vector<16x128xf32> -> vector<16x128xf32>
    %588 = arith.addf %581, %587 : vector<16x128xf32>
    %589 = vector.broadcast %1 : vector<1x128xf32> to vector<16x128xf32>
    %590 = arith.addf %588, %589 : vector<16x128xf32>
    %c0_564 = arith.constant 0 : index
    %c7_565 = arith.constant 7 : index
    %c0_566 = arith.constant 0 : index
    %c0_567 = arith.constant 0 : index
    %591 = vector.load %arg5[%c0_564, %c7_565, %c0_566, %c0_567] : memref<1x8x16x128xf32, #tpu.memory_space<vmem>>, vector<1x1x16x128xf32>
    %592 = vector.shape_cast %591 : vector<1x1x16x128xf32> to vector<16x128xf32>
    %593 = vector.shape_cast %590 : vector<16x128xf32> to vector<1x1x16x128xf32>
    tpu.vector_store %arg5[%c0_564, %c7_565, %c0_566, %c0_567], %593 {strides = array<i32>} : memref<1x8x16x128xf32, #tpu.memory_space<vmem>>, vector<1x1x16x128xf32>,
    return
  }
  func.func @transform_0(%arg0: i32, %arg1: i32) -> (i32, i32, i32, i32) {
    %c0_i32 = arith.constant 0 : i32
    %c0_i32_0 = arith.constant 0 : i32
    %c0_i32_1 = arith.constant 0 : i32
    %c0_i32_2 = arith.constant 0 : i32
    return %arg0, %c0_i32, %c0_i32_0, %c0_i32_1 : i32, i32, i32, i32
  }
  func.func @transform_1(%arg0: i32, %arg1: i32) -> (i32, i32, i32) {
    %c0_i32 = arith.constant 0 : i32
    %c0_i32_0 = arith.constant 0 : i32
    %c0_i32_1 = arith.constant 0 : i32
    %c0_i32_2 = arith.constant 0 : i32
    return %c0_i32, %c0_i32_0, %c0_i32_1 : i32, i32, i32
  }
  func.func @transform_2(%arg0: i32, %arg1: i32) -> (i32, i32) {
    %c0_i32 = arith.constant 0 : i32
    %c0_i32_0 = arith.constant 0 : i32
    %c0_i32_1 = arith.constant 0 : i32
    return %c0_i32, %c0_i32_0 : i32, i32
  }
  func.func @transform_3(%arg0: i32, %arg1: i32) -> (i32, i32, i32, i32) {
    %c0_i32 = arith.constant 0 : i32
    %c0_i32_0 = arith.constant 0 : i32
    %c0_i32_1 = arith.constant 0 : i32
    return %arg0, %arg1, %c0_i32, %c0_i32_0 : i32, i32, i32, i32
  }
}

</mosaic_0001>

<bundles_post_ra>
// kernel: tpu_custom_call.1
= control target key start
LH: loop header
LB: loop body
LE: loop exit
PB: predicated region body
PF: predicated region fallthrough
CT: control target
= control target key end

     0   :  { %8 = vsyncpa [#allocation3], 0  ;;  %s7156_s0 = inlined_call_operand.vmem [shape: bf16[2,18,18,4], index: 0, kind: input, shape index: {}]   ;;  %s7157_s1 = inlined_call_operand.vmem [shape: bf16[9,4,128], index: 1, kind: input, shape index: {}]   ;;  %s7158_s2 = inlined_call_operand.vmem [shape: f32[1,128], index: 2, kind: input, shape index: {}]   ;;  %s7159_s3 = inlined_call_operand.hbm [shape: f32[2,16,16,128], index: 3, kind: output, shape index: {}]  }
   0x1   :  { %10 = vsyncpa [#allocation3 + $0x1], 0  ;;  %s6066_s12 = smov 0   ;;  %s6068_s13 = smov 0  }
   0x2   :  { %s6070_s14 = smov 0   ;;  %s6072_s15 = smov 0  }
   0x3   :  { %s6074_s16 = smov 0   ;;  %s6076_s17 = smov 0  }
   0x4   :  { %s6078_s18 = smov 0   ;;  %s6080_s19 = smov 0  }
   0x5 LB: > { %s4806_s20 = sadd.s32 4294967295, %s6039_s19   ;;  %s4807_s21 = sadd.s32 4294967294, %s6039_s19   ;;  %s6039_s19 = sphi %s6080_s19, %s16_s19   ;;  %s6035_s18 = sphi %s6078_s18, %s7168_s18   ;;  %s6031_s17 = sphi %s6076_s17, %s7167_s17   ;;  %s6027_s16 = sphi %s6074_s16, %s7166_s16   ;;  %s6023_s15 = sphi %s6072_s15, %s7165_s15   ;;  %s6019_s14 = sphi %s6070_s14, %s7164_s14   ;;  %s6015_s13 = sphi %s6068_s13, %s7163_s13   ;;  %s6011_s12 = sphi %s6066_s12, %s7162_s12  }
   0x6   : > { %s25_s22 = sadd.s32 1, %s6031_s17  ;;  %s28_s23 = sadd.s32 1, %s6035_s18 }
   0x7   : > { %p26_p0 = scmp.ge.s32.totalorder %s25_s22, 2  ;;  %p115_p1 = scmp.ne.s32.totalorder %s6019_s14, %s6015_s13 }
   0x8   : > { %p116_p2 = scmp.eq.s32.totalorder %s4806_s20, 3  ;;  %p121_p5 = scmp.ne.s32.totalorder %s6015_s13, %s6011_s12 }
   0x9   : > { %s7170_s22 = smov (%p26_p0, %s25_s22), 0  ;;  %s7172_s23 = smov (!%p26_p0, %s28_s23), %s6035_s18 }
   0xa   : > { %s101_s24 = ssub.s32 %s6031_s17, %s7170_s22  ;;  %p6117_p3 = por %p116_p2, %p115_p1 }
   0xb   : > { %p30_p4 = scmp.ge.s32.totalorder %s7172_s23, 2  ;;  %p122_p6 = scmp.eq.s32.totalorder %s4807_s21, 3 }
   0xc   : > { %p4810_p7 = scmp.ge.s32.totalorder %s6039_s19, 1  ;;  %p154_p9 = scmp.lt.s32.totalorder %s6039_s19, 5 }
   0xd   : > { %s7174_s23 = smov (%p30_p4, %s7172_s23), 0  ;;  %p6126_p8 = por %p122_p6, %p121_p5 }
   0xe   : > { %s100_s27 = ssub.s32 %s6035_s18, %s7174_s23  ;;  %s105_s28 = sadd.s32 1, %s6019_s14 }
   0xf   : > { %s102_s29 = sor.u32 %s101_s24, %s100_s27  ;;  %p155_p10 = pnand %p4810_p7, %p154_p9 }
  0x10   : > { %p103_p11 = scmp.eq.s32.totalorder %s102_s29, 0  ;;  %p178_p12 = scmp.lt.s32.totalorder (!%p155_p10), %s6027_s16, 1 }
  0x11   : > { %158 = sbr.rel (%p155_p10) target bundleno = 536 (0x218), region = 32  ;;  %s5205_s5 = sshll.u32 (!%p155_p10), %s6023_s15, 4 }
  0x12   : > { %s6135_s30 = scalar_select %p103_p11, %s6019_s14, %s105_s28  }
  0x13   : > { %s5204_s9 = smul.u32 (!%p155_p10), 96, %s6023_s15  ;;  %s5200_s6 = sshll.u32 (!%p155_p10), %s6027_s16, 5 }
  0x14   : > { %s4689_s7 = sadd.s32 (!%p155_p10), %s5205_s5, %s5200_s6 }
  0x15   : > { %s5201_s11 = sshll.u32 (!%p155_p10), %s4689_s7, 7 }
  0x16   : > { %v192_v0 = vld [vmem:[%s7157_s1] sm:$0x3]  ;;  %vm221_vm0 = vcmask 1041408   ;;  %v6041_v1 = vmov 0.0   ;;  %v4816_v3 = vld [vmem:[%s7157_s1 + $0x2] sm:$0x3]  ;;  %s7098_s24 = scalar_lea.hbm %s7159_s3, %s5201_s11 }
  0x17   : > { %5356 = vmatprep.subr.bf16.mxu1 %v6041_v1  ;;  %v269_v2 = vsel %vm221_vm0, %v192_v0, 0  ;;  %5350 = vmatprep.subr.bf16.mxu0 %v6041_v1  ;;  %vm6042_vm1 = vmmov 0   ;;  %v223_v4 = vsel %vm221_vm0, %v4816_v3, 0  ;;  %s179_s8 = scalar_select %p178_p12, %s6027_s16, 1  ;;  %v4828_v5 = vld [vmem:[%s7157_s1 + $0x6] sm:$0x3] }
  0x18   : > { %5357 = vmatpush3.bf16.msra.mxu1 %v269_v2  ;;  %5358 = vmatprep.mubr.msk.bf16.mxu1 %vm6042_vm1, %v6041_v1  ;;  %vm217_vm2 = vcmask 31744   ;;  %v388_v10 = vsel %vm221_vm0, %v4828_v5, 0  ;;  %v4821_v15 = vld [vmem:[%s7157_s1 + $0x4] sm:$0x3]  ;;  %vm204_vm3 = vsmask.f32 7424 }
  0x19   : > { %5351 = vmatpush3.bf16.msra.mxu0 %v223_v4  ;;  %5352 = vmatprep.mubr.msk.bf16.mxu0 %vm6042_vm1, %v6041_v1  ;;  %s5782_s10 = smul.u32 216, %s179_s8  ;;  %v4839_v26 = vld [vmem:[%s7157_s1 + $0xa] sm:$0x3]  ;;  %v326_v29 = vsel %vm221_vm0, %v4821_v15, 0  ;;  %vm318_vm4 = vcmask 1046528  }
  0x1a   : > { %5362 = vmatprep.subr.bf16.mxu0 %v6041_v1  ;;  %5368 = vmatprep.subr.bf16.mxu1 %v6041_v1  ;;  %v520_v35 = vsel %vm221_vm0, %v4839_v26, 0  ;;  %v4834_v36 = vld [vmem:[%s7157_s1 + $0x8] sm:$0x3]  ;;  %v4852_v49 = vld [vmem:[%s7157_s1 + $0xe] sm:$0x3] }
  0x1b   : > { %s182_s21 = scalar_lea.vmem %s7156_s0, %s5782_s10  ;;  %v462_v45 = vsel %vm221_vm0, %v4834_v36, 0  ;;  %v4846_v55 = vld [vmem:[%s7157_s1 + $0xc] sm:$0x3]  ;;  %v656_v56 = vsel %vm221_vm0, %v4852_v49, 0  ;;  %v4864_v2 = vld [vmem:[%s7157_s1 + $0x2] sm:$0x3] }
  0x1c   : > { %s6162_s28 = scalar_lea.vmem %s182_s21, %s5204_s9  ;;  %v582_v0 = vsel %vm221_vm0, %v4846_v55, 0  ;;  %s175_s21 = sand.u32 1, %s6015_s13  }
  0x1d   : > { %v190_v6 = vld [vmem:[%s6162_s28] sm:$0xf]  ;;  %v191_v7 = vld [vmem:[%s6162_s28 + $0x4] sm:$0xf]  ;;  %v4831_v16 = vld [vmem:[%s6162_s28 + $0xc] sm:$0xf] }
  0x1e   : > { %v4817_v8 = vcombine.low %v190_v6, %v191_v7  ;;  %v5860_v9 = vld [vmem:[%s6162_s28 + $0x8] ss:$0 sps:$4 sm:$0x11]   ;;  %v312_v11 = vld [vmem:[%s6162_s28] sm:$0xe]  ;;  %v5861_v25 = vld [vmem:[%s6162_s28 + $0xc] sm:$0xff]  }
  0x1f   : > { %v213_v14 = vshll.u32 %v5860_v9, 16  ;;  %v4832_v17 = vld [vmem:[%s6162_s28 + $0x10] sm:$0xf]  ;;  %v4838_v20 = vld [vmem:[%s6162_s28 + $0xc] sm:$0xe]  ;;  %v4822_v22 = vcombine.low %v312_v11, %v191_v7  ;;  %v320_v34 = vrot.slane %v5860_v9, 1 }
  0x20   : > { %5359 = vmatmul.mubr.msk.bf16.vlgmr.msra.gmra.mxu1 %vm217_vm2, %v4817_v8  ;;  %v206_v12 = vshrl.u32 %v4817_v8, 16  ;;  %v208_v13 = vshll.u32 %v4817_v8, 16  ;;  %v4849_v21 = vld [vmem:[%s6162_s28 + $0x18] sm:$0xf]  ;;  %v6181_v23 = vld [vmem:[%s6162_s28 + $0x1c] sm:$0xf]  ;;  %v4835_v27 = vcombine.low %v4831_v16, %v4832_v17  ;;  %v4840_v30 = vcombine.low %v4838_v20, %v4832_v17 }
  0x21   : > { %5369 = vmatpush3.bf16.msra.mxu1 %v388_v10  ;;  %5370 = vmatprep.mubr.msk.bf16.mxu1 %vm6042_vm1, %v6041_v1  ;;  %v215_v19 = vrot.slane %v213_v14, 1  ;;  %v5863_v28 = vld [vmem:[%s6162_s28 + $0x14] ss:$0 sps:$4 sm:$0x11]   ;;  %v4853_v31 = vcombine.low %v4849_v21, %v6181_v23  ;;  %v319_v33 = vrot.slane %v4822_v22, 1  ;;  %v798_v7 = vsel %vm221_vm0, %v4864_v2, 0 }
  0x22   : > { %v210_v18 = vrot.slane %v208_v13, 1  ;;  %5380 = vmatprep.subr.bf16.mxu1 %v6041_v1  ;;  %v449_v37 = vshll.u32 %v4835_v27, 16  ;;  %v513_v38 = vrot.slane %v4840_v30, 1  ;;  %v514_v39 = vrot.slane %v5863_v28, 1  ;;  %v4861_v42 = vld [vmem:[%s6162_s28 + $0xc] sm:$0xf] }
  0x23   : > { %v6201_v40 = vld [vmem:[%s6162_s28 + $0x20] ss:$0 sps:$4 sm:$0x11]   ;;  %v643_v41 = vshll.u32 %v4853_v31, 16  ;;  %v6207_v43 = vld [vmem:[%s6162_s28 + $0x10] sm:$0xf]  ;;  %v321_v44 = vsel %vm318_vm4, %v319_v33, %v320_v34 }
  0x24   : > { %v211_v24 = vor.u32 %v210_v18, %v206_v12  ;;  %v447_v46 = vshrl.u32 %v4835_v27, 16  ;;  %v451_v47 = vrot.slane %v449_v37, 1  ;;  %v454_v48 = vshll.u32 %v5863_v28, 16  ;;  %v5869_v61 = vld [vmem:[%s6162_s28 + $0x14] ss:$0 sps:$4 sm:$0x11]  }
  0x25   : > { %v641_v50 = vshrl.u32 %v4853_v31, 16  ;;  %v515_v51 = vsel %vm318_vm4, %v513_v38, %v514_v39  ;;  %v645_v52 = vrot.slane %v643_v41, 1  ;;  %v648_v53 = vshll.u32 %v6201_v40, 16  ;;  %v4857_v8 = vld [vmem:[%s7157_s1 + $0x10] sm:$0x3]  ;;  %v5867_v15 = vld [vmem:[%s6162_s28 + $0x18] sm:$0xff]  }
  0x26   : > { %v216_v32 = vsel %vm204_vm3, %v211_v24, %v215_v19  ;;  %v6218_v54 = vcombine.low %v4861_v42, %v6207_v43  ;;  %v452_v57 = vor.u32 %v451_v47, %v447_v46  ;;  %v456_v58 = vrot.slane %v454_v48, 1  ;;  %v4856_v9 = vld [vmem:[%s6162_s28 + $0x18] sm:$0xe]  ;;  %v4869_v12 = vld [vmem:[%s6162_s28 + $0xc] sm:$0xe]  ;;  %s4811_s29 = sshll.u32 %s175_s21, 7 }
  0x27   : > { %5353 = vmatmul.mubr.msk.bf16.vlgmr.msra.gmra.mxu0 %vm217_vm2, %v216_v32  ;;  %v646_v59 = vor.u32 %v645_v52, %v641_v50  ;;  %v650_v60 = vrot.slane %v648_v53, 1  ;;  %v790_v6 = vshll.u32 %v5869_v61, 16  ;;  %v4878_v13 = vld [vmem:[%s6162_s28 + $0x18] sm:$0xf]  ;;  %v6256_v14 = vld [vmem:[%s6162_s28 + $0x1c] sm:$0xf]  ;;  %v4858_v16 = vcombine.low %v4856_v9, %v6181_v23 }
  0x28   : > { %5363 = vmatpush3.bf16.msra.mxu0 %v326_v29  ;;  %5371 = vmatmul.mubr.msk.bf16.vlgmr.msra.gmra.mxu1 %vm217_vm2, %v5861_v25  ;;  %v785_v62 = vshll.u32 %v6218_v54, 16  ;;  %v457_v63 = vsel %vm204_vm3, %v452_v57, %v456_v58  ;;  %v783_v4 = vshrl.u32 %v6218_v54, 16  ;;  %v4870_v17 = vld [vmem:[%s7157_s1 + $0x4] sm:$0x3]  ;;  %v4871_v18 = vcombine.low %v4869_v12, %v6207_v43  ;;  %v771_v22 = vld [vmem:[%s7157_s1] sm:$0x3] }
  0x29   : > { %5364 = vmatprep.mubr.msk.bf16.mxu0 %vm6042_vm1, %v6041_v1  ;;  %5374 = vmatprep.subr.bf16.mxu0 %v6041_v1  ;;  %v651_v3 = vsel %vm204_vm3, %v646_v59, %v650_v60  ;;  %v792_v11 = vrot.slane %v790_v6, 1  ;;  %v714_v19 = vsel %vm221_vm0, %v4857_v8, 0  ;;  %v4882_v21 = vcombine.low %v4878_v13, %v6256_v14  ;;  %v6279_v28 = vld [vmem:[%s6162_s28 + $0x20] ss:$0 sps:$4 sm:$0x11]   ;;  %v5874_v50 = vld [vmem:[%s6162_s28 + $0x18] sm:$0xff]  }
  0x2a   : > { %5381 = vmatpush3.bf16.msra.mxu1 %v520_v35  ;;  %5382 = vmatprep.mubr.msk.bf16.mxu1 %vm6042_vm1, %v6041_v1  ;;  %v787_v5 = vrot.slane %v785_v62, 1  ;;  %v899_v23 = vsel %vm221_vm0, %v4870_v17, 0  ;;  %v707_v24 = vrot.slane %v4858_v16, 1  ;;  %v708_v25 = vrot.slane %v6201_v40, 1  ;;  %v4881_v32 = vld [vmem:[%s7157_s1 + $0x8] sm:$0x3] }
  0x2b   : > { %5392 = vmatprep.subr.bf16.mxu1 %v6041_v1  ;;  %v892_v26 = vrot.slane %v4871_v18, 1  ;;  %v893_v27 = vrot.slane %v5869_v61, 1  ;;  %v1016_v29 = vshll.u32 %v4882_v21, 16  ;;  %v844_v31 = vsel %vm221_vm0, %v771_v22, 0  ;;  %v4875_v40 = vld [vmem:[%s7157_s1 + $0x6] sm:$0x3] }
  0x2c   : > { %v788_v10 = vor.u32 %v787_v5, %v783_v4  ;;  %v709_v30 = vsel %vm318_vm4, %v707_v24, %v708_v25  ;;  %v1014_v34 = vshrl.u32 %v4882_v21, 16  ;;  %v1021_v36 = vshll.u32 %v6279_v28, 16  ;;  %v4893_v41 = vld [vmem:[%s7157_s1 + $0xc] sm:$0x3]  ;;  %v4896_v46 = vld [vmem:[%s6162_s28 + $0x24] sm:$0xf] }
  0x2d   : > { %v894_v33 = vsel %vm318_vm4, %v892_v26, %v893_v27  ;;  %v1018_v35 = vrot.slane %v1016_v29, 1  ;;  %v1029_v37 = vsel %vm221_vm0, %v4881_v32, 0  ;;  %v956_v42 = vsel %vm221_vm0, %v4875_v40, 0  ;;  %v4897_v47 = vld [vmem:[%s6162_s28 + $0x28] sm:$0xf]  ;;  %s6922_s8 = scalar_lea.vmem [#allocation2], %s4811_s29 }
  0x2e   : > { %v793_v20 = vsel %vm204_vm3, %v788_v10, %v792_v11  ;;  %v1023_v39 = vrot.slane %v1021_v36, 1  ;;  %v4886_v48 = vld [vmem:[%s7157_s1 + $0xa] sm:$0x3]  ;;  %v4903_v49 = vld [vmem:[%s6162_s28 + $0x24] sm:$0xe]  ;;  %v1080_v59 = vrot.slane %v6279_v28, 1 }
  0x2f   : > { %5365 = vmatmul.mubr.msk.bf16.vlgmr.msra.gmra.mxu0 %vm217_vm2, %v321_v44  ;;  %v1019_v38 = vor.u32 %v1018_v35, %v1014_v34  ;;  %v1147_v44 = vsel %vm221_vm0, %v4893_v41, 0  ;;  %v5875_v52 = vld [vmem:[%s6162_s28 + $0x24] sm:$0xff]   ;;  %v4904_v53 = vld [vmem:[%s7157_s1 + $0x10] sm:$0x3]  ;;  %v1086_v55 = vsel %vm221_vm0, %v4886_v48, 0  ;;  %v4905_v57 = vcombine.low %v4903_v49, %v4897_v47  ;;  %s4692_s20 = sshll.u32 %s6922_s8, 4  ;;  %s7100_s20 = int_to_ptr.vmem [resolvable:$true] %s4692_s20 }
  0x30   : > { %5375 = vmatpush3.bf16.msra.mxu0 %v462_v45  ;;  %5383 = vmatmul.mubr.msk.bf16.vlgmr.msra.gmra.mxu1 %vm217_vm2, %v515_v51  ;;  %v4885_v45 = vld [vmem:[%s6162_s28 + $0x18] sm:$0xe]  ;;  %v1277_v60 = vsel %vm221_vm0, %v4904_v53, 0  ;;  %v4910_v2 = vld [vmem:[%s6162_s28 + $0x1c] sm:$0xf]  ;;  %v5882_v34 = vld [vmem:[%s6162_s28 + $0x24] sm:$0xff]  }
  0x31   : > { %5376 = vmatprep.mubr.msk.bf16.mxu0 %vm6042_vm1, %v6041_v1  ;;  %5386 = vmatprep.subr.bf16.mxu0 %v6041_v1  ;;  %v1024_v43 = vsel %vm204_vm3, %v1019_v38, %v1023_v39  ;;  %v4887_v51 = vcombine.low %v4885_v45, %v6256_v14  ;;  %v4909_v62 = vld [vmem:[%s6162_s28 + $0x18] sm:$0xf]  ;;  %v1329_v5 = vld [vmem:[%s7157_s1] sm:$0x3]  ;;  %v4912_v17 = vld [vmem:[%s7157_s1 + $0x2] sm:$0x3] }
  0x32   : > { %5393 = vmatpush3.bf16.msra.mxu1 %v656_v56  ;;  %5394 = vmatprep.mubr.msk.bf16.mxu1 %vm6042_vm1, %v6041_v1  ;;  %v5878_v56 = vld [vmem:[%s6162_s28 + $0x2c] ss:$0 sps:$4 sm:$0x11]   ;;  %v4913_v9 = vcombine.low %v4909_v62, %v4910_v2  ;;  %v1402_v12 = vsel %vm221_vm0, %v1329_v5, 0  ;;  %v4923_v18 = vld [vmem:[%s7157_s1 + $0x6] sm:$0x3] }
  0x33   : > { %5404 = vmatprep.subr.bf16.mxu1 %v6041_v1  ;;  %v1079_v58 = vrot.slane %v4887_v51, 1  ;;  %v1212_v8 = vshll.u32 %v5878_v56, 16  ;;  %v6357_v13 = vld [vmem:[%s6162_s28 + $0x20] ss:$0 sps:$4 sm:$0x11]   ;;  %v1514_v24 = vsel %vm221_vm0, %v4923_v18, 0 }
  0x34   : > { %v1343_v16 = vshll.u32 %v4913_v9, 16  ;;  %v1348_v22 = vshll.u32 %v6357_v13, 16  ;;  %v4917_v27 = vld [vmem:[%s6162_s28 + $0x18] sm:$0xe]  ;;  %v4926_v28 = vld [vmem:[%s6162_s28 + $0x24] sm:$0xf] }
  0x35   : > { %v1081_v4 = vsel %vm318_vm4, %v1079_v58, %v1080_v59  ;;  %v4927_v29 = vld [vmem:[%s6162_s28 + $0x28] sm:$0xf]  ;;  %v4944_v32 = vld [vmem:[%s6162_s28 + $0x30] sm:$0xf]  ;;  %v4919_v35 = vcombine.low %v4917_v27, %v4910_v2  ;;  %v1451_v45 = vrot.slane %v6357_v13, 1  ;;  %s7105_s27 = scalar_lea.sflag [#allocation3], %s175_s21 }
  0x36   : > { %v1345_v21 = vrot.slane %v1343_v16, 1  ;;  %v1350_v26 = vrot.slane %v1348_v22, 1  ;;  %v5885_v36 = vld [vmem:[%s6162_s28 + $0x2c] ss:$0 sps:$4 sm:$0x11]   ;;  %v4930_v39 = vcombine.low %v4926_v28, %v4927_v29  ;;  %s5947_s29 = scalar_lea.vmem %s7100_s20, 2048 }
  0x37   : > { %5377 = vmatmul.mubr.msk.bf16.vlgmr.msra.gmra.mxu0 %vm217_vm2, %v457_v63  ;;  %v1270_v63 = vrot.slane %v4905_v57, 1  ;;  %v4934_v38 = vld [vmem:[%s7157_s1 + $0xa] sm:$0x3]  ;;  %v1638_v49 = vrot.slane %v5885_v36, 1  ;;  %v4947_v53 = vld [vmem:[%s7157_s1 + $0xe] sm:$0x3]  ;;  %p5948_p13 = scmp.ne.s32.totalorder %s7100_s20, %s5947_s29 }
  0x38   : > { %5387 = vmatpush3.bf16.msra.mxu0 %v582_v0  ;;  %5395 = vmatmul.mubr.msk.bf16.vlgmr.msra.gmra.mxu1 %vm217_vm2, %v651_v3  ;;  %v1271_v0 = vrot.slane %v5878_v56, 1  ;;  %v4899_v3 = vld [vmem:[%s7157_s1 + $0xe] sm:$0x3]  ;;  %v6415_v51 = vld [vmem:[%s6162_s28 + $0x38] ss:$0 sps:$4 sm:$0x11]  }
  0x39   : > { %5388 = vmatprep.mubr.msk.bf16.mxu0 %vm6042_vm1, %v6041_v1  ;;  %5398 = vmatprep.subr.bf16.mxu0 %v6041_v1  ;;  %v1220_v10 = vsel %vm221_vm0, %v4899_v3, 0  ;;  %v1572_v58 = vshrl.u32 %v4930_v39, 16  ;;  %v1778_v2 = vsel %vm221_vm0, %v4947_v53, 0  ;;  %v4941_v5 = vld [vmem:[%s7157_s1 + $0xc] sm:$0x3]  ;;  %p5949_p0 = pnand %p5948_p13, %p6117_p3 }
  0x3a   : > { %5405 = vmatpush3.bf16.msra.mxu1 %v798_v7  ;;  %5406 = vmatprep.mubr.msk.bf16.mxu1 %vm6042_vm1, %v6041_v1  ;;  %v1272_v11 = vsel %vm318_vm4, %v1270_v63, %v1271_v0  ;;  %v1770_v63 = vshll.u32 %v6415_v51, 16  ;;  %v4952_v18 = vld [vmem:[%s7157_s1 + $0x10] sm:$0x3]  ;;  %v4965_v22 = vld [vmem:[%s6162_s28 + $0x24] sm:$0xe] }
  0x3b   : > { %5416 = vmatprep.subr.bf16.mxu1 %v6041_v1  ;;  %v4966_v27 = vld [vmem:[%s7157_s1 + $0x4] sm:$0x3]  ;;  %v1835_v28 = vsel %vm221_vm0, %v4952_v18, 0  ;;  %v2445_v18 = vld [vmem:[%s7157_s1] sm:$0x3]  ;;  %p5950_p1 = pneg %p5949_p0 }
  0x3f   : > { %5389 = vmatmul.mubr.msk.bf16.vlgmr.msra.gmra.mxu0 %vm217_vm2, %v5867_v15  ;;  %v1214_v15 = vrot.slane %v1212_v8, 1  ;;  %v1772_v8 = vrot.slane %v1770_v63, 1  ;;  %v5000_v63 = vld [vmem:[%s7157_s1 + $0x10] sm:$0x3] }
  0x40   : > { %5399 = vmatpush3.bf16.msra.mxu0 %v714_v19  ;;  %5407 = vmatmul.mubr.msk.bf16.vlgmr.msra.gmra.mxu1 %vm217_vm2, %v793_v20  ;;  %v1341_v20 = vshrl.u32 %v4913_v9, 16 }
  0x41   : > { %5400 = vmatprep.mubr.msk.bf16.mxu0 %vm6042_vm1, %v6041_v1  ;;  %5410 = vmatprep.subr.bf16.mxu0 %v6041_v1 }
  0x42   : > { %5417 = vmatpush3.bf16.msra.mxu1 %v899_v23  ;;  %5418 = vmatprep.mubr.msk.bf16.mxu1 %vm6042_vm1, %v6041_v1  ;;  %v1356_v23 = vsel %vm221_vm0, %v4912_v17, 0  ;;  %v1346_v25 = vor.u32 %v1345_v21, %v1341_v20  ;;  %v4951_v21 = vld [vmem:[%s6162_s28 + $0x30] sm:$0xe] }
  0x43   : > { %5428 = vmatprep.subr.bf16.mxu1 %v6041_v1 }
  0x47   : > { %5401 = vmatmul.mubr.msk.bf16.vlgmr.msra.gmra.mxu0 %vm217_vm2, %v709_v30  ;;  %v4933_v30 = vld [vmem:[%s6162_s28 + $0x24] sm:$0xe] }
  0x48   : > { %5411 = vmatpush3.bf16.msra.mxu0 %v844_v31  ;;  %5419 = vmatmul.mubr.msk.bf16.vlgmr.msra.gmra.mxu1 %vm217_vm2, %v894_v33  ;;  %v4918_v31 = vld [vmem:[%s7157_s1 + $0x4] sm:$0x3]  ;;  %v6392_v33 = vld [vmem:[%s6162_s28 + $0x34] sm:$0xf]  ;;  %v4935_v40 = vcombine.low %v4933_v30, %v4927_v29 }
  0x49   : > { %5412 = vmatprep.mubr.msk.bf16.mxu0 %vm6042_vm1, %v6041_v1  ;;  %5422 = vmatprep.subr.bf16.mxu0 %v6041_v1  ;;  %v1457_v41 = vsel %vm221_vm0, %v4918_v31, 0 }
  0x4a   : > { %5429 = vmatpush3.bf16.msra.mxu1 %v1029_v37  ;;  %5430 = vmatprep.mubr.msk.bf16.mxu1 %vm6042_vm1, %v6041_v1  ;;  %v1351_v37 = vsel %vm204_vm3, %v1346_v25, %v1350_v26  ;;  %v1637_v48 = vrot.slane %v4935_v40, 1  ;;  %v5889_v25 = vld [vmem:[%s6162_s28 + $0x30] sm:$0xff]   ;;  %v4953_v26 = vcombine.low %v4951_v21, %v6392_v33 }
  0x4b   : > { %5440 = vmatprep.subr.bf16.mxu1 %v6041_v1 }
  0x4c   : > { %v1639_v57 = vsel %vm318_vm4, %v1637_v48, %v1638_v49 }
  0x4f   : > { %5413 = vmatmul.mubr.msk.bf16.vlgmr.msra.gmra.mxu0 %vm217_vm2, %v6218_v54  ;;  %v4900_v54 = vcombine.low %v4896_v46, %v4897_v47  ;;  %v1644_v46 = vsel %vm221_vm0, %v4934_v38, 0  ;;  %v6492_v38 = vld [vmem:[%s6162_s28 + $0x38] ss:$0 sps:$4 sm:$0x11]  }
  0x50   : > { %5423 = vmatpush3.bf16.msra.mxu0 %v956_v42  ;;  %5431 = vmatmul.mubr.msk.bf16.vlgmr.msra.gmra.mxu1 %vm217_vm2, %v1024_v43  ;;  %v4929_v42 = vld [vmem:[%s7157_s1 + $0x8] sm:$0x3]  ;;  %v4948_v43 = vcombine.low %v4944_v32, %v6392_v33  ;;  %v2015_v32 = vsel %vm221_vm0, %v4966_v27, 0  ;;  %v1828_v33 = vrot.slane %v4953_v26, 1  ;;  %v5008_v27 = vld [vmem:[%s7157_s1 + $0x2] sm:$0x3] }
  0x51   : > { %5424 = vmatprep.mubr.msk.bf16.mxu0 %vm6042_vm1, %v6041_v1  ;;  %5434 = vmatprep.subr.bf16.mxu0 %v6041_v1  ;;  %v1207_v61 = vshll.u32 %v4900_v54, 16  ;;  %v1205_v6 = vshrl.u32 %v4900_v54, 16  ;;  %v1587_v47 = vsel %vm221_vm0, %v4929_v42, 0  ;;  %v4957_v54 = vld [vmem:[%s6162_s28 + $0x24] sm:$0xf] }
  0x52   : > { %5441 = vmatpush3.bf16.msra.mxu1 %v1147_v44  ;;  %5442 = vmatprep.mubr.msk.bf16.mxu1 %vm6042_vm1, %v6041_v1  ;;  %v1450_v44 = vrot.slane %v4919_v35, 1  ;;  %v1887_v35 = vld [vmem:[%s7157_s1] sm:$0x3]  ;;  %v4977_v42 = vld [vmem:[%s7157_s1 + $0x8] sm:$0x3] }
  0x53   : > { %5452 = vmatprep.subr.bf16.mxu1 %v6041_v1  ;;  %v1209_v7 = vrot.slane %v1207_v61, 1  ;;  %v1763_v61 = vshrl.u32 %v4948_v43, 16 }
  0x54   : > { %v1452_v56 = vsel %vm318_vm4, %v1450_v44, %v1451_v45 }
  0x55   : > { %v1210_v14 = vor.u32 %v1209_v7, %v1205_v6  ;;  %v5891_v6 = vld [vmem:[%s6162_s28 + $0x2c] ss:$0 sps:$4 sm:$0x11]  }
  0x56   : > { %v1906_v16 = vshll.u32 %v5891_v6, 16 }
  0x57   : > { %5425 = vmatmul.mubr.msk.bf16.vlgmr.msra.gmra.mxu0 %vm217_vm2, %v5874_v50  ;;  %v1215_v19 = vsel %vm204_vm3, %v1210_v14, %v1214_v15  ;;  %v1574_v50 = vshll.u32 %v4930_v39, 16 }
  0x58   : > { %5435 = vmatpush3.bf16.msra.mxu0 %v1086_v55  ;;  %5443 = vmatmul.mubr.msk.bf16.vlgmr.msra.gmra.mxu1 %vm217_vm2, %v5875_v52  ;;  %v1765_v52 = vshll.u32 %v4948_v43, 16  ;;  %v6424_v55 = vld [vmem:[%s6162_s28 + $0x28] sm:$0xf]  ;;  %v1908_v20 = vrot.slane %v1906_v16, 1 }
  0x59   : > { %5436 = vmatprep.mubr.msk.bf16.mxu0 %vm6042_vm1, %v6041_v1  ;;  %5446 = vmatprep.subr.bf16.mxu0 %v6041_v1  ;;  %v1576_v59 = vrot.slane %v1574_v50, 1  ;;  %v6431_v0 = vcombine.low %v4957_v54, %v6424_v55  ;;  %v4967_v30 = vcombine.low %v4965_v22, %v6424_v55  ;;  %v4971_v50 = vld [vmem:[%s7157_s1 + $0x6] sm:$0x3]  ;;  %v4981_v55 = vld [vmem:[%s6162_s28 + $0x30] sm:$0xe]  ;;  %v2518_v22 = vsel %vm221_vm0, %v2445_v18, 0 }
  0x5a   : > { %5453 = vmatpush3.bf16.msra.mxu1 %v1277_v60  ;;  %5454 = vmatprep.mubr.msk.bf16.mxu1 %vm6042_vm1, %v6041_v1  ;;  %v1579_v60 = vshll.u32 %v5885_v36, 16  ;;  %v1767_v62 = vrot.slane %v1765_v52, 1  ;;  %v2072_v52 = vsel %vm221_vm0, %v4971_v50, 0  ;;  %v5913_v18 = vld [vmem:[%s6162_s28 + $0x44] ss:$0 sps:$4 sm:$0x11]  }
  0x5b   : > { %5464 = vmatprep.subr.bf16.mxu1 %v6041_v1  ;;  %v1577_v3 = vor.u32 %v1576_v59, %v1572_v58  ;;  %v1899_v14 = vshrl.u32 %v6431_v0, 16  ;;  %v2008_v36 = vrot.slane %v4967_v30, 1  ;;  %v4982_v58 = vld [vmem:[%s7157_s1 + $0xa] sm:$0x3]  ;;  %v4999_v59 = vld [vmem:[%s6162_s28 + $0x3c] sm:$0xe] }
  0x5c   : > { %v1768_v7 = vor.u32 %v1767_v62, %v1763_v61  ;;  %v5897_v62 = vld [vmem:[%s6162_s28 + $0x3c] sm:$0xff]  }
  0x5e   : > { %v1773_v13 = vsel %vm204_vm3, %v1768_v7, %v1772_v8  ;;  %v2393_v7 = vsel %vm221_vm0, %v5000_v63, 0  ;;  %v6629_v63 = vld [vmem:[%s6162_s28 + $0x40] sm:$0xf] }
  0x5f   : > { %5437 = vmatmul.mubr.msk.bf16.vlgmr.msra.gmra.mxu0 %vm217_vm2, %v1081_v4  ;;  %v1581_v4 = vrot.slane %v1579_v60, 1  ;;  %v5896_v60 = vld [vmem:[%s6162_s28 + $0x30] sm:$0xff]  }
  0x60   : > { %5447 = vmatpush3.bf16.msra.mxu0 %v1220_v10  ;;  %5455 = vmatmul.mubr.msk.bf16.vlgmr.msra.gmra.mxu1 %vm217_vm2, %v1272_v11  ;;  %v1705_v11 = vsel %vm221_vm0, %v4941_v5, 0 }
  0x61   : > { %5448 = vmatprep.mubr.msk.bf16.mxu0 %vm6042_vm1, %v6041_v1  ;;  %5458 = vmatprep.subr.bf16.mxu0 %v6041_v1  ;;  %v1582_v10 = vsel %vm204_vm3, %v1577_v3, %v1581_v4  ;;  %v5900_v3 = vld [vmem:[%s6162_s28 + $0x44] ss:$0 sps:$4 sm:$0x11]  }
  0x62   : > { %5465 = vmatpush3.bf16.msra.mxu1 %v1402_v12  ;;  %5466 = vmatprep.mubr.msk.bf16.mxu1 %vm6042_vm1, %v6041_v1  ;;  %v4960_v12 = vld [vmem:[%s7157_s1 + $0x2] sm:$0x3] }
  0x63   : > { %5476 = vmatprep.subr.bf16.mxu1 %v6041_v1  ;;  %v1914_v17 = vsel %vm221_vm0, %v4960_v12, 0  ;;  %v5006_v12 = vld [vmem:[%s6162_s28 + $0x34] sm:$0xf] }
  0x67   : > { %5449 = vmatmul.mubr.msk.bf16.vlgmr.msra.gmra.mxu0 %vm217_vm2, %v1215_v19 }
  0x68   : > { %5459 = vmatpush3.bf16.msra.mxu0 %v1356_v23  ;;  %5467 = vmatmul.mubr.msk.bf16.vlgmr.msra.gmra.mxu1 %vm217_vm2, %v4913_v9  ;;  %v1901_v9 = vshll.u32 %v6431_v0, 16  ;;  %v4974_v23 = vld [vmem:[%s6162_s28 + $0x30] sm:$0xf] }
  0x69   : > { %5460 = vmatprep.mubr.msk.bf16.mxu0 %vm6042_vm1, %v6041_v1  ;;  %5470 = vmatprep.subr.bf16.mxu0 %v6041_v1 }
  0x6a   : > { %5477 = vmatpush3.bf16.msra.mxu1 %v1514_v24  ;;  %5478 = vmatprep.mubr.msk.bf16.mxu1 %vm6042_vm1, %v6041_v1  ;;  %v1903_v15 = vrot.slane %v1901_v9, 1  ;;  %v6469_v24 = vld [vmem:[%s6162_s28 + $0x34] sm:$0xf] }
  0x6b   : > { %5488 = vmatprep.subr.bf16.mxu1 %v6041_v1  ;;  %v4978_v31 = vcombine.low %v4974_v23, %v6469_v24  ;;  %v4983_v61 = vcombine.low %v4981_v55, %v6469_v24 }
  0x6c   : > { %v1904_v19 = vor.u32 %v1903_v15, %v1899_v14 }
  0x6d   : > { %v2132_v39 = vshll.u32 %v4978_v31, 16  ;;  %v2130_v44 = vshrl.u32 %v4978_v31, 16  ;;  %v2195_v5 = vrot.slane %v4983_v61, 1 }
  0x6e   : > { %v1909_v29 = vsel %vm204_vm3, %v1904_v19, %v1908_v20 }
  0x6f   : > { %5461 = vmatmul.mubr.msk.bf16.vlgmr.msra.gmra.mxu0 %vm217_vm2, %v1351_v37  ;;  %v2009_v37 = vrot.slane %v5891_v6, 1  ;;  %v2134_v45 = vrot.slane %v2132_v39, 1  ;;  %v2196_v6 = vrot.slane %v6492_v38, 1  ;;  %v5023_v39 = vld [vmem:[%s6162_s28 + $0x40] sm:$0xf] }
  0x70   : > { %5471 = vmatpush3.bf16.msra.mxu0 %v1457_v41  ;;  %5479 = vmatmul.mubr.msk.bf16.vlgmr.msra.gmra.mxu1 %vm217_vm2, %v5882_v34  ;;  %v1829_v34 = vrot.slane %v6415_v51, 1  ;;  %v1960_v41 = vsel %vm221_vm0, %v1887_v35, 0  ;;  %v4989_v51 = vld [vmem:[%s7157_s1 + $0xc] sm:$0x3] }
  0x71   : > { %5472 = vmatprep.mubr.msk.bf16.mxu0 %vm6042_vm1, %v6041_v1  ;;  %5482 = vmatprep.subr.bf16.mxu0 %v6041_v1  ;;  %v2010_v43 = vsel %vm318_vm4, %v2008_v36, %v2009_v37  ;;  %v2135_v48 = vor.u32 %v2134_v45, %v2130_v44  ;;  %v2263_v54 = vsel %vm221_vm0, %v4989_v51, 0  ;;  %v2197_v14 = vsel %vm318_vm4, %v2195_v5, %v2196_v6  ;;  %v5013_v37 = vld [vmem:[%s6162_s28 + $0x30] sm:$0xe] }
  0x72   : > { %5489 = vmatpush3.bf16.msra.mxu1 %v1644_v46  ;;  %5490 = vmatprep.mubr.msk.bf16.mxu1 %vm6042_vm1, %v6041_v1  ;;  %v1830_v40 = vsel %vm318_vm4, %v1828_v33, %v1829_v34  ;;  %v2137_v46 = vshll.u32 %v6492_v38, 16  ;;  %v2472_v33 = vsel %vm221_vm0, %v5008_v27, 0  ;;  %v5022_v38 = vld [vmem:[%s6162_s28 + $0x3c] sm:$0xf]  ;;  %v5015_v44 = vcombine.low %v5013_v37, %v5006_v12  ;;  %v5062_v37 = vld [vmem:[%s7157_s1 + $0x4] sm:$0x3] }
  0x73   : > { %5500 = vmatprep.subr.bf16.mxu1 %v6041_v1 }
  0x74   : > { %v2139_v49 = vrot.slane %v2137_v46, 1  ;;  %v5904_v46 = vld [vmem:[%s6162_s28 + $0x3c] sm:$0xff]  }
  0x76   : > { %v2140_v53 = vsel %vm204_vm3, %v2135_v48, %v2139_v49  ;;  %v5026_v48 = vcombine.low %v5022_v38, %v5023_v39  ;;  %v5907_v49 = vld [vmem:[%s6162_s28 + $0x44] ss:$0 sps:$4 sm:$0x11]  }
  0x77   : > { %5473 = vmatmul.mubr.msk.bf16.vlgmr.msra.gmra.mxu0 %vm217_vm2, %v1452_v56  ;;  %v4992_v56 = vld [vmem:[%s6162_s28 + $0x3c] sm:$0xf]  ;;  %v2695_v6 = vshll.u32 %v5907_v49, 16 }
  0x78   : > { %5483 = vmatpush3.bf16.msra.mxu0 %v1587_v47  ;;  %5491 = vmatmul.mubr.msk.bf16.vlgmr.msra.gmra.mxu1 %vm217_vm2, %v1639_v57  ;;  %v2145_v47 = vsel %vm221_vm0, %v4977_v42, 0  ;;  %v4993_v57 = vld [vmem:[%s6162_s28 + $0x40] sm:$0xf]  ;;  %v5040_v42 = vld [vmem:[%s6162_s28 + $0x48] sm:$0xf] }
  0x79   : > { %5484 = vmatprep.mubr.msk.bf16.mxu0 %vm6042_vm1, %v6041_v1  ;;  %5494 = vmatprep.subr.bf16.mxu0 %v6041_v1  ;;  %v5001_v4 = vcombine.low %v4999_v59, %v4993_v57  ;;  %v2690_v59 = vshll.u32 %v5026_v48, 16 }
  0x7a   : > { %5501 = vmatpush3.bf16.msra.mxu1 %v1778_v2  ;;  %5502 = vmatprep.mubr.msk.bf16.mxu1 %vm6042_vm1, %v6041_v1  ;;  %v2202_v2 = vsel %vm221_vm0, %v4982_v58, 0  ;;  %v2754_v58 = vrot.slane %v5907_v49, 1 }
  0x7b   : > { %5512 = vmatprep.subr.bf16.mxu1 %v6041_v1  ;;  %v2386_v9 = vrot.slane %v5001_v4, 1  ;;  %v2688_v4 = vshrl.u32 %v5026_v48, 16  ;;  %v2692_v5 = vrot.slane %v2690_v59, 1  ;;  %v6701_v48 = vld [vmem:[%s6162_s28 + $0x50] ss:$0 sps:$4 sm:$0x11]  }
  0x7f   : > { %5485 = vmatmul.mubr.msk.bf16.vlgmr.msra.gmra.mxu0 %vm217_vm2, %v1582_v10  ;;  %v2387_v10 = vrot.slane %v5900_v3, 1 }
  0x80   : > { %5495 = vmatpush3.bf16.msra.mxu0 %v1705_v11  ;;  %5503 = vmatmul.mubr.msk.bf16.vlgmr.msra.gmra.mxu1 %vm217_vm2, %v1773_v13  ;;  %v5005_v11 = vld [vmem:[%s6162_s28 + $0x30] sm:$0xf]  ;;  %v4995_v13 = vld [vmem:[%s7157_s1 + $0xe] sm:$0x3] }
  0x81   : > { %5496 = vmatprep.mubr.msk.bf16.mxu0 %vm6042_vm1, %v6041_v1  ;;  %5506 = vmatprep.subr.bf16.mxu0 %v6041_v1  ;;  %v5009_v19 = vcombine.low %v5005_v11, %v5006_v12  ;;  %v2336_v20 = vsel %vm221_vm0, %v4995_v13, 0  ;;  %v2388_v21 = vsel %vm318_vm4, %v2386_v9, %v2387_v10  ;;  %v2693_v13 = vor.u32 %v2692_v5, %v2688_v4  ;;  %v5089_v4 = vld [vmem:[%s6162_s28 + $0x58] sm:$0xf]  ;;  %v5077_v5 = vld [vmem:[%s6162_s28 + $0x48] sm:$0xe] }
  0x82   : > { %5513 = vmatpush3.bf16.msra.mxu1 %v1914_v17  ;;  %5514 = vmatprep.mubr.msk.bf16.mxu1 %vm6042_vm1, %v6041_v1  ;;  %v2328_v17 = vshll.u32 %v5900_v3, 16 }
  0x83   : > { %5524 = vmatprep.subr.bf16.mxu1 %v6041_v1  ;;  %v2459_v26 = vshll.u32 %v5009_v19, 16 }
  0x84   : > { %v2330_v24 = vrot.slane %v2328_v17, 1 }
  0x85   : > { %v2461_v30 = vrot.slane %v2459_v26, 1  ;;  %v3022_v26 = vshll.u32 %v5913_v18, 16 }
  0x87   : > { %5497 = vmatmul.mubr.msk.bf16.vlgmr.msra.gmra.mxu0 %vm217_vm2, %v5889_v25  ;;  %v5903_v25 = vld [vmem:[%s6162_s28 + $0x38] ss:$0 sps:$4 sm:$0x11]  }
  0x88   : > { %5507 = vmatpush3.bf16.msra.mxu0 %v1835_v28  ;;  %5515 = vmatmul.mubr.msk.bf16.vlgmr.msra.gmra.mxu1 %vm217_vm2, %v1909_v29  ;;  %v2457_v29 = vshrl.u32 %v5009_v19, 16  ;;  %v2464_v31 = vshll.u32 %v5903_v25, 16 }
  0x89   : > { %5508 = vmatprep.mubr.msk.bf16.mxu0 %vm6042_vm1, %v6041_v1  ;;  %5518 = vmatprep.subr.bf16.mxu0 %v6041_v1 }
  0x8a   : > { %5525 = vmatpush3.bf16.msra.mxu1 %v2015_v32  ;;  %5526 = vmatprep.mubr.msk.bf16.mxu1 %vm6042_vm1, %v6041_v1  ;;  %v5019_v32 = vld [vmem:[%s7157_s1 + $0x6] sm:$0x3]  ;;  %v2462_v35 = vor.u32 %v2461_v30, %v2457_v29  ;;  %v2466_v36 = vrot.slane %v2464_v31, 1  ;;  %v3024_v30 = vrot.slane %v3022_v26, 1  ;;  %v5047_v31 = vld [vmem:[%s6162_s28 + $0x48] sm:$0xe] }
  0x8b   : > { %5536 = vmatprep.subr.bf16.mxu1 %v6041_v1  ;;  %v2630_v34 = vsel %vm221_vm0, %v5019_v32, 0  ;;  %v5061_v32 = vld [vmem:[%s6162_s28 + $0x3c] sm:$0xe] }
  0x8c   : > { %v2467_v45 = vsel %vm204_vm3, %v2462_v35, %v2466_v36  ;;  %v5911_v35 = vld [vmem:[%s6162_s28 + $0x48] sm:$0xff]  }
  0x8f   : > { %5509 = vmatmul.mubr.msk.bf16.vlgmr.msra.gmra.mxu0 %vm217_vm2, %v1830_v40  ;;  %v5029_v40 = vld [vmem:[%s6162_s28 + $0x3c] sm:$0xe] }
  0x90   : > { %5519 = vmatpush3.bf16.msra.mxu0 %v1960_v41  ;;  %5527 = vmatmul.mubr.msk.bf16.vlgmr.msra.gmra.mxu1 %vm217_vm2, %v2010_v43  ;;  %v5014_v41 = vld [vmem:[%s7157_s1 + $0x4] sm:$0x3]  ;;  %v6602_v43 = vld [vmem:[%s6162_s28 + $0x4c] sm:$0xf]  ;;  %v5031_v50 = vcombine.low %v5029_v40, %v5023_v39  ;;  %v5063_v40 = vcombine.low %v5061_v32, %v6629_v63 }
  0x91   : > { %5520 = vmatprep.mubr.msk.bf16.mxu0 %vm6042_vm1, %v6041_v1  ;;  %5530 = vmatprep.subr.bf16.mxu0 %v6041_v1  ;;  %v2573_v51 = vsel %vm221_vm0, %v5014_v41, 0  ;;  %v5049_v36 = vcombine.low %v5047_v31, %v6602_v43  ;;  %v5091_v31 = vld [vmem:[%s7157_s1 + $0xe] sm:$0x3] }
  0x92   : > { %5537 = vmatpush3.bf16.msra.mxu1 %v2145_v47  ;;  %5538 = vmatprep.mubr.msk.bf16.mxu1 %vm6042_vm1, %v6041_v1  ;;  %v5030_v47 = vld [vmem:[%s7157_s1 + $0xa] sm:$0x3] }
  0x93   : > { %5548 = vmatprep.subr.bf16.mxu1 %v6041_v1  ;;  %v2760_v55 = vsel %vm221_vm0, %v5030_v47, 0  ;;  %v3125_v47 = vrot.slane %v5913_v18, 1 }
  0x97   : > { %5521 = vmatmul.mubr.msk.bf16.vlgmr.msra.gmra.mxu0 %vm217_vm2, %v6431_v0  ;;  %v4996_v0 = vcombine.low %v4992_v56, %v4993_v57  ;;  %v5025_v56 = vld [vmem:[%s7157_s1 + $0x8] sm:$0x3]  ;;  %v2753_v57 = vrot.slane %v5031_v50, 1 }
  0x98   : > { %5531 = vmatpush3.bf16.msra.mxu0 %v2072_v52  ;;  %5539 = vmatmul.mubr.msk.bf16.vlgmr.msra.gmra.mxu1 %vm217_vm2, %v2140_v53  ;;  %v5044_v52 = vcombine.low %v5040_v42, %v6602_v43  ;;  %v2566_v53 = vrot.slane %v5015_v44, 1  ;;  %v3131_v42 = vsel %vm221_vm0, %v5062_v37, 0  ;;  %v2944_v43 = vrot.slane %v5049_v36, 1 }
  0x99   : > { %5532 = vmatprep.mubr.msk.bf16.mxu0 %vm6042_vm1, %v6041_v1  ;;  %5542 = vmatprep.subr.bf16.mxu0 %v6041_v1  ;;  %v2323_v8 = vshll.u32 %v4996_v0, 16  ;;  %v2321_v15 = vshrl.u32 %v4996_v0, 16  ;;  %v2755_v3 = vsel %vm318_vm4, %v2753_v57, %v2754_v58 }
  0x9a   : > { %5549 = vmatpush3.bf16.msra.mxu1 %v2263_v54  ;;  %5550 = vmatprep.mubr.msk.bf16.mxu1 %vm6042_vm1, %v6041_v1  ;;  %v2567_v54 = vrot.slane %v5903_v25, 1  ;;  %v2881_v61 = vshll.u32 %v5044_v52, 16 }
  0x9b   : > { %5560 = vmatprep.subr.bf16.mxu1 %v6041_v1  ;;  %v2325_v16 = vrot.slane %v2323_v8, 1  ;;  %v2879_v8 = vshrl.u32 %v5044_v52, 16  ;;  %v5073_v52 = vld [vmem:[%s7157_s1 + $0x8] sm:$0x3] }
  0x9c   : > { %v2568_v0 = vsel %vm318_vm4, %v2566_v53, %v2567_v54  ;;  %v2883_v9 = vrot.slane %v2881_v61, 1  ;;  %v3261_v57 = vsel %vm221_vm0, %v5073_v52, 0  ;;  %v5085_v61 = vld [vmem:[%s7157_s1 + $0xc] sm:$0x3] }
  0x9d   : > { %v2326_v23 = vor.u32 %v2325_v16, %v2321_v15  ;;  %v5037_v15 = vld [vmem:[%s7157_s1 + $0xc] sm:$0x3] }
  0x9e   : > { %v2884_v16 = vor.u32 %v2883_v9, %v2879_v8  ;;  %v5095_v8 = vld [vmem:[%s6162_s28 + $0x54] sm:$0xe]  ;;  %v5918_v9 = vld [vmem:[%s6162_s28 + $0x48] sm:$0xff]  }
  0x9f   : > { %5533 = vmatmul.mubr.msk.bf16.vlgmr.msra.gmra.mxu0 %vm217_vm2, %v5896_v60  ;;  %v2331_v28 = vsel %vm204_vm3, %v2326_v23, %v2330_v24  ;;  %v6623_v60 = vld [vmem:[%s6162_s28 + $0x50] ss:$0 sps:$4 sm:$0x11]  }
  0xa0   : > { %5543 = vmatpush3.bf16.msra.mxu0 %v2202_v2  ;;  %5551 = vmatmul.mubr.msk.bf16.vlgmr.msra.gmra.mxu1 %vm217_vm2, %v5897_v62  ;;  %v5053_v62 = vld [vmem:[%s6162_s28 + $0x3c] sm:$0xf]  ;;  %v2703_v2 = vsel %vm221_vm0, %v5025_v56, 0  ;;  %v2886_v10 = vshll.u32 %v6623_v60, 16  ;;  %v2945_v44 = vrot.slane %v6623_v60, 1  ;;  %v3253_v56 = vshll.u32 %v6701_v48, 16 }
  0xa1   : > { %5544 = vmatprep.mubr.msk.bf16.mxu0 %vm6042_vm1, %v6041_v1  ;;  %5554 = vmatprep.subr.bf16.mxu0 %v6041_v1  ;;  %v6640_v11 = vcombine.low %v5053_v62, %v6629_v63  ;;  %v5067_v60 = vld [vmem:[%s7157_s1 + $0x6] sm:$0x3] }
  0xa2   : > { %5561 = vmatpush3.bf16.msra.mxu1 %v2393_v7  ;;  %5562 = vmatprep.mubr.msk.bf16.mxu1 %vm6042_vm1, %v6041_v1  ;;  %v5043_v7 = vld [vmem:[%s7157_s1 + $0xe] sm:$0x3]  ;;  %v2888_v17 = vrot.slane %v2886_v10, 1  ;;  %v2946_v50 = vsel %vm318_vm4, %v2944_v43, %v2945_v44  ;;  %v3255_v59 = vrot.slane %v3253_v56, 1  ;;  %v3188_v62 = vsel %vm221_vm0, %v5067_v60, 0 }
  0xa3   : > { %5572 = vmatprep.subr.bf16.mxu1 %v6041_v1  ;;  %v2894_v12 = vsel %vm221_vm0, %v5043_v7, 0  ;;  %v3015_v24 = vshrl.u32 %v6640_v11, 16  ;;  %v5078_v7 = vld [vmem:[%s7157_s1 + $0xa] sm:$0x3] }
  0xa4   : > { %v2889_v23 = vsel %vm204_vm3, %v2884_v16, %v2888_v17  ;;  %v5922_v16 = vld [vmem:[%s6162_s28 + $0x5c] ss:$0 sps:$4 sm:$0x11]   ;;  %v5097_v17 = vcombine.low %v5095_v8, %v5089_v4 }
  0xa6   : > { %v3502_v26 = vrot.slane %v5097_v17, 1  ;;  %v5110_v17 = vld [vmem:[%s7157_s1 + $0x4] sm:$0x3] }
  0xa7   : > { %5545 = vmatmul.mubr.msk.bf16.vlgmr.msra.gmra.mxu0 %vm217_vm2, %v2197_v14  ;;  %v2697_v14 = vrot.slane %v2695_v6, 1 }
  0xa8   : > { %5555 = vmatpush3.bf16.msra.mxu0 %v2336_v20  ;;  %5563 = vmatmul.mubr.msk.bf16.vlgmr.msra.gmra.mxu1 %vm217_vm2, %v2388_v21  ;;  %v2821_v21 = vsel %vm221_vm0, %v5037_v15, 0  ;;  %v3318_v15 = vsel %vm221_vm0, %v5078_v7, 0 }
  0xa9   : > { %5556 = vmatprep.mubr.msk.bf16.mxu0 %vm6042_vm1, %v6041_v1  ;;  %5566 = vmatprep.subr.bf16.mxu0 %v6041_v1  ;;  %v2698_v20 = vsel %vm204_vm3, %v2693_v13, %v2697_v14  ;;  %v5096_v14 = vld [vmem:[%s7157_s1 + $0x10] sm:$0x3] }
  0xaa   : > { %5573 = vmatpush3.bf16.msra.mxu1 %v2518_v22  ;;  %5574 = vmatprep.mubr.msk.bf16.mxu1 %vm6042_vm1, %v6041_v1  ;;  %v5056_v22 = vld [vmem:[%s7157_s1 + $0x2] sm:$0x3] }
  0xab   : > { %5584 = vmatprep.subr.bf16.mxu1 %v6041_v1  ;;  %v3030_v27 = vsel %vm221_vm0, %v5056_v22, 0 }
  0xaf   : > { %5557 = vmatmul.mubr.msk.bf16.vlgmr.msra.gmra.mxu0 %vm217_vm2, %v2331_v28  ;;  %v5048_v28 = vld [vmem:[%s7157_s1 + $0x10] sm:$0x3] }
  0xb0   : > { %5567 = vmatpush3.bf16.msra.mxu0 %v2472_v33  ;;  %5575 = vmatmul.mubr.msk.bf16.vlgmr.msra.gmra.mxu1 %vm217_vm2, %v5009_v19  ;;  %v3017_v19 = vshll.u32 %v6640_v11, 16  ;;  %v5070_v33 = vld [vmem:[%s6162_s28 + $0x48] sm:$0xf]  ;;  %v2951_v38 = vsel %vm221_vm0, %v5048_v28, 0 }
  0xb1   : > { %5568 = vmatprep.mubr.msk.bf16.mxu0 %vm6042_vm1, %v6041_v1  ;;  %5578 = vmatprep.subr.bf16.mxu0 %v6041_v1  ;;  %v5101_v28 = vld [vmem:[%s6162_s28 + $0x48] sm:$0xf] }
  0xb2   : > { %5585 = vmatpush3.bf16.msra.mxu1 %v2630_v34  ;;  %5586 = vmatprep.mubr.msk.bf16.mxu1 %vm6042_vm1, %v6041_v1  ;;  %v3019_v25 = vrot.slane %v3017_v19, 1  ;;  %v6678_v34 = vld [vmem:[%s6162_s28 + $0x4c] sm:$0xf] }
  0xb3   : > { %5596 = vmatprep.subr.bf16.mxu1 %v6041_v1  ;;  %v5074_v41 = vcombine.low %v5070_v33, %v6678_v34  ;;  %v5079_v13 = vcombine.low %v5077_v5, %v6678_v34 }
  0xb4   : > { %v3020_v29 = vor.u32 %v3019_v25, %v3015_v24  ;;  %v3312_v24 = vrot.slane %v6701_v48, 1 }
  0xb5   : > { %v3248_v49 = vshll.u32 %v5074_v41, 16  ;;  %v3246_v54 = vshrl.u32 %v5074_v41, 16  ;;  %v3452_v41 = vsel %vm221_vm0, %v5091_v31, 0 }
  0xb6   : > { %v3025_v39 = vsel %vm204_vm3, %v3020_v29, %v3024_v30  ;;  %v6770_v29 = vld [vmem:[%s6162_s28 + $0x4c] sm:$0xf] }
  0xb7   : > { %5569 = vmatmul.mubr.msk.bf16.vlgmr.msra.gmra.mxu0 %vm217_vm2, %v2467_v45  ;;  %v3003_v45 = vld [vmem:[%s7157_s1] sm:$0x3] }
  0xb8   : > { %5579 = vmatpush3.bf16.msra.mxu0 %v2573_v51  ;;  %5587 = vmatmul.mubr.msk.bf16.vlgmr.msra.gmra.mxu1 %vm217_vm2, %v5904_v46  ;;  %v3124_v46 = vrot.slane %v5063_v40, 1  ;;  %v3076_v51 = vsel %vm221_vm0, %v3003_v45, 0 }
  0xb9   : > { %5580 = vmatprep.mubr.msk.bf16.mxu0 %vm6042_vm1, %v6041_v1  ;;  %5590 = vmatprep.subr.bf16.mxu0 %v6041_v1 }
  0xba   : > { %5597 = vmatpush3.bf16.msra.mxu1 %v2760_v55  ;;  %5598 = vmatprep.mubr.msk.bf16.mxu1 %vm6042_vm1, %v6041_v1  ;;  %v3126_v53 = vsel %vm318_vm4, %v3124_v46, %v3125_v47  ;;  %v3250_v55 = vrot.slane %v3248_v49, 1  ;;  %v6793_v49 = vld [vmem:[%s6162_s28 + $0x50] ss:$0 sps:$4 sm:$0x11]  }
  0xbb   : > { %5608 = vmatprep.subr.bf16.mxu1 %v6041_v1  ;;  %v3580_v60 = vshll.u32 %v6793_v49, 16 }
  0xbc   : > { %v3251_v58 = vor.u32 %v3250_v55, %v3246_v54 }
  0xbd   : > { %v3582_v8 = vrot.slane %v3580_v60, 1 }
  0xbe   : > { %v3256_v63 = vsel %vm204_vm3, %v3251_v58, %v3255_v59 }
  0xbf   : > { %5581 = vmatmul.mubr.msk.bf16.vlgmr.msra.gmra.mxu0 %vm217_vm2, %v2568_v0  ;;  %v3379_v0 = vsel %vm221_vm0, %v5085_v61, 0  ;;  %v5115_v61 = vld [vmem:[%s7157_s1 + $0x6] sm:$0x3] }
  0xc0   : > { %5591 = vmatpush3.bf16.msra.mxu0 %v2703_v2  ;;  %5599 = vmatmul.mubr.msk.bf16.vlgmr.msra.gmra.mxu1 %vm217_vm2, %v2755_v3  ;;  %v5088_v3 = vld [vmem:[%s6162_s28 + $0x54] sm:$0xf] }
  0xc1   : > { %5592 = vmatprep.mubr.msk.bf16.mxu0 %vm6042_vm1, %v6041_v1  ;;  %5602 = vmatprep.subr.bf16.mxu0 %v6041_v1  ;;  %v5092_v10 = vcombine.low %v5088_v3, %v5089_v4  ;;  %v3746_v4 = vsel %vm221_vm0, %v5115_v61, 0 }
  0xc2   : > { %5609 = vmatpush3.bf16.msra.mxu1 %v2894_v12  ;;  %5610 = vmatprep.mubr.msk.bf16.mxu1 %vm6042_vm1, %v6041_v1  ;;  %v5919_v12 = vld [vmem:[%s6162_s28 + $0x54] sm:$0xff]  }
  0xc3   : > { %5620 = vmatprep.subr.bf16.mxu1 %v6041_v1  ;;  %v3437_v33 = vshrl.u32 %v5092_v10, 16 }
  0xc7   : > { %5593 = vmatmul.mubr.msk.bf16.vlgmr.msra.gmra.mxu0 %vm217_vm2, %v2698_v20  ;;  %v3509_v20 = vsel %vm221_vm0, %v5096_v14, 0 }
  0xc8   : > { %5603 = vmatpush3.bf16.msra.mxu0 %v2821_v21  ;;  %5611 = vmatmul.mubr.msk.bf16.vlgmr.msra.gmra.mxu1 %vm217_vm2, %v2889_v23  ;;  %v3439_v21 = vshll.u32 %v5092_v10, 16  ;;  %v3311_v23 = vrot.slane %v5079_v13, 1  ;;  %v5119_v13 = vld [vmem:[%s6162_s28 + $0x58] sm:$0xf] }
  0xc9   : > { %5604 = vmatprep.mubr.msk.bf16.mxu0 %vm6042_vm1, %v6041_v1  ;;  %5614 = vmatprep.subr.bf16.mxu0 %v6041_v1 }
  0xca   : > { %5621 = vmatpush3.bf16.msra.mxu1 %v3030_v27  ;;  %5622 = vmatprep.mubr.msk.bf16.mxu1 %vm6042_vm1, %v6041_v1  ;;  %v3503_v27 = vrot.slane %v5922_v16, 1  ;;  %v3441_v34 = vrot.slane %v3439_v21, 1  ;;  %v3313_v37 = vsel %vm318_vm4, %v3311_v23, %v3312_v24  ;;  %v6839_v23 = vld [vmem:[%s6162_s28 + $0x5c] ss:$0 sps:$4 sm:$0x11]  }
  0xcb   : > { %5632 = vmatprep.subr.bf16.mxu1 %v6041_v1 }
  0xcc   : > { %v3442_v45 = vor.u32 %v3441_v34, %v3437_v33 }
  0xcf   : > { %5605 = vmatmul.mubr.msk.bf16.vlgmr.msra.gmra.mxu0 %vm217_vm2, %v5911_v35  ;;  %v3444_v35 = vshll.u32 %v5922_v16, 16 }
  0xd0   : > { %5615 = vmatpush3.bf16.msra.mxu0 %v2951_v38  ;;  %5623 = vmatmul.mubr.msk.bf16.vlgmr.msra.gmra.mxu1 %vm217_vm2, %v3025_v39  ;;  %v3561_v38 = vld [vmem:[%s7157_s1] sm:$0x3]  ;;  %v5105_v39 = vcombine.low %v5101_v28, %v6770_v29 }
  0xd1   : > { %5616 = vmatprep.mubr.msk.bf16.mxu0 %vm6042_vm1, %v6041_v1  ;;  %5626 = vmatprep.subr.bf16.mxu0 %v6041_v1  ;;  %v3446_v46 = vrot.slane %v3444_v35, 1  ;;  %v3634_v47 = vsel %vm221_vm0, %v3561_v38, 0  ;;  %v3683_v38 = vrot.slane %v6793_v49, 1 }
  0xd2   : > { %5633 = vmatpush3.bf16.msra.mxu1 %v3131_v42  ;;  %5634 = vmatprep.mubr.msk.bf16.mxu1 %vm6042_vm1, %v6041_v1  ;;  %v3504_v42 = vsel %vm318_vm4, %v3502_v26, %v3503_v27  ;;  %v3573_v58 = vshrl.u32 %v5105_v39, 16  ;;  %v5926_v26 = vld [vmem:[%s6162_s28 + $0x54] sm:$0xff]   ;;  %v5126_v27 = vld [vmem:[%s7157_s1 + $0xa] sm:$0x3] }
  0xd3   : > { %5644 = vmatprep.subr.bf16.mxu1 %v6041_v1  ;;  %v3447_v55 = vsel %vm204_vm3, %v3442_v45, %v3446_v46  ;;  %v5121_v46 = vld [vmem:[%s7157_s1 + $0x8] sm:$0x3] }
  0xd4   : > { %v3819_v60 = vsel %vm221_vm0, %v5121_v46, 0  ;;  %v5143_v46 = vld [vmem:[%s6162_s28 + $0x60] sm:$0xe] }
  0xd7   : > { %5617 = vmatmul.mubr.msk.bf16.vlgmr.msra.gmra.mxu0 %vm217_vm2, %v2946_v50  ;;  %v3575_v50 = vshll.u32 %v5105_v39, 16 }
  0xd8   : > { %5627 = vmatpush3.bf16.msra.mxu0 %v3076_v51  ;;  %5635 = vmatmul.mubr.msk.bf16.vlgmr.msra.gmra.mxu1 %vm217_vm2, %v3126_v53  ;;  %v5104_v53 = vld [vmem:[%s7157_s1 + $0x2] sm:$0x3] }
  0xd9   : > { %5628 = vmatprep.mubr.msk.bf16.mxu0 %vm6042_vm1, %v6041_v1  ;;  %5638 = vmatprep.subr.bf16.mxu0 %v6041_v1  ;;  %v3577_v59 = vrot.slane %v3575_v50, 1 }
  0xda   : > { %5645 = vmatpush3.bf16.msra.mxu1 %v3261_v57  ;;  %5646 = vmatprep.mubr.msk.bf16.mxu1 %vm6042_vm1, %v6041_v1 }
  0xdb   : > { %5656 = vmatprep.subr.bf16.mxu1 %v6041_v1  ;;  %v3578_v7 = vor.u32 %v3577_v59, %v3573_v58 }
  0xdf   : > { %5629 = vmatmul.mubr.msk.bf16.vlgmr.msra.gmra.mxu0 %vm217_vm2, %v6640_v11 }
  0xe0   : > { %5639 = vmatpush3.bf16.msra.mxu0 %v3188_v62  ;;  %v6733_v2 = vpop.f32.mrf.mxu1  ;;  %5647 = vmatmul.mubr.msk.bf16.vlgmr.msra.gmra.mxu1 %vm217_vm2, %v3256_v63  ;;  %v3588_v63 = vsel %vm221_vm0, %v5104_v53, 0 }
  0xe1   : > { %5640 = vmatprep.mubr.msk.bf16.mxu0 %vm6042_vm1, %v6041_v1  ;;  %5650 = vmatprep.subr.bf16.mxu0 %v6041_v1 }
  0xe2   : > { %v5360_v6 = vpop.f32.mrf.mxu1  ;;  %5657 = vmatpush3.bf16.msra.mxu1 %v3379_v0  ;;  %5658 = vmatprep.mubr.msk.bf16.mxu1 %vm6042_vm1, %v6041_v1 }
  0xe3   : > { %5668 = vmatprep.subr.bf16.mxu1 %v6041_v1 }
  0xe4   : > { %v6750_v11 = vpop.f32.mrf.mxu1 }
  0xe6   : > { %v5361_v18 = vpop.f32.mrf.mxu1 }
  0xe7   : > { %v259_v19 = vpop.f32.mrf.mxu0  ;;  %5641 = vmatmul.mubr.msk.bf16.vlgmr.msra.gmra.mxu0 %vm217_vm2, %v5918_v9  ;;  %v5109_v9 = vld [vmem:[%s6162_s28 + $0x48] sm:$0xe]  ;;  %v5136_v18 = vld [vmem:[%s6162_s28 + $0x60] sm:$0xf] }
  0xe8   : > { %5651 = vmatpush3.bf16.msra.mxu0 %v3318_v15  ;;  %v6761_v22 = vpop.f32.mrf.mxu1  ;;  %5659 = vmatmul.mubr.msk.bf16.vlgmr.msra.gmra.mxu1 %vm217_vm2, %v5919_v12  ;;  %v306_v56 = vadd.f32 %v6733_v2, %v259_v19  ;;  %v5118_v12 = vld [vmem:[%s6162_s28 + $0x54] sm:$0xf]  ;;  %v6834_v19 = vld [vmem:[%s6162_s28 + $0x64] sm:$0xf]  ;;  %v5111_v21 = vcombine.low %v5109_v9, %v6770_v29  ;;  %v6900_v9 = vld [vmem:[%s7158_s2] ss:$0 sm:$0xff] }
  0xe9   : > { %v5354_v25 = vpop.f32.mrf.mxu0  ;;  %5652 = vmatprep.mubr.msk.bf16.mxu0 %vm6042_vm1, %v6041_v1  ;;  %5662 = vmatprep.subr.bf16.mxu0 %v6041_v1  ;;  %v5122_v28 = vcombine.low %v5118_v12, %v5119_v13  ;;  %v6850_v29 = vcombine.low %v5136_v18, %v6834_v19 }
  0xea   : > { %v5372_v30 = vpop.f32.mrf.mxu1  ;;  %5669 = vmatpush3.bf16.msra.mxu1 %v3509_v20  ;;  %5670 = vmatprep.mubr.msk.bf16.mxu1 %vm6042_vm1, %v6041_v1  ;;  %v3583_v25 = vsel %vm204_vm3, %v3578_v7, %v3582_v8 }
  0xeb   : > { %v262_v32 = vpop.f32.mrf.mxu0  ;;  %5680 = vmatprep.subr.bf16.mxu1 %v6041_v1 }
  0xec   : > { %v6778_v36 = vpop.f32.mrf.mxu1  ;;  %v309_v5 = vadd.f32 %v6750_v11, %v262_v32  ;;  %v5125_v11 = vld [vmem:[%s6162_s28 + $0x54] sm:$0xe]  ;;  %v3689_v32 = vsel %vm221_vm0, %v5110_v17, 0 }
  0xed   : > { %v5355_v40 = vpop.f32.mrf.mxu0  ;;  %v5127_v30 = vcombine.low %v5125_v11, %v5119_v13 }
  0xee   : > { %v5373_v43 = vpop.f32.mrf.mxu1  ;;  %v3870_v40 = vrot.slane %v6839_v23, 1 }
  0xef   : > { %v362_v44 = vpop.f32.mrf.mxu0  ;;  %5653 = vmatmul.mubr.msk.bf16.vlgmr.msra.gmra.mxu0 %vm217_vm2, %v3313_v37  ;;  %v3682_v37 = vrot.slane %v5111_v21, 1 }
  0xf0   : > { %5663 = vmatpush3.bf16.msra.mxu0 %v3452_v41  ;;  %v6789_v48 = vpop.f32.mrf.mxu1  ;;  %5671 = vmatmul.mubr.msk.bf16.vlgmr.msra.gmra.mxu1 %vm217_vm2, %v3504_v42  ;;  %v369_v0 = vadd.f32 %v362_v44, %v306_v56  ;;  %v3806_v44 = vshll.u32 %v5122_v28, 16  ;;  %v3811_v56 = vshll.u32 %v6839_v23, 16 }
  0xf1   : > { %v5366_v51 = vpop.f32.mrf.mxu0  ;;  %5664 = vmatprep.mubr.msk.bf16.mxu0 %vm6042_vm1, %v6041_v1  ;;  %5674 = vmatprep.subr.bf16.mxu0 %v6041_v1 }
  0xf2   : > { %v5384_v52 = vpop.f32.mrf.mxu1  ;;  %5681 = vmatpush3.bf16.msra.mxu1 %v3634_v47  ;;  %5682 = vmatprep.mubr.msk.bf16.mxu1 %vm6042_vm1, %v6041_v1  ;;  %v431_v15 = vadd.f32 %v6761_v22, %v369_v0  ;;  %v6868_v47 = vld [vmem:[%s6162_s28 + $0x68] ss:$0 sps:$4 sm:$0x11]   ;;  %v5149_v51 = vld [vmem:[%s6162_s28 + $0x54] sm:$0xf] }
  0xf3   : > { %v365_v54 = vpop.f32.mrf.mxu0  ;;  %5692 = vmatprep.subr.bf16.mxu1 %v6041_v1  ;;  %v6875_v52 = vld [vmem:[%s6162_s28 + $0x58] sm:$0xf] }
  0xf4   : > { %v6806_v57 = vpop.f32.mrf.mxu1  ;;  %v370_v14 = vadd.f32 %v365_v54, %v309_v5  ;;  %v3684_v54 = vsel %vm318_vm4, %v3682_v37, %v3683_v38  ;;  %v6892_v5 = vcombine.low %v5149_v51, %v6875_v52  ;;  %v6954_v51 = vld [vmem:[%s6162_s28 + $0x64] sm:$0xf] }
  0xf5   : > { %v5367_v62 = vpop.f32.mrf.mxu0 }
  0xf6   : > { %v5385_v3 = vpop.f32.mrf.mxu1  ;;  %v432_v33 = vadd.f32 %v6778_v36, %v370_v14  ;;  %v3869_v36 = vrot.slane %v5127_v30, 1  ;;  %v3808_v62 = vrot.slane %v3806_v44, 1  ;;  %v4133_v21 = vshll.u32 %v6892_v5, 16 }
  0xf7   : > { %v498_v2 = vpop.f32.mrf.mxu0  ;;  %5665 = vmatmul.mubr.msk.bf16.vlgmr.msra.gmra.mxu0 %vm217_vm2, %v3447_v55  ;;  %v3804_v55 = vshrl.u32 %v5122_v28, 16  ;;  %v3995_v3 = vshrl.u32 %v6850_v29, 16 }
  0xf8   : > { %5675 = vmatpush3.bf16.msra.mxu0 %v3588_v63  ;;  %v6816_v6 = vpop.f32.mrf.mxu1  ;;  %5683 = vmatmul.mubr.msk.bf16.vlgmr.msra.gmra.mxu1 %vm217_vm2, %v5105_v39  ;;  %v505_v22 = vadd.f32 %v498_v2, %v431_v15  ;;  %v3876_v39 = vsel %vm221_vm0, %v5126_v27, 0  ;;  %v3871_v61 = vsel %vm318_vm4, %v3869_v36, %v3870_v40  ;;  %v5139_v63 = vld [vmem:[%s7157_s1 + $0xe] sm:$0x3]  ;;  %v5133_v15 = vld [vmem:[%s7157_s1 + $0xc] sm:$0x3] }
  0xf9   : > { %v5378_v10 = vpop.f32.mrf.mxu0  ;;  %5676 = vmatprep.mubr.msk.bf16.mxu0 %vm6042_vm1, %v6041_v1  ;;  %5686 = vmatprep.subr.bf16.mxu0 %v6041_v1  ;;  %v4010_v12 = vsel %vm221_vm0, %v5139_v63, 0  ;;  %v3809_v14 = vor.u32 %v3808_v62, %v3804_v55  ;;  %v5144_v36 = vld [vmem:[%s7157_s1 + $0x10] sm:$0x3] }
  0xfa   : > { %v5396_v16 = vpop.f32.mrf.mxu1  ;;  %5693 = vmatpush3.bf16.msra.mxu1 %v3746_v4  ;;  %5694 = vmatprep.mubr.msk.bf16.mxu1 %vm6042_vm1, %v6041_v1  ;;  %v563_v42 = vadd.f32 %v6789_v48, %v505_v22  ;;  %v3997_v48 = vshll.u32 %v6850_v29, 16  ;;  %v4002_v4 = vshll.u32 %v6868_v47, 16 }
  0xfb   : > { %v501_v20 = vpop.f32.mrf.mxu0  ;;  %5704 = vmatprep.subr.bf16.mxu1 %v6041_v1 }
  0xfc   : > { %v6841_v24 = vpop.f32.mrf.mxu1  ;;  %v506_v41 = vadd.f32 %v501_v20, %v432_v33  ;;  %v3999_v2 = vrot.slane %v3997_v48, 1  ;;  %v4004_v18 = vrot.slane %v4002_v4, 1  ;;  %v6914_v20 = vld [vmem:[%s6162_s28 + $0x5c] ss:$0 sps:$4 sm:$0x11]   ;;  %v4131_v33 = vshrl.u32 %v6892_v5, 16 }
  0xfd   : > { %v5379_v31 = vpop.f32.mrf.mxu0 }
  0xfe   : > { %v5397_v34 = vpop.f32.mrf.mxu1  ;;  %v564_v58 = vadd.f32 %v6806_v57, %v506_v41  ;;  %v4000_v17 = vor.u32 %v3999_v2, %v3995_v3  ;;  %v5152_v31 = vld [vmem:[%s7157_s1 + $0x2] sm:$0x3] }
  0xff   : > { %v618_v35 = vpop.f32.mrf.mxu0  ;;  %5677 = vmatmul.mubr.msk.bf16.vlgmr.msra.gmra.mxu0 %vm217_vm2, %v3583_v25  ;;  %v4135_v34 = vrot.slane %v4133_v21, 1  ;;  %v4146_v40 = vsel %vm221_vm0, %v5152_v31, 0 }
 0x100   : > { %5687 = vmatpush3.bf16.msra.mxu0 %v3689_v32  ;;  %v6858_v43 = vpop.f32.mrf.mxu1  ;;  %5695 = vmatmul.mubr.msk.bf16.vlgmr.msra.gmra.mxu1 %vm217_vm2, %v5926_v26  ;;  %v625_v49 = vadd.f32 %v618_v35, %v563_v42  ;;  %v4005_v29 = vsel %vm204_vm3, %v4000_v17, %v4004_v18  ;;  %v4138_v35 = vshll.u32 %v6914_v20, 16 }
 0x101   : > { %v5390_v45 = vpop.f32.mrf.mxu0  ;;  %5688 = vmatprep.mubr.msk.bf16.mxu0 %vm6042_vm1, %v6041_v1  ;;  %5698 = vmatprep.subr.bf16.mxu0 %v6041_v1  ;;  %v4136_v44 = vor.u32 %v4135_v34, %v4131_v33 }
 0x102   : > { %v5408_v50 = vpop.f32.mrf.mxu1  ;;  %5705 = vmatpush3.bf16.msra.mxu1 %v3876_v39  ;;  %5706 = vmatprep.mubr.msk.bf16.mxu1 %vm6042_vm1, %v6041_v1  ;;  %v699_v7 = vadd.f32 %v6816_v6, %v625_v49  ;;  %v3813_v6 = vrot.slane %v3811_v56, 1  ;;  %v4140_v45 = vrot.slane %v4138_v35, 1  ;;  %v5157_v49 = vld [vmem:[%s6162_s28 + $0x54] sm:$0xe]  ;;  %v5145_v56 = vcombine.low %v5143_v46, %v6834_v19 }
 0x103   : > { %v621_v53 = vpop.f32.mrf.mxu0  ;;  %5716 = vmatprep.subr.bf16.mxu1 %v6041_v1  ;;  %v5166_v50 = vld [vmem:[%s6162_s28 + $0x60] sm:$0xf]  ;;  %v5159_v63 = vcombine.low %v5157_v49, %v6875_v52 }
 0x104   : > { %v6882_v59 = vpop.f32.mrf.mxu1  ;;  %v626_v57 = vadd.f32 %v621_v53, %v564_v58  ;;  %v3814_v30 = vsel %vm204_vm3, %v3809_v14, %v3813_v6  ;;  %v5158_v58 = vld [vmem:[%s7157_s1 + $0x4] sm:$0x3]  ;;  %v4141_v62 = vsel %vm204_vm3, %v4136_v44, %v4140_v45  ;;  %v4119_v52 = vld [vmem:[%s7157_s1] sm:$0x3] }
 0x105   : > { %v5391_v0 = vpop.f32.mrf.mxu0  ;;  %v4247_v19 = vsel %vm221_vm0, %v5158_v58, 0 }
 0x106   : > { %v5409_v8 = vpop.f32.mrf.mxu1  ;;  %v700_v22 = vadd.f32 %v6841_v24, %v626_v57  ;;  %v3937_v24 = vsel %vm221_vm0, %v5133_v15, 0  ;;  %v5170_v0 = vcombine.low %v5166_v50, %v6954_v51 }
 0x107   : > { %v750_v10 = vpop.f32.mrf.mxu0  ;;  %5689 = vmatmul.mubr.msk.bf16.vlgmr.msra.gmra.mxu0 %vm217_vm2, %v3684_v54  ;;  %v5933_v54 = vld [vmem:[%s6162_s28 + $0x60] sm:$0xff]   ;;  %v4061_v8 = vrot.slane %v6868_v47, 1 }
 0x108   : > { %v757_v13 = vadd.f32 %v750_v10, %v699_v7  ;;  %5699 = vmatpush3.bf16.msra.mxu0 %v3819_v60  ;;  %v6904_v11 = vpop.f32.mrf.mxu1  ;;  %5707 = vmatmul.mubr.msk.bf16.vlgmr.msra.gmra.mxu1 %vm217_vm2, %v3871_v61  ;;  %v4067_v61 = vsel %vm221_vm0, %v5144_v36, 0  ;;  %v4060_v7 = vrot.slane %v5145_v56, 1  ;;  %v4364_v14 = vshll.u32 %v5170_v0, 16  ;;  %v5181_v36 = vld [vmem:[%s7157_s1 + $0xc] sm:$0x3] }
 0x109   : > { %v5402_v16 = vpop.f32.mrf.mxu0  ;;  %5700 = vmatprep.mubr.msk.bf16.mxu0 %vm6042_vm1, %v6041_v1  ;;  %5710 = vmatprep.subr.bf16.mxu0 %v6041_v1 }
 0x10a   : > { %v765_v23 = vadd.f32 %v6900_v9, %v757_v13  ;;  %v5420_v25 = vpop.f32.mrf.mxu1  ;;  %5717 = vmatpush3.bf16.msra.mxu1 %v4010_v12  ;;  %5718 = vmatprep.mubr.msk.bf16.mxu1 %vm6042_vm1, %v6041_v1  ;;  %v4241_v12 = vrot.slane %v6914_v20, 1  ;;  %v6981_v13 = vld [vmem:[%s6162_s28 + $0x68] ss:$0 sps:$4 sm:$0x11]   ;;  %v4062_v21 = vsel %vm318_vm4, %v4060_v7, %v4061_v8  ;;  %v4192_v20 = vsel %vm221_vm0, %v4119_v52, 0  ;;  %v5941_v52 = vld [vmem:[%s6162_s28 + $0x6c] sm:$0xff]  }
 0x10b   : > { %v753_v26 = vpop.f32.mrf.mxu0  ;;  %5728 = vmatprep.subr.bf16.mxu1 %v6041_v1  ;;  %v4366_v25 = vrot.slane %v4364_v14, 1 }
 0x10c   : > { %767 = vst [vmem:[%s6922_s8] sm:$0xff] %v765_v23  ;;  %v758_v27 = vadd.f32 %v753_v26, %v700_v22  ;;  %v6925_v28 = vpop.f32.mrf.mxu1  ;;  %v4362_v22 = vshrl.u32 %v5170_v0, 16  ;;  %v4369_v26 = vshll.u32 %v6981_v13, 16 }
 0x10d   : > { %v5403_v32 = vpop.f32.mrf.mxu0 }
 0x10e   : > { %v766_v37 = vadd.f32 %v6900_v9, %v758_v27  ;;  %v5421_v38 = vpop.f32.mrf.mxu1  ;;  %v4371_v35 = vrot.slane %v4369_v26, 1 }
 0x10f   : > { %v880_v39 = vpop.f32.mrf.mxu0  ;;  %5701 = vmatmul.mubr.msk.bf16.vlgmr.msra.gmra.mxu0 %vm217_vm2, %v3814_v30 }
 0x110   : > { %768 = vst [vmem:[%s6922_s8 + $0x8] sm:$0xff] %v766_v37  ;;  %5711 = vmatpush3.bf16.msra.mxu0 %v3937_v24  ;;  %v6939_v41 = vpop.f32.mrf.mxu1  ;;  %5719 = vmatmul.mubr.msk.bf16.vlgmr.msra.gmra.mxu1 %vm217_vm2, %v4005_v29  ;;  %v881_v3 = vadd.f32 %v880_v39, %v6858_v43  ;;  %v4240_v43 = vrot.slane %v5159_v63, 1  ;;  %v5163_v39 = vld [vmem:[%s7157_s1 + $0x6] sm:$0x3] }
 0x111   : > { %v5414_v42 = vpop.f32.mrf.mxu0  ;;  %5712 = vmatprep.mubr.msk.bf16.mxu0 %vm6042_vm1, %v6041_v1  ;;  %5722 = vmatprep.subr.bf16.mxu0 %v6041_v1  ;;  %v4304_v45 = vsel %vm221_vm0, %v5163_v39, 0 }
 0x112   : > { %v5432_v48 = vpop.f32.mrf.mxu1  ;;  %5729 = vmatpush3.bf16.msra.mxu1 %v4146_v40  ;;  %5730 = vmatprep.mubr.msk.bf16.mxu1 %vm6042_vm1, %v6041_v1  ;;  %v942_v47 = vadd.f32 %v6904_v11, %v881_v3  ;;  %v4242_v11 = vsel %vm318_vm4, %v4240_v43, %v4241_v12  ;;  %v5174_v3 = vld [vmem:[%s7157_s1 + $0xa] sm:$0x3]  ;;  %v5192_v43 = vld [vmem:[%s7157_s1 + $0x10] sm:$0x3] }
 0x113   : > { %v883_v53 = vpop.f32.mrf.mxu0  ;;  %5740 = vmatprep.subr.bf16.mxu1 %v6041_v1 }
 0x114   : > { %v6958_v55 = vpop.f32.mrf.mxu1  ;;  %v884_v6 = vadd.f32 %v883_v53, %v6882_v59  ;;  %v5169_v59 = vld [vmem:[%s7157_s1 + $0x8] sm:$0x3] }
 0x115   : > { %v5415_v60 = vpop.f32.mrf.mxu0  ;;  %v4377_v31 = vsel %vm221_vm0, %v5169_v59, 0 }
 0x116   : > { %v5433_v2 = vpop.f32.mrf.mxu1  ;;  %v943_v27 = vadd.f32 %v6925_v28, %v884_v6  ;;  %v4367_v28 = vor.u32 %v4366_v25, %v4362_v22  ;;  %v5173_v60 = vld [vmem:[%s6162_s28 + $0x60] sm:$0xe]  ;;  %v4434_v6 = vsel %vm221_vm0, %v5174_v3, 0 }
 0x117   : > { %v992_v4 = vpop.f32.mrf.mxu0  ;;  %5713 = vmatmul.mubr.msk.bf16.vlgmr.msra.gmra.mxu0 %vm217_vm2, %v5933_v54  ;;  %v4495_v54 = vsel %vm221_vm0, %v5181_v36, 0  ;;  %v5191_v2 = vld [vmem:[%s6162_s28 + $0x6c] sm:$0xe] }
 0x118   : > { %5723 = vmatpush3.bf16.msra.mxu0 %v4067_v61  ;;  %v1183_v57 = vpop.f32.mrf.mxu1  ;;  %5731 = vmatmul.mubr.msk.bf16.vlgmr.msra.gmra.mxu1 %vm217_vm2, %v4141_v62  ;;  %v999_v17 = vadd.f32 %v992_v4, %v942_v47  ;;  %v4372_v46 = vsel %vm204_vm3, %v4367_v28, %v4371_v35  ;;  %v5184_v61 = vld [vmem:[%s6162_s28 + $0x6c] sm:$0xf]  ;;  %v5944_v47 = vld [vmem:[%s6162_s28 + $0x74] ss:$0 sps:$4 sm:$0x11]  }
 0x119   : > { %v5426_v10 = vpop.f32.mrf.mxu0  ;;  %5724 = vmatprep.mubr.msk.bf16.mxu0 %vm6042_vm1, %v6041_v1  ;;  %5734 = vmatprep.subr.bf16.mxu0 %v6041_v1  ;;  %v4619_v26 = vrot.slane %v5944_v47, 1 }
 0x11a   : > { %v5444_v15 = vpop.f32.mrf.mxu1  ;;  %5741 = vmatpush3.bf16.msra.mxu1 %v4247_v19  ;;  %5742 = vmatprep.mubr.msk.bf16.mxu1 %vm6042_vm1, %v6041_v1  ;;  %v1072_v29 = vadd.f32 %v6939_v41, %v999_v17  ;;  %v5940_v19 = vld [vmem:[%s6162_s28 + $0x60] sm:$0xff]   ;;  %v5175_v10 = vcombine.low %v5173_v60, %v6954_v51 }
 0x11b   : > { %v995_v16 = vpop.f32.mrf.mxu0  ;;  %5752 = vmatprep.subr.bf16.mxu1 %v6041_v1 }
 0x11c   : > { %v1186_v18 = vpop.f32.mrf.mxu1  ;;  %v1000_v32 = vadd.f32 %v995_v16, %v943_v27  ;;  %v4427_v59 = vrot.slane %v5175_v10, 1 }
 0x11d   : > { %v5427_v23 = vpop.f32.mrf.mxu0 }
 0x11e   : > { %v5445_v30 = vpop.f32.mrf.mxu1  ;;  %v1073_v41 = vadd.f32 %v6958_v55, %v1000_v32  ;;  %v4428_v23 = vrot.slane %v6981_v13, 1 }
 0x11f   : > { %v1122_v24 = vpop.f32.mrf.mxu0  ;;  %5725 = vmatmul.mubr.msk.bf16.vlgmr.msra.gmra.mxu0 %vm217_vm2, %v4062_v21  ;;  %v4625_v21 = vsel %vm221_vm0, %v5192_v43, 0  ;;  %v5187_v30 = vld [vmem:[%s7157_s1 + $0xe] sm:$0x3] }
 0x120   : > { %5735 = vmatpush3.bf16.msra.mxu0 %v4192_v20  ;;  %v1313_v33 = vpop.f32.mrf.mxu1  ;;  %5743 = vmatmul.mubr.msk.bf16.vlgmr.msra.gmra.mxu1 %vm217_vm2, %v4242_v11  ;;  %v1129_v37 = vadd.f32 %v1122_v24, %v1072_v29  ;;  %v4568_v28 = vsel %vm221_vm0, %v5187_v30, 0 }
 0x121   : > { %v5438_v34 = vpop.f32.mrf.mxu0  ;;  %5736 = vmatprep.mubr.msk.bf16.mxu0 %vm6042_vm1, %v6041_v1  ;;  %5746 = vmatprep.subr.bf16.mxu0 %v6041_v1 }
 0x122   : > { %v5456_v38 = vpop.f32.mrf.mxu1  ;;  %5753 = vmatpush3.bf16.msra.mxu1 %v4377_v31  ;;  %5754 = vmatprep.mubr.msk.bf16.mxu1 %vm6042_vm1, %v6041_v1  ;;  %v1190_v49 = vadd.f32 %v1183_v57, %v1129_v37  ;;  %v4429_v31 = vsel %vm318_vm4, %v4427_v59, %v4428_v23 }
 0x123   : > { %v1125_v40 = vpop.f32.mrf.mxu0  ;;  %5764 = vmatprep.subr.bf16.mxu1 %v6041_v1 }
 0x124   : > { %v1316_v42 = vpop.f32.mrf.mxu1  ;;  %v1130_v48 = vadd.f32 %v1125_v40, %v1073_v41 }
 0x125   : > { %v5439_v44 = vpop.f32.mrf.mxu0 }
 0x126   : > { %v5457_v50 = vpop.f32.mrf.mxu1  ;;  %v1191_v63 = vadd.f32 %v1186_v18, %v1130_v48 }
 0x127   : > { %v1256_v53 = vpop.f32.mrf.mxu0  ;;  %5737 = vmatmul.mubr.msk.bf16.vlgmr.msra.gmra.mxu0 %vm217_vm2, %v6892_v5  ;;  %v5185_v5 = vld [vmem:[%s6162_s28 + $0x70] sm:$0xf]  ;;  %s6043_s28 = smov [#allocation2]  }
 0x128   : > { %v1263_v55 = vadd.f32 %v1256_v53, %v1190_v49  ;;  %5747 = vmatpush3.bf16.msra.mxu0 %v4304_v45  ;;  %v7018_v56 = vpop.f32.mrf.mxu1  ;;  %5755 = vmatmul.mubr.msk.bf16.vlgmr.msra.gmra.mxu1 %vm217_vm2, %v4372_v46  ;;  %v5188_v12 = vcombine.low %v5184_v61, %v5185_v5  ;;  %v5193_v15 = vcombine.low %v5191_v2, %v5185_v5  ;;  %s5951_s4 = sshll.u32 %s6043_s28, 4  ;;  %s5952_s4 = int_to_ptr.vmem [resolvable:$false] %s5951_s4 }
 0x129   : > { %v5450_v58 = vpop.f32.mrf.mxu0  ;;  %5748 = vmatprep.mubr.msk.bf16.mxu0 %vm6042_vm1, %v6041_v1  ;;  %5758 = vmatprep.subr.bf16.mxu0 %v6041_v1  ;;  %s5953_s5 = scalar_lea.vmem %s5952_s4, 4096  ;;  %p5954_p2 = scmp.lt.s32.totalorder %s7100_s20, %s5952_s4 }
 0x12a   : > { %v1320_v62 = vadd.f32 %v1313_v33, %v1263_v55  ;;  %v5468_v0 = vpop.f32.mrf.mxu1  ;;  %5765 = vmatpush3.bf16.msra.mxu1 %v4495_v54  ;;  %5766 = vmatprep.mubr.msk.bf16.mxu1 %vm6042_vm1, %v6041_v1  ;;  %v4555_v11 = vshll.u32 %v5188_v12, 16  ;;  %v4618_v25 = vrot.slane %v5193_v15, 1  ;;  %v4553_v32 = vshrl.u32 %v5188_v12, 16  ;;  %p5955_p4 = scmp.lt.s32.totalorder %s5953_s5, %s5947_s29 }
 0x12b   : > { %v1259_v4 = vpop.f32.mrf.mxu0  ;;  %5776 = vmatprep.subr.bf16.mxu1 %v6041_v1  ;;  %v4560_v33 = vshll.u32 %v5944_v47, 16 }
 0x12c   : > { %v1322_v57 = vadd.f32 %v6900_v9, %v1320_v62  ;;  %v1264_v7 = vadd.f32 %v1259_v4, %v1191_v63  ;;  %v1441_v8 = vpop.f32.mrf.mxu1  ;;  %v4557_v29 = vrot.slane %v4555_v11, 1  ;;  %v4620_v35 = vsel %vm318_vm4, %v4618_v25, %v4619_v26  ;;  %p5956_p5 = por %p5955_p4, %p5954_p2 }
 0x12d   : > { %v5451_v14 = vpop.f32.mrf.mxu0  ;;  %v4562_v41 = vrot.slane %v4560_v33, 1 }
 0x12e   : > { %4907 = vst [vmem:[%s6922_s8 + $0x10] sm:$0xff] %v1322_v57  ;;  %v1321_v16 = vadd.f32 %v1316_v42, %v1264_v7  ;;  %v5469_v17 = vpop.f32.mrf.mxu1  ;;  %v4558_v40 = vor.u32 %v4557_v29, %v4553_v32  ;;  %p5957_p6 = pnand %p5956_p5, %p5950_p1 }
 0x12f   : > { %v1392_v18 = vpop.f32.mrf.mxu0  ;;  %5749 = vmatmul.mubr.msk.bf16.vlgmr.msra.gmra.mxu0 %vm217_vm2, %v5940_v19 }
 0x130   : > { %v1323_v51 = vadd.f32 %v6900_v9, %v1321_v16  ;;  %5759 = vmatpush3.bf16.msra.mxu0 %v4434_v6  ;;  %v1550_v20 = vpop.f32.mrf.mxu1  ;;  %5767 = vmatmul.mubr.msk.bf16.vlgmr.msra.gmra.mxu1 %vm217_vm2, %v5941_v52  ;;  %v1439_v45 = vadd.f32 %v7018_v56, %v1392_v18  ;;  %v4563_v48 = vsel %vm204_vm3, %v4558_v40, %v4562_v41 }
 0x131   : > { %v5462_v22 = vpop.f32.mrf.mxu0  ;;  %5760 = vmatprep.mubr.msk.bf16.mxu0 %vm6042_vm1, %v6041_v1  ;;  %5770 = vmatprep.subr.bf16.mxu0 %v6041_v1 }
 0x132   : > { %4908 = vst [vmem:[%s6922_s8 + $0x18] sm:$0xff] %v1323_v51  ;;  %v5480_v27 = vpop.f32.mrf.mxu1  ;;  %5777 = vmatpush3.bf16.msra.mxu1 %v4625_v21  ;;  %5778 = vmatprep.mubr.msk.bf16.mxu1 %vm6042_vm1, %v6041_v1 }
 0x133   : > { %v1395_v13 = vpop.f32.mrf.mxu0 }
 0x134   : > { %v1553_v24 = vpop.f32.mrf.mxu1  ;;  %v1442_v55 = vadd.f32 %v1441_v8, %v1395_v13 }
 0x135   : > { %v5463_v34 = vpop.f32.mrf.mxu0 }
 0x136   : > { %v5481_v37 = vpop.f32.mrf.mxu1 }
 0x137   : > { %v1493_v38 = vpop.f32.mrf.mxu0  ;;  %5761 = vmatmul.mubr.msk.bf16.vlgmr.msra.gmra.mxu0 %vm217_vm2, %v4429_v31 }
 0x138   : > { %5771 = vmatpush3.bf16.msra.mxu0 %v4568_v28  ;;  %v1680_v39 = vpop.f32.mrf.mxu1  ;;  %5779 = vmatmul.mubr.msk.bf16.vlgmr.msra.gmra.mxu1 %vm217_vm2, %v4620_v35  ;;  %v1500_v50 = vadd.f32 %v1493_v38, %v1439_v45 }
 0x139   : > { %v5474_v42 = vpop.f32.mrf.mxu0  ;;  %5772 = vmatprep.mubr.msk.bf16.mxu0 %vm6042_vm1, %v6041_v1 }
 0x13a   : > { %v5492_v36 = vpop.f32.mrf.mxu1  ;;  %v1557_v5 = vadd.f32 %v1550_v20, %v1500_v50 }
 0x13b   : > { %v1496_v44 = vpop.f32.mrf.mxu0 }
 0x13c   : > { %v1683_v46 = vpop.f32.mrf.mxu1  ;;  %v1501_v61 = vadd.f32 %v1496_v44, %v1442_v55 }
 0x13d   : > { %v5475_v49 = vpop.f32.mrf.mxu0 }
 0x13e   : > { %v5493_v53 = vpop.f32.mrf.mxu1  ;;  %v1558_v56 = vadd.f32 %v1553_v24, %v1501_v61 }
 0x13f   : > { %v1623_v54 = vpop.f32.mrf.mxu0  ;;  %5773 = vmatmul.mubr.msk.bf16.vlgmr.msra.gmra.mxu0 %vm217_vm2, %v4563_v48 }
 0x140   : > { %v1814_v58 = vpop.f32.mrf.mxu1  ;;  %v1630_v63 = vadd.f32 %v1623_v54, %v1557_v5 }
 0x141   : > { %v5486_v60 = vpop.f32.mrf.mxu0 }
 0x142   : > { %v5504_v62 = vpop.f32.mrf.mxu1  ;;  %v1687_v57 = vadd.f32 %v1680_v39, %v1630_v63 }
 0x143   : > { %v1626_v1 = vpop.f32.mrf.mxu0 }
 0x144   : > { %v1817_v0 = vpop.f32.mrf.mxu1  ;;  %v1631_v19 = vadd.f32 %v1626_v1, %v1558_v56 }
 0x145   : > { %v5487_v3 = vpop.f32.mrf.mxu0 }
 0x146   : > { %v5505_v2 = vpop.f32.mrf.mxu1  ;;  %v1688_v12 = vadd.f32 %v1683_v46, %v1631_v19 }
 0x147   : > { %v1741_v4 = vpop.f32.mrf.mxu0 }
 0x148   : > { %v1950_v7 = vpop.f32.mrf.mxu1  ;;  %v1748_v10 = vadd.f32 %v1741_v4, %v1687_v57 }
 0x149   : > { %v5498_v52 = vpop.f32.mrf.mxu0 }
 0x14a   : > { %v5516_v43 = vpop.f32.mrf.mxu1  ;;  %v1821_v15 = vadd.f32 %v1814_v58, %v1748_v10 }
 0x14b   : > { %v1744_v8 = vpop.f32.mrf.mxu0 }
 0x14c   : > { %v1953_v14 = vpop.f32.mrf.mxu1  ;;  %v1749_v47 = vadd.f32 %v1744_v8, %v1688_v12 }
 0x14d   : > { %v5499_v6 = vpop.f32.mrf.mxu0 }
 0x14e   : > { %v5517_v16 = vpop.f32.mrf.mxu1  ;;  %v1822_v59 = vadd.f32 %v1817_v0, %v1749_v47 }
 0x14f   : > { %v1871_v17 = vpop.f32.mrf.mxu0 }
 0x150   : > { %v1878_v18 = vadd.f32 %v1871_v17, %v1821_v15  ;;  %v2051_v21 = vpop.f32.mrf.mxu1 }
 0x151   : > { %v5510_v51 = vpop.f32.mrf.mxu0 }
 0x152   : > { %v1880_v20 = vadd.f32 %v6900_v9, %v1878_v18  ;;  %v5528_v23 = vpop.f32.mrf.mxu1 }
 0x153   : > { %v1874_v11 = vpop.f32.mrf.mxu0 }
 0x154   : > { %4955 = vst [vmem:[%s6922_s8 + $0x20] sm:$0xff] %v1880_v20  ;;  %v1879_v22 = vadd.f32 %v1874_v11, %v1822_v59  ;;  %v2054_v25 = vpop.f32.mrf.mxu1 }
 0x155   : > { %v5511_v26 = vpop.f32.mrf.mxu0 }
 0x156   : > { %v1881_v27 = vadd.f32 %v6900_v9, %v1879_v22  ;;  %v5529_v30 = vpop.f32.mrf.mxu1 }
 0x157   : > { %v1996_v13 = vpop.f32.mrf.mxu0 }
 0x158   : > { %4956 = vst [vmem:[%s6922_s8 + $0x28] sm:$0xff] %v1881_v27  ;;  %v2181_v24 = vpop.f32.mrf.mxu1  ;;  %v1997_v28 = vadd.f32 %v1996_v13, %v1950_v7 }
 0x159   : > { %v5522_v31 = vpop.f32.mrf.mxu0 }
 0x15a   : > { %v5540_v32 = vpop.f32.mrf.mxu1  ;;  %v2058_v41 = vadd.f32 %v2051_v21, %v1997_v28 }
 0x15b   : > { %v1999_v29 = vpop.f32.mrf.mxu0 }
 0x15c   : > { %v2184_v33 = vpop.f32.mrf.mxu1  ;;  %v2000_v40 = vadd.f32 %v1999_v29, %v1953_v14 }
 0x15d   : > { %v5523_v34 = vpop.f32.mrf.mxu0 }
 0x15e   : > { %v5541_v35 = vpop.f32.mrf.mxu1  ;;  %v2059_v48 = vadd.f32 %v2054_v25, %v2000_v40 }
 0x15f   : > { %v2108_v37 = vpop.f32.mrf.mxu0 }
 0x160   : > { %v2299_v38 = vpop.f32.mrf.mxu1  ;;  %v2115_v44 = vadd.f32 %v2108_v37, %v2058_v41 }
 0x161   : > { %v5534_v39 = vpop.f32.mrf.mxu0 }
 0x162   : > { %v5552_v42 = vpop.f32.mrf.mxu1  ;;  %v2188_v54 = vadd.f32 %v2181_v24, %v2115_v44 }
 0x163   : > { %v2111_v36 = vpop.f32.mrf.mxu0 }
 0x164   : > { %v2302_v45 = vpop.f32.mrf.mxu1  ;;  %v2116_v53 = vadd.f32 %v2111_v36, %v2059_v48 }
 0x165   : > { %v5535_v46 = vpop.f32.mrf.mxu0 }
 0x166   : > { %v5553_v49 = vpop.f32.mrf.mxu1  ;;  %v2189_v62 = vadd.f32 %v2184_v33, %v2116_v53 }
 0x167   : > { %v2238_v50 = vpop.f32.mrf.mxu0 }
 0x168   : > { %v2429_v55 = vpop.f32.mrf.mxu1  ;;  %v2245_v60 = vadd.f32 %v2238_v50, %v2188_v54 }
 0x169   : > { %v5546_v58 = vpop.f32.mrf.mxu0 }
 0x16a   : > { %v5564_v61 = vpop.f32.mrf.mxu1  ;;  %v2306_v3 = vadd.f32 %v2299_v38, %v2245_v60 }
 0x16b   : > { %v2241_v5 = vpop.f32.mrf.mxu0 }
 0x16c   : > { %v2432_v1 = vpop.f32.mrf.mxu1  ;;  %v2246_v0 = vadd.f32 %v2241_v5, %v2189_v62 }
 0x16d   : > { %v5547_v63 = vpop.f32.mrf.mxu0 }
 0x16e   : > { %v5565_v56 = vpop.f32.mrf.mxu1  ;;  %v2307_v52 = vadd.f32 %v2302_v45, %v2246_v0 }
 0x16f   : > { %v2372_v2 = vpop.f32.mrf.mxu0 }
 0x170   : > { %v2379_v4 = vadd.f32 %v2372_v2, %v2306_v3  ;;  %v2554_v19 = vpop.f32.mrf.mxu1 }
 0x171   : > { %v5558_v57 = vpop.f32.mrf.mxu0 }
 0x172   : > { %v2436_v7 = vadd.f32 %v2429_v55, %v2379_v4  ;;  %v5576_v10 = vpop.f32.mrf.mxu1 }
 0x173   : > { %v2375_v43 = vpop.f32.mrf.mxu0 }
 0x174   : > { %v2438_v8 = vadd.f32 %v6900_v9, %v2436_v7  ;;  %v2380_v12 = vadd.f32 %v2375_v43, %v2307_v52  ;;  %v2557_v14 = vpop.f32.mrf.mxu1 }
 0x175   : > { %v5559_v6 = vpop.f32.mrf.mxu0 }
 0x176   : > { %5003 = vst [vmem:[%s6922_s8 + $0x30] sm:$0xff] %v2438_v8  ;;  %v2437_v47 = vadd.f32 %v2432_v1, %v2380_v12  ;;  %v5577_v15 = vpop.f32.mrf.mxu1 }
 0x177   : > { %v2508_v16 = vpop.f32.mrf.mxu0 }
 0x178   : > { %v2439_v17 = vadd.f32 %v6900_v9, %v2437_v47  ;;  %v2666_v18 = vpop.f32.mrf.mxu1  ;;  %v2555_v13 = vadd.f32 %v2554_v19, %v2508_v16 }
 0x179   : > { %v5570_v21 = vpop.f32.mrf.mxu0 }
 0x17a   : > { %5004 = vst [vmem:[%s6922_s8 + $0x38] sm:$0xff] %v2439_v17  ;;  %v5588_v51 = vpop.f32.mrf.mxu1 }
 0x17b   : > { %v2511_v20 = vpop.f32.mrf.mxu0 }
 0x17c   : > { %v2669_v59 = vpop.f32.mrf.mxu1  ;;  %v2558_v34 = vadd.f32 %v2557_v14, %v2511_v20 }
 0x17d   : > { %v5571_v23 = vpop.f32.mrf.mxu0 }
 0x17e   : > { %v5589_v11 = vpop.f32.mrf.mxu1 }
 0x17f   : > { %v2609_v22 = vpop.f32.mrf.mxu0 }
 0x180   : > { %v2796_v25 = vpop.f32.mrf.mxu1  ;;  %v2616_v32 = vadd.f32 %v2609_v22, %v2555_v13 }
 0x181   : > { %v5582_v26 = vpop.f32.mrf.mxu0 }
 0x182   : > { %v5600_v27 = vpop.f32.mrf.mxu1  ;;  %v2673_v38 = vadd.f32 %v2666_v18, %v2616_v32 }
 0x183   : > { %v2612_v30 = vpop.f32.mrf.mxu0 }
 0x184   : > { %v2799_v24 = vpop.f32.mrf.mxu1  ;;  %v2617_v37 = vadd.f32 %v2612_v30, %v2558_v34 }
 0x185   : > { %v5583_v31 = vpop.f32.mrf.mxu0 }
 0x186   : > { %v5601_v29 = vpop.f32.mrf.mxu1  ;;  %v2674_v44 = vadd.f32 %v2669_v59, %v2617_v37 }
 0x187   : > { %v2739_v33 = vpop.f32.mrf.mxu0 }
 0x188   : > { %v2930_v28 = vpop.f32.mrf.mxu1  ;;  %v2746_v41 = vadd.f32 %v2739_v33, %v2673_v38 }
 0x189   : > { %v5594_v35 = vpop.f32.mrf.mxu0 }
 0x18a   : > { %v5612_v39 = vpop.f32.mrf.mxu1  ;;  %v2803_v49 = vadd.f32 %v2796_v25, %v2746_v41 }
 0x18b   : > { %v2742_v40 = vpop.f32.mrf.mxu0 }
 0x18c   : > { %v2933_v42 = vpop.f32.mrf.mxu1  ;;  %v2747_v48 = vadd.f32 %v2742_v40, %v2674_v44 }
 0x18d   : > { %v5595_v36 = vpop.f32.mrf.mxu0 }
 0x18e   : > { %v5613_v45 = vpop.f32.mrf.mxu1  ;;  %v2804_v60 = vadd.f32 %v2799_v24, %v2747_v48 }
 0x18f   : > { %v2857_v46 = vpop.f32.mrf.mxu0 }
 0x190   : > { %v3066_v50 = vpop.f32.mrf.mxu1  ;;  %v2864_v54 = vadd.f32 %v2857_v46, %v2803_v49 }
 0x191   : > { %v5606_v53 = vpop.f32.mrf.mxu0 }
 0x192   : > { %v5624_v55 = vpop.f32.mrf.mxu1  ;;  %v2937_v1 = vadd.f32 %v2930_v28, %v2864_v54 }
 0x193   : > { %v2860_v58 = vpop.f32.mrf.mxu0 }
 0x194   : > { %v3069_v61 = vpop.f32.mrf.mxu1  ;;  %v2865_v62 = vadd.f32 %v2860_v58, %v2804_v60 }
 0x195   : > { %v5607_v5 = vpop.f32.mrf.mxu0 }
 0x196   : > { %v5625_v63 = vpop.f32.mrf.mxu1  ;;  %v2938_v19 = vadd.f32 %v2933_v42, %v2865_v62 }
 0x197   : > { %v2987_v0 = vpop.f32.mrf.mxu0 }
 0x198   : > { %v2994_v3 = vadd.f32 %v2987_v0, %v2937_v1  ;;  %v3167_v56 = vpop.f32.mrf.mxu1 }
 0x199   : > { %v5618_v2 = vpop.f32.mrf.mxu0 }
 0x19a   : > { %v2996_v4 = vadd.f32 %v6900_v9, %v2994_v3  ;;  %v5636_v57 = vpop.f32.mrf.mxu1 }
 0x19b   : > { %v2990_v7 = vpop.f32.mrf.mxu0 }
 0x19c   : > { %5051 = vst [vmem:[%s6922_s8 + $0x40] sm:$0xff] %v2996_v4  ;;  %v2995_v52 = vadd.f32 %v2990_v7, %v2938_v19  ;;  %v3170_v10 = vpop.f32.mrf.mxu1 }
 0x19d   : > { %v5619_v43 = vpop.f32.mrf.mxu0 }
 0x19e   : > { %v2997_v8 = vadd.f32 %v6900_v9, %v2995_v52  ;;  %v5637_v12 = vpop.f32.mrf.mxu1 }
 0x19f   : > { %v3112_v14 = vpop.f32.mrf.mxu0 }
 0x1a0   : > { %5052 = vst [vmem:[%s6922_s8 + $0x48] sm:$0xff] %v2997_v8  ;;  %v3297_v6 = vpop.f32.mrf.mxu1  ;;  %v3113_v21 = vadd.f32 %v3112_v14, %v3066_v50 }
 0x1a1   : > { %v5630_v47 = vpop.f32.mrf.mxu0 }
 0x1a2   : > { %v5648_v15 = vpop.f32.mrf.mxu1  ;;  %v3174_v22 = vadd.f32 %v3167_v56, %v3113_v21 }
 0x1a3   : > { %v3115_v16 = vpop.f32.mrf.mxu0 }
 0x1a4   : > { %v3300_v17 = vpop.f32.mrf.mxu1  ;;  %v3116_v11 = vadd.f32 %v3115_v16, %v3069_v61 }
 0x1a5   : > { %v5631_v18 = vpop.f32.mrf.mxu0 }
 0x1a6   : > { %v5649_v51 = vpop.f32.mrf.mxu1  ;;  %v3175_v24 = vadd.f32 %v3170_v10, %v3116_v11 }
 0x1a7   : > { %v3224_v20 = vpop.f32.mrf.mxu0 }
 0x1a8   : > { %v3415_v59 = vpop.f32.mrf.mxu1  ;;  %v3231_v27 = vadd.f32 %v3224_v20, %v3174_v22 }
 0x1a9   : > { %v5642_v23 = vpop.f32.mrf.mxu0 }
 0x1aa   : > { %v5660_v25 = vpop.f32.mrf.mxu1  ;;  %v3304_v33 = vadd.f32 %v3297_v6, %v3231_v27 }
 0x1ab   : > { %v3227_v26 = vpop.f32.mrf.mxu0 }
 0x1ac   : > { %v3418_v30 = vpop.f32.mrf.mxu1  ;;  %v3232_v29 = vadd.f32 %v3227_v26, %v3175_v24 }
 0x1ad   : > { %v5643_v13 = vpop.f32.mrf.mxu0 }
 0x1ae   : > { %v5661_v31 = vpop.f32.mrf.mxu1  ;;  %v3305_v39 = vadd.f32 %v3300_v17, %v3232_v29 }
 0x1af   : > { %v3354_v32 = vpop.f32.mrf.mxu0 }
 0x1b0   : > { %v3545_v34 = vpop.f32.mrf.mxu1  ;;  %v3361_v35 = vadd.f32 %v3354_v32, %v3304_v33 }
 0x1b1   : > { %v5654_v28 = vpop.f32.mrf.mxu0 }
 0x1b2   : > { %v5672_v37 = vpop.f32.mrf.mxu1  ;;  %v3422_v36 = vadd.f32 %v3415_v59, %v3361_v35 }
 0x1b3   : > { %v3357_v38 = vpop.f32.mrf.mxu0 }
 0x1b4   : > { %v3548_v40 = vpop.f32.mrf.mxu1  ;;  %v3362_v42 = vadd.f32 %v3357_v38, %v3305_v39 }
 0x1b5   : > { %v5655_v41 = vpop.f32.mrf.mxu0 }
 0x1b6   : > { %v5673_v44 = vpop.f32.mrf.mxu1  ;;  %v3423_v53 = vadd.f32 %v3418_v30, %v3362_v42 }
 0x1b7   : > { %v3488_v45 = vpop.f32.mrf.mxu0 }
 0x1b8   : > { %v3495_v46 = vadd.f32 %v3488_v45, %v3422_v36  ;;  %v3670_v48 = vpop.f32.mrf.mxu1 }
 0x1b9   : > { %v5666_v49 = vpop.f32.mrf.mxu0 }
 0x1ba   : > { %v3552_v50 = vadd.f32 %v3545_v34, %v3495_v46  ;;  %v5684_v54 = vpop.f32.mrf.mxu1 }
 0x1bb   : > { %v3491_v55 = vpop.f32.mrf.mxu0 }
 0x1bc   : > { %v3554_v58 = vadd.f32 %v6900_v9, %v3552_v50  ;;  %v3496_v60 = vadd.f32 %v3491_v55, %v3423_v53  ;;  %v3673_v61 = vpop.f32.mrf.mxu1 }
 0x1bd   : > { %v5667_v5 = vpop.f32.mrf.mxu0 }
 0x1be   : > { %5099 = vst [vmem:[%s6922_s8 + $0x50] sm:$0xff] %v3554_v58  ;;  %v3553_v62 = vadd.f32 %v3548_v40, %v3496_v60  ;;  %v5685_v1 = vpop.f32.mrf.mxu1 }
 0x1bf   : > { %v3624_v63 = vpop.f32.mrf.mxu0 }
 0x1c0   : > { %v3555_v0 = vadd.f32 %v6900_v9, %v3553_v62  ;;  %v3782_v3 = vpop.f32.mrf.mxu1  ;;  %v3671_v14 = vadd.f32 %v3670_v48, %v3624_v63 }
 0x1c1   : > { %v5678_v56 = vpop.f32.mrf.mxu0 }
 0x1c2   : > { %5100 = vst [vmem:[%s6922_s8 + $0x58] sm:$0xff] %v3555_v0  ;;  %v5696_v2 = vpop.f32.mrf.mxu1 }
 0x1c3   : > { %v3627_v4 = vpop.f32.mrf.mxu0 }
 0x1c4   : > { %v3785_v19 = vpop.f32.mrf.mxu1  ;;  %v3674_v18 = vadd.f32 %v3673_v61, %v3627_v4 }
 0x1c5   : > { %v5679_v57 = vpop.f32.mrf.mxu0 }
 0x1c6   : > { %v5697_v7 = vpop.f32.mrf.mxu1 }
 0x1c7   : > { %v3725_v52 = vpop.f32.mrf.mxu0 }
 0x1c8   : > { %v3912_v10 = vpop.f32.mrf.mxu1  ;;  %v3732_v15 = vadd.f32 %v3725_v52, %v3671_v14 }
 0x1c9   : > { %v5690_v43 = vpop.f32.mrf.mxu0 }
 0x1ca   : > { %v5708_v8 = vpop.f32.mrf.mxu1  ;;  %v3789_v59 = vadd.f32 %v3782_v3, %v3732_v15 }
 0x1cb   : > { %v3728_v12 = vpop.f32.mrf.mxu0 }
 0x1cc   : > { %v3915_v6 = vpop.f32.mrf.mxu1  ;;  %v3733_v20 = vadd.f32 %v3728_v12, %v3674_v18 }
 0x1cd   : > { %v5691_v47 = vpop.f32.mrf.mxu0 }
 0x1ce   : > { %v5709_v16 = vpop.f32.mrf.mxu1  ;;  %v3790_v27 = vadd.f32 %v3785_v19, %v3733_v20 }
 0x1cf   : > { %v3855_v17 = vpop.f32.mrf.mxu0 }
 0x1d0   : > { %v4046_v21 = vpop.f32.mrf.mxu1  ;;  %v3862_v22 = vadd.f32 %v3855_v17, %v3789_v59 }
 0x1d1   : > { %v5702_v51 = vpop.f32.mrf.mxu0 }
 0x1d2   : > { %v5720_v23 = vpop.f32.mrf.mxu1  ;;  %v3919_v31 = vadd.f32 %v3912_v10, %v3862_v22 }
 0x1d3   : > { %v3858_v11 = vpop.f32.mrf.mxu0 }
 0x1d4   : > { %v4049_v25 = vpop.f32.mrf.mxu1  ;;  %v3863_v24 = vadd.f32 %v3858_v11, %v3790_v27 }
 0x1d5   : > { %v5703_v26 = vpop.f32.mrf.mxu0 }
 0x1d6   : > { %v5721_v30 = vpop.f32.mrf.mxu1  ;;  %v3920_v35 = vadd.f32 %v3915_v6, %v3863_v24 }
 0x1d7   : > { %v3973_v13 = vpop.f32.mrf.mxu0 }
 0x1d8   : > { %v4182_v32 = vpop.f32.mrf.mxu1  ;;  %v3980_v33 = vadd.f32 %v3973_v13, %v3919_v31 }
 0x1d9   : > { %v5714_v29 = vpop.f32.mrf.mxu0 }
 0x1da   : > { %v5732_v34 = vpop.f32.mrf.mxu1  ;;  %v4053_v40 = vadd.f32 %v4046_v21, %v3980_v33  ;;  %v5946_v29 = vld [vmem:[%s7158_s2] ss:$0 sm:$0xff] }
 0x1db   : > { %v3976_v28 = vpop.f32.mrf.mxu0 }
 0x1dc   : > { %v4185_v37 = vpop.f32.mrf.mxu1  ;;  %v3981_v39 = vadd.f32 %v3976_v28, %v3920_v35 }
 0x1dd   : > { %v5715_v38 = vpop.f32.mrf.mxu0 }
 0x1de   : > { %v5733_v41 = vpop.f32.mrf.mxu1  ;;  %v4054_v48 = vadd.f32 %v4049_v25, %v3981_v39 }
 0x1df   : > { %v4103_v42 = vpop.f32.mrf.mxu0 }
 0x1e0   : > { %v4110_v36 = vadd.f32 %v4103_v42, %v4053_v40  ;;  %v4283_v44 = vpop.f32.mrf.mxu1 }
 0x1e1   : > { %v5726_v45 = vpop.f32.mrf.mxu0 }
 0x1e2   : > { %v4112_v46 = vadd.f32 %v6900_v9, %v4110_v36  ;;  %v5744_v49 = vpop.f32.mrf.mxu1 }
 0x1e3   : > { %v4106_v50 = vpop.f32.mrf.mxu0 }
 0x1e4   : > { %5147 = vst [vmem:[%s6922_s8 + $0x60] sm:$0xff] %v4112_v46  ;;  %v4111_v53 = vadd.f32 %v4106_v50, %v4054_v48  ;;  %v4286_v54 = vpop.f32.mrf.mxu1 }
 0x1e5   : > { %v5727_v55 = vpop.f32.mrf.mxu0 }
 0x1e6   : > { %v4113_v58 = vadd.f32 %v6900_v9, %v4111_v53  ;;  %v5745_v60 = vpop.f32.mrf.mxu1 }
 0x1e7   : > { %v4228_v61 = vpop.f32.mrf.mxu0 }
 0x1e8   : > { %5148 = vst [vmem:[%s6922_s8 + $0x68] sm:$0xff] %v4113_v58  ;;  %v4413_v5 = vpop.f32.mrf.mxu1  ;;  %v4229_v56 = vadd.f32 %v4228_v61, %v4182_v32 }
 0x1e9   : > { %v5738_v62 = vpop.f32.mrf.mxu0 }
 0x1ea   : > { %v5756_v1 = vpop.f32.mrf.mxu1  ;;  %v4290_v52 = vadd.f32 %v4283_v44, %v4229_v56 }
 0x1eb   : > { %v4231_v63 = vpop.f32.mrf.mxu0 }
 0x1ec   : > { %v4416_v0 = vpop.f32.mrf.mxu1  ;;  %v4232_v7 = vadd.f32 %v4231_v63, %v4185_v37 }
 0x1ed   : > { %v5739_v3 = vpop.f32.mrf.mxu0 }
 0x1ee   : > { %v5757_v2 = vpop.f32.mrf.mxu1  ;;  %v4291_v14 = vadd.f32 %v4286_v54, %v4232_v7 }
 0x1ef   : > { %v4340_v4 = vpop.f32.mrf.mxu0 }
 0x1f0   : > { %v4531_v19 = vpop.f32.mrf.mxu1  ;;  %v4347_v8 = vadd.f32 %v4340_v4, %v4290_v52 }
 0x1f1   : > { %v5750_v57 = vpop.f32.mrf.mxu0 }
 0x1f2   : > { %v5768_v10 = vpop.f32.mrf.mxu1  ;;  %v4420_v16 = vadd.f32 %v4413_v5, %v4347_v8 }
 0x1f3   : > { %v4343_v43 = vpop.f32.mrf.mxu0 }
 0x1f4   : > { %v4534_v9 = vpop.f32.mrf.mxu1  ;;  %v4348_v15 = vadd.f32 %v4343_v43, %v4291_v14 }
 0x1f5   : > { %v5751_v12 = vpop.f32.mrf.mxu0 }
 0x1f6   : > { %v5769_v6 = vpop.f32.mrf.mxu1  ;;  %v4421_v59 = vadd.f32 %v4416_v0, %v4348_v15 }
 0x1f7   : > { %v4470_v47 = vpop.f32.mrf.mxu0 }
 0x1f8   : > { %v4661_v17 = vpop.f32.mrf.mxu1  ;;  %v4477_v21 = vadd.f32 %v4470_v47, %v4420_v16 }
 0x1f9   : > { %v5762_v18 = vpop.f32.mrf.mxu0 }
 0x1fa   : > { %v5780_v51 = vpop.f32.mrf.mxu1  ;;  %v4538_v25 = vadd.f32 %v4531_v19, %v4477_v21 }
 0x1fb   : > { %v4473_v20 = vpop.f32.mrf.mxu0 }
 0x1fc   : > { %v4664_v23 = vpop.f32.mrf.mxu1  ;;  %v4478_v22 = vadd.f32 %v4473_v20, %v4421_v59 }
 0x1fd   : > { %v5763_v11 = vpop.f32.mrf.mxu0 }
 0x1fe   : > { %v5781_v26 = vpop.f32.mrf.mxu1  ;;  %v4539_v31 = vadd.f32 %v4534_v9, %v4478_v22 }
 0x1ff   : > { %v4604_v27 = vpop.f32.mrf.mxu0 }
 0x200   : > { %v4611_v30 = vadd.f32 %v4604_v27, %v4538_v25 }
 0x201   : > { %v5774_v13 = vpop.f32.mrf.mxu0 }
 0x202   : > { %v4668_v24 = vadd.f32 %v4661_v17, %v4611_v30 }
 0x203   : > { %v4607_v32 = vpop.f32.mrf.mxu0 }
 0x204   : > { %v4670_v33 = vadd.f32 %v5946_v29, %v4668_v24  ;;  %v4612_v34 = vadd.f32 %v4607_v32, %v4539_v31 }
 0x205   : > { %v5775_v28 = vpop.f32.mrf.mxu0 }
 0x206   : > { %5195 = vst [vmem:[%s6922_s8 + $0x70] sm:$0xff] %v4670_v33  ;;  %v4669_v35 = vadd.f32 %v4664_v23, %v4612_v34 }
 0x208   : > { %v4671_v37 = vadd.f32 %v5946_v29, %v4669_v35 }
 0x20a   : > { %5196 = vst [vmem:[%s6922_s8 + $0x78] sm:$0xff] %v4671_v37 }
 0x20b   : > { %5960 = shalt.err (!%p5957_p6)
}
 0x20c   : > { %s5961_s21 = scalar_lea.hbm %s7098_s24, 2048  ;;  %s5965_s7 = scalar_lea.hbm %s7159_s3, 8192 }
 0x20d   : > { %p5962_p7 = scmp.ne.s32.totalorder %s7098_s24, %s5961_s21  ;;  %p5966_p11 = scmp.lt.s32.totalorder %s7098_s24, %s7159_s3 }
 0x20e   : > { %p5967_p12 = scmp.lt.s32.totalorder %s5965_s7, %s5961_s21 }
 0x20f   : > { %p5963_p9 = pnand %p5962_p7, %p6117_p3 }
 0x210   : > { %p5968_p13 = por %p5967_p12, %p5966_p11 }
 0x211   : > { %p5964_p10 = pneg %p5963_p9 }
 0x213   : > { %p5969_p0 = pnand %p5968_p13, %p5964_p10 }
 0x215   : > { %5972 = shalt.err (!%p5969_p0)
}
 0x216   : > { %s6044_s11 = smov 128   ;;  %s6045_s15 = smov 8  }
 0x217   : > { %5783 = dma.vmem_to_hbm [thread:$0]  (%p6117_p3), %s7100_s20, 2048, %s7098_s24, %s7105_s27, %s6044_s11, %s6044_s11, %s6045_s15  }
 0x218 PF: > { %p5789_p1 = scmp.ge.s32.totalorder %s6039_s19, 2  ;;  %s4707_s16 = sand.u32 1, %s6011_s12  }
 0x219   : > { %s4708_s29 = scalar_lea.sflag [#allocation3], %s4707_s16 }
 0x21a   : > { %p5786_p2 = pnand %p5789_p1, %p6126_p8 }
 0x21c   : > { %p5787_p4 = pneg %p5786_p2 }
 0x21e   : > { %6006 = dma.done.wait (%p5787_p4), %s4708_s29, 2048  }
 0x21f   : > { %6008 = vsyncadd (%p5787_p4), %s4708_s29, 4294965248  ;;  %s16_s19 = sadd.s32 1, %s6039_s19   ;;  %s7162_s12 = smov %s6015_s13 }
 0x220   : > { %p13_p5 = scmp.ge.s32.totalorder %s16_s19, 6   ;;  %s7163_s13 = smov %s6019_s14 }
 0x221   : > { %s7164_s14 = smov %s6135_s30  ;;  %s7165_s15 = smov %s6031_s17 }
 0x222   : > { %s7166_s16 = smov %s6035_s18  ;;  %s7167_s17 = smov %s7170_s22 }
 0x223   : > { %s7168_s18 = smov %s7174_s23  ;;  %15 = sbr.rel (!%p13_p5) target bundleno = 5 (0x5), region = 92 }
 0x228   :  { %4713 = vsyncpa [#allocation3], 1 }
 0x229   :  { %4715 = vsyncpa [#allocation3 + $0x1], 1 }

</bundles_post_ra>
